<compile_context>
chip_gen: v6e
topology: v6e:2x2x1
jax: 0.10.0
libtpu: 0.0.40
codegen_flags: <defaults>
</compile_context>

<pallas_src>
import jax
import jax.numpy as jnp
from jax.experimental import pallas as pl
from jax.experimental.pallas import tpu as pltpu


def _spatial_attention_kernel(x_ref, m_ref, b_ref, o_ref):
    # x_ref/o_ref: (Nb, C, HW) VMEM;  m_ref: (2, HW, HW) VMEM;  b_ref: (1,) SMEM.
    _, C, _ = x_ref.shape

    # Fused channel-wise max + sum: one VMEM read per channel feeds both.
    x0 = x_ref[:, 0, :].astype(jnp.float32)
    mx = x0
    sm = x0
    for c in range(1, C):
        xc = x_ref[:, c, :].astype(jnp.float32)
        mx = jnp.maximum(mx, xc)
        sm = sm + xc
    av = sm * (1.0 / C)                                   # mean over channels

    # 7x7 zero-padded conv over the two pooled maps, as two MXU matmuls against
    # the precomputed banded matrices (full f32 precision on the MXU).
    logits = (
        jnp.dot(mx, m_ref[0], preferred_element_type=jnp.float32,
                precision=jax.lax.Precision.HIGHEST)
        + jnp.dot(av, m_ref[1], preferred_element_type=jnp.float32,
                  precision=jax.lax.Precision.HIGHEST)
        + b_ref[0]
    )
    att = jax.nn.sigmoid(logits)                          # (Nb, HW)

    # Lane-dense rescale: broadcast attention over the channel (sublane) axis.
    o_ref[...] = (x_ref[...].astype(jnp.float32) * att[:, None, :]).astype(o_ref.dtype)


def _conv7x7_as_matrix(conv_w, H, W):
    """Conv2d(2,1,7,pad=3) OIHW weight -> M (2, HW, HW) with
    logits = max_map @ M[0] + avg_map @ M[1] (flattened row-major spatial)."""
    HW = H * W
    w = conv_w.reshape(2, 7, 7).astype(jnp.float32)
    idx = jnp.arange(HW, dtype=jnp.int32)
    y, x = idx // W, idx % W
    # rows of M index the source pixel q, columns index the output pixel p
    dy = y[:, None] - y[None, :] + 3
    dx = x[:, None] - x[None, :] + 3
    valid = (dy >= 0) & (dy < 7) & (dx >= 0) & (dx < 7)
    taps = w[:, jnp.clip(dy, 0, 6), jnp.clip(dx, 0, 6)]   # (2, HW, HW)
    return jnp.where(valid[None], taps, 0.0)


def _pick_images_per_step(N, per_image_bytes, vmem_bytes):
    """Batch images per grid step to a few MiB of block, keep >= 2 grid steps
    (feeds both v7x TensorCores), and keep the grid exact (no ragged block)."""
    target = max(per_image_bytes, min(4 << 20, vmem_bytes // 16))
    nb = max(1, min(N, target // per_image_bytes))
    if N >= 2:
        nb = min(nb, -(-N // 2))      # ceil(N/2): at least 2 grid steps
    while N % nb:
        nb -= 1
    return int(nb)


def spatial_attention(x, conv_w, conv_b):
    """x: (N, C, H, W); conv_w: (1, 2, 7, 7); conv_b: (1,)."""
    N, C, H, W = x.shape
    HW = H * W

    x_flat = x.reshape(N, C, HW)                     # lane-dense: HW on the lane axis
    conv_mat = _conv7x7_as_matrix(conv_w, H, W)      # (2, HW, HW) f32
    bias = conv_b.reshape(1).astype(jnp.float32)

    try:
        vmem_bytes = int(pltpu.get_tpu_info().vmem_capacity_bytes)
    except Exception:
        vmem_bytes = 64 << 20                        # v7x per-core VMEM (most restrictive)

    per_image_bytes = C * HW * jnp.dtype(x.dtype).itemsize
    nb = _pick_images_per_step(N, per_image_bytes, vmem_bytes)
    grid = (N // nb,)

    block_bytes = nb * per_image_bytes
    m_bytes = 2 * HW * HW * 4
    # double-buffered in + out blocks, resident conv matrix, plus slack
    needed = 4 * block_bytes + 2 * m_bytes + (4 << 20)
    vmem_limit = int(min(max(needed, 32 << 20), 48 << 20))

    out_flat = pl.pallas_call(
        _spatial_attention_kernel,
        out_shape=jax.ShapeDtypeStruct((N, C, HW), x.dtype),
        grid_spec=pltpu.PrefetchScalarGridSpec(
            num_scalar_prefetch=0,
            grid=grid,
            in_specs=[
                pl.BlockSpec((nb, C, HW), lambda n: (n, 0, 0)),     # x block
                pl.BlockSpec((2, HW, HW), lambda n: (0, 0, 0)),     # conv matrix (resident)
                pl.BlockSpec(memory_space=pltpu.MemorySpace.SMEM),  # bias scalar
            ],
            out_specs=pl.BlockSpec((nb, C, HW), lambda n: (n, 0, 0)),
        ),
        compiler_params=pltpu.CompilerParams(
            dimension_semantics=("parallel",),
            vmem_limit_bytes=vmem_limit,
        ),
    )(x_flat, conv_mat, bias)

    return out_flat.reshape(N, C, H, W)


def _reference(x, conv_w, conv_b):
    """Pure-JAX reference matching the PyTorch forward."""
    mx = jnp.max(x, axis=1, keepdims=True)
    av = jnp.mean(x, axis=1, keepdims=True)
    cat = jnp.concatenate([mx, av], axis=1)
    conv = jax.lax.conv_general_dilated(
        cat, conv_w, window_strides=(1, 1), padding=[(3, 3), (3, 3)],
        dimension_numbers=("NCHW", "OIHW", "NCHW"),
        precision=jax.lax.Precision.HIGHEST)
    att = jax.nn.sigmoid(conv + conv_b.reshape(1, 1, 1, 1))
    return x * att


if __name__ == "__main__":
    key = jax.random.PRNGKey(0)
    kx, kw, kb = jax.random.split(key, 3)

    N, C, H, W = 2, 4, 16, 16
    x = jax.random.normal(kx, (N, C, H, W), dtype=jnp.float32)

    # Deterministic synthetic parameters (Conv2d(2, 1, 7) weight/bias shapes).
    conv_w = 0.1 * jax.random.normal(kw, (1, 2, 7, 7), dtype=jnp.float32)
    conv_b = 0.1 * jax.random.normal(kb, (1,), dtype=jnp.float32)

    out = jax.block_until_ready(spatial_attention(x, conv_w, conv_b))
    ref = jax.block_until_ready(_reference(x, conv_w, conv_b))

    assert out.shape == (N, C, H, W)
    assert jnp.allclose(out, ref, atol=1e-4, rtol=1e-4), "mismatch vs reference"

    print("KERNEL_OK")
</pallas_src>

<mosaic_0001>
module attributes {stable_mosaic.version = 11 : i64} {
  func.func @_spatial_attention_kernel(%arg0: i32, %arg1: memref<1x4x256xf32, #tpu.memory_space<vmem>>, %arg2: memref<2x256x256xf32, #tpu.memory_space<vmem>>, %arg3: memref<1xf32, #tpu.memory_space<smem>>, %arg4: memref<1x4x256xf32, #tpu.memory_space<vmem>>) attributes {dimension_semantics = [#tpu.dimension_semantics<parallel>], iteration_bounds = array<i64: 2>, scalar_prefetch = 0 : i64, scratch_operands = 0 : i64, tpu.core_type = #tpu.core_type<tc>, window_params = [{transform_indices = @transform_0, window_bounds = array<i64: 1, 4, 256>}, {pipeline_mode = #tpu.pipeline_mode<synchronous>, transform_indices = @transform_1, window_bounds = array<i64: 2, 256, 256>}, {transform_indices = @transform_2, window_bounds = array<i64: 1>}, {transform_indices = @transform_3, window_bounds = array<i64: 1, 4, 256>}]} {
    %c0 = arith.constant 0 : index
    %c0_0 = arith.constant 0 : index
    %c0_1 = arith.constant 0 : index
    %0 = vector.load %arg1[%c0, %c0_0, %c0_1] : memref<1x4x256xf32, #tpu.memory_space<vmem>>, vector<1x1x256xf32>
    %1 = vector.shape_cast %0 : vector<1x1x256xf32> to vector<1x256xf32>
    %c0_2 = arith.constant 0 : index
    %c1 = arith.constant 1 : index
    %c0_3 = arith.constant 0 : index
    %2 = vector.load %arg1[%c0_2, %c1, %c0_3] : memref<1x4x256xf32, #tpu.memory_space<vmem>>, vector<1x1x256xf32>
    %3 = vector.shape_cast %2 : vector<1x1x256xf32> to vector<1x256xf32>
    %4 = arith.maximumf %1, %3 : vector<1x256xf32>
    %5 = arith.addf %1, %3 : vector<1x256xf32>
    %c0_4 = arith.constant 0 : index
    %c2 = arith.constant 2 : index
    %c0_5 = arith.constant 0 : index
    %6 = vector.load %arg1[%c0_4, %c2, %c0_5] : memref<1x4x256xf32, #tpu.memory_space<vmem>>, vector<1x1x256xf32>
    %7 = vector.shape_cast %6 : vector<1x1x256xf32> to vector<1x256xf32>
    %8 = arith.maximumf %4, %7 : vector<1x256xf32>
    %9 = arith.addf %5, %7 : vector<1x256xf32>
    %c0_6 = arith.constant 0 : index
    %c3 = arith.constant 3 : index
    %c0_7 = arith.constant 0 : index
    %10 = vector.load %arg1[%c0_6, %c3, %c0_7] : memref<1x4x256xf32, #tpu.memory_space<vmem>>, vector<1x1x256xf32>
    %11 = vector.shape_cast %10 : vector<1x1x256xf32> to vector<1x256xf32>
    %12 = arith.maximumf %8, %11 : vector<1x256xf32>
    %13 = arith.addf %9, %11 : vector<1x256xf32>
    %cst = arith.constant 2.500000e-01 : f32
    %14 = vector.broadcast %cst : f32 to vector<1x256xf32>
    %15 = arith.mulf %13, %14 : vector<1x256xf32>
    %c0_8 = arith.constant 0 : index
    %c0_9 = arith.constant 0 : index
    %c0_10 = arith.constant 0 : index
    %16 = vector.load %arg2[%c0_8, %c0_9, %c0_10] : memref<2x256x256xf32, #tpu.memory_space<vmem>>, vector<1x256x256xf32>
    %17 = vector.shape_cast %16 : vector<1x256x256xf32> to vector<256x256xf32>
    %cst_11 = arith.constant dense<0.000000e+00> : vector<1x256xf32>
    %18 = tpu.matmul %12, %17, %cst_11 {dimension_numbers = #tpu.dot_dimension_numbers<[1], [0], [0], [1], [0, 0, 1, 1], [], []>, precision = #tpu.contract_precision<fp32>} : vector<1x256xf32>, vector<256x256xf32>, vector<1x256xf32> -> vector<1x256xf32>
    %c1_12 = arith.constant 1 : index
    %c0_13 = arith.constant 0 : index
    %c0_14 = arith.constant 0 : index
    %19 = vector.load %arg2[%c1_12, %c0_13, %c0_14] : memref<2x256x256xf32, #tpu.memory_space<vmem>>, vector<1x256x256xf32>
    %20 = vector.shape_cast %19 : vector<1x256x256xf32> to vector<256x256xf32>
    %cst_15 = arith.constant dense<0.000000e+00> : vector<1x256xf32>
    %21 = tpu.matmul %15, %20, %cst_15 {dimension_numbers = #tpu.dot_dimension_numbers<[1], [0], [0], [1], [0, 0, 1, 1], [], []>, precision = #tpu.contract_precision<fp32>} : vector<1x256xf32>, vector<256x256xf32>, vector<1x256xf32> -> vector<1x256xf32>
    %22 = arith.addf %18, %21 : vector<1x256xf32>
    %c0_16 = arith.constant 0 : index
    %23 = memref.load %arg3[%c0_16] : memref<1xf32, #tpu.memory_space<smem>>
    %24 = vector.broadcast %23 : f32 to vector<1x256xf32>
    %25 = arith.addf %22, %24 : vector<1x256xf32>
    %26 = arith.negf %25 : vector<1x256xf32>
    %27 = math.exp %26 : vector<1x256xf32>
    %cst_17 = arith.constant 1.000000e+00 : f32
    %28 = vector.broadcast %cst_17 : f32 to vector<1x256xf32>
    %29 = arith.addf %28, %27 : vector<1x256xf32>
    %30 = arith.divf %28, %29 : vector<1x256xf32>
    %c0_18 = arith.constant 0 : index
    %c0_19 = arith.constant 0 : index
    %c0_20 = arith.constant 0 : index
    %31 = vector.load %arg1[%c0_18, %c0_19, %c0_20] : memref<1x4x256xf32, #tpu.memory_space<vmem>>, vector<1x4x256xf32>
    %32 = vector.shape_cast %30 : vector<1x256xf32> to vector<1x1x256xf32>
    %33 = vector.broadcast %32 : vector<1x1x256xf32> to vector<1x4x256xf32>
    %34 = arith.mulf %31, %33 : vector<1x4x256xf32>
    %c0_21 = arith.constant 0 : index
    %c0_22 = arith.constant 0 : index
    %c0_23 = arith.constant 0 : index
    %35 = vector.load %arg4[%c0_21, %c0_22, %c0_23] : memref<1x4x256xf32, #tpu.memory_space<vmem>>, vector<1x4x256xf32>
    tpu.vector_store %arg4[%c0_21, %c0_22, %c0_23], %34 {strides = array<i32>} : memref<1x4x256xf32, #tpu.memory_space<vmem>>, vector<1x4x256xf32>,
    return
  }
  func.func @transform_0(%arg0: i32) -> (i32, i32, i32) {
    %c0_i32 = arith.constant 0 : i32
    %c0_i32_0 = arith.constant 0 : i32
    %c0_i32_1 = arith.constant 0 : i32
    return %arg0, %c0_i32, %c0_i32_0 : i32, i32, i32
  }
  func.func @transform_1(%arg0: i32) -> (i32, i32, i32) {
    %c0_i32 = arith.constant 0 : i32
    %c0_i32_0 = arith.constant 0 : i32
    %c0_i32_1 = arith.constant 0 : i32
    %c0_i32_2 = arith.constant 0 : i32
    return %c0_i32, %c0_i32_0, %c0_i32_1 : i32, i32, i32
  }
  func.func @transform_2(%arg0: i32) -> i32 {
    %c0_i32 = arith.constant 0 : i32
    %c0_i32_0 = arith.constant 0 : i32
    return %c0_i32 : i32
  }
  func.func @transform_3(%arg0: i32) -> (i32, i32, i32) {
    %c0_i32 = arith.constant 0 : i32
    %c0_i32_0 = arith.constant 0 : i32
    %c0_i32_1 = arith.constant 0 : i32
    return %arg0, %c0_i32, %c0_i32_0 : i32, i32, i32
  }
}

</mosaic_0001>

<bundles_post_ra>
// kernel: tpu_custom_call.1
= control target key start
LH: loop header
LB: loop body
LE: loop exit
PB: predicated region body
PF: predicated region fallthrough
CT: control target
= control target key end

     0   :  { %s5905_s0 = inlined_call_operand.hbm [shape: f32[2,4,256], index: 0, kind: input, shape index: {}]   ;;  %s5906_s1 = inlined_call_operand.hbm [shape: f32[2,256,256], index: 1, kind: input, shape index: {}]   ;;  %s5907_s2 = inlined_call_operand.<no memory space> [shape: f32[1], index: 2, kind: input, shape index: {}]   ;;  %s5908_s3 = inlined_call_operand.hbm [shape: f32[2,4,256], index: 3, kind: output, shape index: {}]  }
   0x1   :  { %8 = sst [smem:[#allocation2]] %s5907_s2 }
   0x2   :  { %9 = vsyncpa [#allocation4], 0 }
   0x3   :  { %11 = vsyncpa [#allocation4 + $0x1], 0 }
   0x4   :  { %12 = vsyncpa [#allocation7], 0 }
   0x5   :  { %13 = vsyncpa [#allocation5], 0 }
   0x6   :  { %15 = vsyncpa [#allocation5 + $0x1], 0  ;;  %s3304_s14 = smov 0   ;;  %s3306_s15 = smov 0  }
   0x7   :  { %s3308_s16 = smov 0   ;;  %s3310_s17 = smov 0  }
   0x8 LB: > { %s3325_s2 = sadd.s32 4294967295, %s3274_s17   ;;  %s3062_s18 = sadd.s32 4294967294, %s3274_s17   ;;  %s3274_s17 = sphi %s3310_s17, %s7133_s17   ;;  %s3270_s16 = sphi %s3308_s16, %s7132_s16   ;;  %s3266_s15 = sphi %s3306_s15, %s7131_s15   ;;  %s3262_s14 = sphi %s3304_s14, %s7130_s14  }
   0x9   : > { %p41_p0 = scmp.ne.s32.totalorder %s3266_s15, %s3262_s14  ;;  %p5909_p1 = scmp.eq.s32.totalorder %s3325_s2, 0 }
   0xa   : > { %p113_p3 = scmp.eq.s32.totalorder %s3062_s18, 1  ;;  %p3063_p5 = scmp.ge.s32.totalorder %s3274_s17, 1 }
   0xb   : > { %p3334_p4 = por %p5909_p1, %p41_p0  ;;  %p120_p7 = scmp.lt.s32.totalorder %s3274_s17, 3 }
   0xc   : > { %p3339_p6 = por %p113_p3, %p41_p0  ;;  %s3276_s22 = smov [#allocation6]  }
   0xd   : > { %s6331_s19 = scalar_select %p3334_p4, 1, 0 }
   0xe   : > { %s6332_s20 = scalar_select %p3339_p6, 1, 0 }
   0xf   : > { %p3344_p8 = pnand %p3063_p5, %p120_p7  ;;  %s132_s23 = sshll.u32 %s3276_s22, 4  ;;  %s133_s23 = int_to_ptr.vmem [resolvable:$true] %s132_s23 }
  0x10   : > { %s3358_s25 = sadd.s32 1, %s3274_s17   ;;  %s28_s26 = sadd.s32 1, %s3270_s16 }
  0x11   : > { %s6333_s21 = scalar_select %p3344_p8, 1, 0 }
  0x12   : > { %p3093_p9 = pneg %p3344_p8  ;;  %s25_s27 = ssub.s32 %s3274_s17, %s3358_s25 }
  0x13   : > { %s3163_s28 = scalar_lea.vmem %s133_s23, 16384  ;;  %p3171_p5 = scmp.lt.s32.totalorder %s133_s23, %s133_s23 }
  0x14   : > { %p3353_p11 = pnand %p3093_p9, %p5909_p1  ;;  %p3164_p13 = scmp.ne.s32.totalorder %s133_s23, %s3163_s28 }
  0x15   : > { %p3172_p7 = scmp.lt.s32.totalorder %s3163_s28, %s3163_s28 }
  0x16   : > { %p3154_p12 = pneg %p3353_p11 }
  0x17   : > { %p3173_p10 = por %p3172_p7, %p3171_p5 }
  0x18   : > { %p3166_p0 = pnand %p3164_p13, %p3154_p12 }
  0x1a   : > { %p3167_p3 = pneg %p3166_p0 }
  0x1c   : > { %p3174_p2 = pnand %p3173_p10, %p3167_p3 }
  0x1e   : > { %3177 = shalt.err (!%p3174_p2)
}
  0x1f   : > { %s3277_s29 = smov 256   ;;  %s3278_s30 = smov 16  }
  0x20   : > { %3096 = dma.hbm_to_vmem [thread:$0]  (!%p3353_p11), %s5906_s1, 16384, %s133_s23, [#allocation7], %s3277_s29, %s3277_s29, %s3278_s30  }
  0x21   : > { %p26_p9 = scmp.eq.s32.totalorder %s25_s27, 0  ;;  %p35_p12 = scmp.ne.s32.totalorder %s3270_s16, %s3266_s15 }
  0x22   : > { %p36_p10 = scmp.eq.s32.totalorder %s3274_s17, 0  ;;  %p3106_p2 = scmp.lt.s32.totalorder %s3274_s17, 2 }
  0x23   : > { %s3375_s6 = scalar_select %p26_p9, %s3270_s16, %s28_s26  }
  0x24   : > { %p37_p13 = por %p36_p10, %p35_p12  ;;  %p6335_p0 = scmp.eq.s32.totalorder %s3325_s2, 1 }
  0x25   : > { %s149_s8 = sand.u32 1, %s3270_s16   ;;  %s3083_s9 = sshll.u32 %s3274_s17, 7 }
  0x26   : > { %p3379_p3 = por %p6335_p0, %p35_p12  ;;  %s3066_s10 = sshll.u32 %s149_s8, 3 }
  0x27   : > { %s3388_s13 = scalar_lea.hbm %s5905_s0, %s3083_s9  ;;  %s153_s18 = scalar_lea.vmem [#allocation3], %s3066_s10 }
  0x28   : > { %s6336_s7 = scalar_select %p3379_p3, 1, 0 }
  0x29   : > { %s161_s22 = sshll.u32 %s153_s18, 4  ;;  %p3390_p11 = pnand %p3106_p2, %p37_p13  ;;  %s162_s22 = int_to_ptr.vmem [resolvable:$true] %s161_s22 }
  0x2a   : > { %s150_s24 = scalar_lea.sflag [#allocation4], %s149_s8  ;;  %s3178_s26 = scalar_lea.hbm %s3388_s13, 128 }
  0x2b   : > { %p3179_p5 = scmp.ne.s32.totalorder %s3388_s13, %s3178_s26  ;;  %p3180_p7 = pneg %p3390_p11 }
  0x2c   : > { %s3183_s29 = scalar_lea.hbm %s5905_s0, 256  ;;  %p3184_p10 = scmp.lt.s32.totalorder %s3388_s13, %s5905_s0 }
  0x2d   : > { %p3181_p9 = pnand %p3180_p7, %p3179_p5  ;;  %p3185_p2 = scmp.lt.s32.totalorder %s3183_s29, %s3178_s26 }
  0x2f   : > { %p3182_p12 = pneg %p3181_p9  ;;  %p3186_p13 = por %p3185_p2, %p3184_p10 }
  0x31   : > { %p3187_p0 = pnand %p3186_p13, %p3182_p12 }
  0x33   : > { %3190 = shalt.err (!%p3187_p0)
}
  0x34   : > { %s3191_s5 = scalar_lea.vmem %s162_s22, 128  ;;  %s3279_s8 = smov [#allocation3]  }
  0x35   : > { %p3192_p1 = scmp.ne.s32.totalorder %s162_s22, %s3191_s5  ;;  %s3196_s9 = sshll.u32 %s3279_s8, 4  ;;  %s3197_s9 = int_to_ptr.vmem [resolvable:$false] %s3196_s9 }
  0x36   : > { %s3198_s10 = scalar_lea.vmem %s3197_s9, 256  ;;  %p3199_p5 = scmp.lt.s32.totalorder %s162_s22, %s3197_s9 }
  0x37   : > { %p3194_p6 = pnand %p3192_p1, %p3180_p7  ;;  %p3200_p9 = scmp.lt.s32.totalorder %s3198_s10, %s3191_s5 }
  0x39   : > { %p3195_p3 = pneg %p3194_p6  ;;  %p3201_p4 = por %p3200_p9, %p3199_p5 }
  0x3b   : > { %p3202_p8 = pnand %p3201_p4, %p3195_p3 }
  0x3d   : > { %3205 = shalt.err (!%p3202_p8)
}
  0x3e   : > { %3100 = dma.hbm_to_vmem [thread:$0]  (!%p3390_p11), %s3388_s13, 128, %s162_s22, %s150_s24  }
  0x3f   : > { %p6338_p12 = scmp.ne.s32.totalorder %s6333_s21, 0 }
  0x41   : > { %170 = sbr.rel (%p6338_p12) target bundleno = 764 (0x2fc), region = 32 }
  0x46   : > { %s3411_s11 = sand.u32 1, %s3266_s15   ;;  %p6339_p1 = scmp.ne.s32.totalorder %s6331_s19, 0 }
  0x47   : > { %s3070_s12 = sshll.u32 %s3411_s11, 3  ;;  %s173_s18 = scalar_lea.sflag [#allocation4], %s3411_s11 }
  0x48   : > { %s3417_s26 = scalar_lea.vmem [#allocation3], %s3070_s12 }
  0x49   : > { %3249 = dma.done.wait (%p6339_p1), %s173_s18, 128  }
  0x4a   : > { %3251 = vsyncadd (%p6339_p1), %s173_s18, 4294967168  ;;  %p6340_p4 = scmp.eq.s32.totalorder %s3325_s2, 0 }
  0x4c   : > { %3253 = dma.done.wait (%p6340_p4), [#allocation7], 16384   ;;  %p6341_p6 = pmov %p6340_p4 }
  0x4d   : > { %v347_v0 = vlaneseq  ;;  %v313_v2 = vld [vmem:[#allocation6 + $0x2f8] sm:$0xff]  ;;  %v312_v3 = vld [vmem:[#allocation6 + $0x2f0] sm:$0xff]  ;;  %v311_v4 = vld [vmem:[#allocation6 + $0x2e8] sm:$0xff]  ;;  %s2936_s19 = sld [smem:[#allocation2]]  ;;  %s3084_s21 = sshll.u32 %s3325_s2, 7 }
  0x4e   : > { %3255 = vsyncadd (%p6341_p6), [#allocation7], 4294950912  ;;  %v3433_v7 = vand.u32 4294901760, %v313_v2  ;;  %v3435_v8 = vand.u32 4294901760, %v312_v3  ;;  %v3437_v9 = vand.u32 4294901760, %v311_v4  ;;  %v310_v10 = vld [vmem:[#allocation6 + $0x2e0] sm:$0xff]  ;;  %s2980_s27 = scalar_lea.hbm %s5908_s3, %s3084_s21 }
  0x4f   : > { %v3427_v1 = vshrl.u32 %v347_v0, 7  ;;  %v309_v11 = vld [vmem:[#allocation6 + $0x2d8] sm:$0xff]  ;;  %v308_v12 = vld [vmem:[#allocation6 + $0x2d0] sm:$0xff]  ;;  %v3439_v13 = vand.u32 4294901760, %v310_v10  ;;  %v307_v16 = vld [vmem:[#allocation6 + $0x2c8] sm:$0xff]  ;;  %s202_s13 = scalar_lea.vmem [#allocation8], %s3070_s12 }
  0x50   : > { %v3441_v14 = vand.u32 4294901760, %v309_v11  ;;  %v3443_v15 = vand.u32 4294901760, %v308_v12  ;;  %v306_v17 = vld [vmem:[#allocation6 + $0x2c0] sm:$0xff]  ;;  %v305_v18 = vld [vmem:[#allocation6 + $0x2b8] sm:$0xff]  ;;  %358 = vmatprep.subr.mxu0 %v3433_v7  ;;  %v3446_v19 = vand.u32 4294901760, %v307_v16  ;;  %v3453_v22 = vsub.f32 %v313_v2, %v3433_v7  ;;  %v3455_v23 = vld [vmem:[#allocation6 + $0x2b0] sm:$0xff] }
  0x51   : > { %6342 = vst [vmem:[#allocation12_spill] sm:$0xff] %v3427_v1  ;;  %v3430_v5 = vsub.s32 0, %v3427_v1  ;;  %v3448_v20 = vand.u32 4294901760, %v306_v17  ;;  %v3450_v21 = vand.u32 4294901760, %v305_v18  ;;  %v3457_v24 = vld [vmem:[#allocation6 + $0x2a8] sm:$0xff]  ;;  %v3459_v25 = vld [vmem:[#allocation6 + $0x2a0] sm:$0xff]  ;;  %360 = vmatpush1.msra.mxu0 %v3435_v8  ;;  %v3466_v27 = vsub.f32 %v312_v3, %v3435_v8 }
  0x52   : > { %v3463_v26 = vand.u32 4294901760, %v3455_v23  ;;  %v3469_v28 = vand.u32 4294901760, %v3457_v24  ;;  %v3472_v29 = vsub.f32 %v311_v4, %v3437_v9  ;;  %v3474_v30 = vld [vmem:[#allocation6 + $0x298] sm:$0xff]  ;;  %v3476_v31 = vld [vmem:[#allocation6 + $0x290] sm:$0xff]  ;;  %v3478_v32 = vld [vmem:[#allocation6 + $0x288] sm:$0xff]  ;;  %362 = vmatprep.subr.mxu0 %v3437_v9  ;;  %v5924_v33 = vand.u32 4294901760, %v3453_v22 }
  0x53   : > { %6343 = vst [vmem:[#allocation13_spill] sm:$0xff] %v3430_v5  ;;  %v3483_v34 = vand.u32 4294901760, %v3459_v25  ;;  %v3486_v35 = vsub.f32 %v310_v10, %v3439_v13  ;;  %v3489_v36 = vand.u32 4294901760, %v3474_v30  ;;  %364 = vmatpush1.msra.mxu0 %v3439_v13  ;;  %v5922_v37 = vand.u32 4294901760, %v3466_v27  ;;  %v3500_v41 = vld [vmem:[#allocation6 + $0x280] sm:$0xff]  ;;  %v3524_v50 = vld [vmem:[#allocation6 + $0x278] sm:$0xff] }
  0x54   : > { %v5921_v38 = vand.u32 4294901760, %v3472_v29  ;;  %v3495_v39 = vsub.f32 %v309_v11, %v3441_v14  ;;  %v3498_v40 = vand.u32 4294901760, %v3476_v31  ;;  %366 = vmatprep.subr.mxu0 %v3441_v14  ;;  %v505_v42 = vsub.f32 %v3453_v22, %v5924_v33  ;;  %v3534_v55 = vld [vmem:[#allocation6 + $0x270] sm:$0xff]  ;;  %v3541_v60 = vld [vmem:[#allocation6 + $0x268] sm:$0xff]  ;;  %v3553_v2 = vld [vmem:[#allocation6 + $0x260] sm:$0xff]  ;;  %s2982_s22 = sshll.u32 %s202_s13, 4  ;;  %s2983_s22 = int_to_ptr.vmem [resolvable:$true] %s2982_s22 }
  0x55   : > { %v5919_v43 = vand.u32 4294901760, %v3486_v35  ;;  %v3508_v44 = vsub.f32 %v308_v12, %v3443_v15  ;;  %v3511_v45 = vand.u32 4294901760, %v3478_v32  ;;  %368 = vmatpush1.msra.mxu0 %v3443_v15  ;;  %v511_v46 = vsub.f32 %v3466_v27, %v5922_v37  ;;  %v3565_v12 = vld [vmem:[#allocation6 + $0x258] sm:$0xff]  ;;  %v3656_v33 = vld [vmem:[#allocation6 + $0x228] sm:$0xff]  ;;  %v3666_v6 = vld [vmem:[#allocation6 + $0x220] sm:$0xff]  ;;  %s2968_s28 = scalar_lea.sflag [#allocation5], %s3411_s11 }
  0x56   : > { %v517_v47 = vsub.f32 %v3472_v29, %v5921_v38  ;;  %v5917_v48 = vand.u32 4294901760, %v3495_v39  ;;  %v3522_v49 = vsub.f32 %v307_v16, %v3446_v19  ;;  %370 = vmatprep.subr.mxu0 %v3446_v19  ;;  %v506_v51 = vand.u32 4294901760, %v505_v42  ;;  %v3643_v38 = vld [vmem:[#allocation6 + $0x230] sm:$0xff]  ;;  %s3206_s29 = scalar_lea.vmem %s2983_s22, 128  ;;  %p7127_p3 = scmp.ne.s32.totalorder %s6336_s7, 0 }
  0x57   : > { %6344 = vst [vmem:[#allocation14_spill] sm:$0xff] %v3511_v45  ;;  %v523_v52 = vsub.f32 %v3486_v35, %v5919_v43  ;;  %v5916_v53 = vand.u32 4294901760, %v3508_v44  ;;  %v3532_v54 = vand.u32 4294901760, %v3500_v41  ;;  %372 = vmatpush1.msra.mxu0 %v3448_v20  ;;  %v512_v56 = vand.u32 4294901760, %v511_v46  ;;  %p3207_p8 = scmp.ne.s32.totalorder %s2983_s22, %s3206_s29  ;;  %s3280_s30 = smov [#allocation8]  }
  0x58   : > { %v518_v57 = vand.u32 4294901760, %v517_v47  ;;  %v529_v58 = vsub.f32 %v3495_v39, %v5917_v48  ;;  %v5914_v59 = vand.u32 4294901760, %v3522_v49  ;;  %374 = vmatprep.subr.mxu0 %v3450_v21  ;;  %507 = vmatprep.subr.mxu1 %v506_v51  ;;  %v3548_v63 = vsub.f32 %v306_v17, %v3448_v20  ;;  %s3210_s4 = sshll.u32 %s3280_s30, 4  ;;  %s3211_s4 = int_to_ptr.vmem [resolvable:$false] %s3210_s4 }
  0x59   : > { %6345 = vst [vmem:[#allocation15_spill] sm:$0xff] %v3532_v54  ;;  %v524_v61 = vand.u32 4294901760, %v523_v52  ;;  %v535_v62 = vsub.f32 %v3508_v44, %v5916_v53  ;;  %v3551_v0 = vand.u32 4294901760, %v3524_v50  ;;  %376 = vmatpush1.msra.mxu0 %v3463_v26  ;;  %513 = vmatpush1.msra.mxu1 %v512_v56  ;;  %v3560_v10 = vsub.f32 %v305_v18, %v3450_v21  ;;  %v3576_v18 = vld [vmem:[#allocation6 + $0x250] sm:$0xff]  ;;  %v3622_v53 = vld [vmem:[#allocation6 + $0x240] sm:$0xff]  ;;  %p3208_p11 = pnand %p3207_p8, %p7127_p3  ;;  %s3212_s2 = scalar_lea.vmem %s3211_s4, 256 }
  0x5a   : > { %v530_v3 = vand.u32 4294901760, %v529_v58  ;;  %v541_v4 = vsub.f32 %v3522_v49, %v5914_v59  ;;  %v3563_v11 = vand.u32 4294901760, %v3534_v55  ;;  %378 = vmatprep.subr.mxu0 %v3469_v28  ;;  %519 = vmatprep.subr.mxu1 %v518_v57  ;;  %v5913_v17 = vand.u32 4294901760, %v3548_v63  ;;  %p3213_p10 = scmp.lt.s32.totalorder %s2983_s22, %s3211_s4  ;;  %p3214_p2 = scmp.lt.s32.totalorder %s3212_s2, %s3206_s29 }
  0x5b   : > { %6346 = vst [vmem:[#allocation16_spill] sm:$0xff] %v3551_v0  ;;  %v536_v16 = vand.u32 4294901760, %v535_v62  ;;  %v3571_v42 = vsub.f32 %v3455_v23, %v3463_v26  ;;  %v3574_v46 = vand.u32 4294901760, %v3541_v60  ;;  %380 = vmatpush1.msra.mxu0 %v3483_v34  ;;  %525 = vmatpush1.msra.mxu1 %v524_v61  ;;  %v5915_v51 = vand.u32 4294901760, %v3560_v10  ;;  %p3209_p7 = pneg %p3208_p11 }
  0x5c   : > { %6347 = vst [vmem:[#allocation17_spill] sm:$0xff] %v3563_v11  ;;  %v542_v47 = vand.u32 4294901760, %v541_v4  ;;  %v3582_v52 = vsub.f32 %v3457_v24, %v3469_v28  ;;  %v3585_v56 = vand.u32 4294901760, %v3553_v2  ;;  %382 = vmatprep.subr.mxu0 %v3489_v36  ;;  %531 = vmatprep.subr.mxu1 %v530_v3  ;;  %v547_v23 = vsub.f32 %v3548_v63, %v5913_v17  ;;  %v3599_v24 = vld [vmem:[#allocation6 + $0x248] sm:$0xff]  ;;  %p3215_p13 = por %p3214_p2, %p3213_p10 }
  0x5d   : > { %6348 = vst [vmem:[#allocation18_spill] sm:$0xff] %v3574_v46  ;;  %v5918_v57 = vand.u32 4294901760, %v3571_v42  ;;  %v3594_v58 = vsub.f32 %v3459_v25, %v3483_v34  ;;  %v3597_v61 = vand.u32 4294901760, %v3565_v12  ;;  %384 = vmatpush1.msra.mxu0 %v3498_v40  ;;  %537 = vmatpush1.msra.mxu1 %v536_v16  ;;  %v553_v62 = vsub.f32 %v3560_v10, %v5915_v51 }
  0x5e   : > { %6349 = vst [vmem:[#allocation19_spill] sm:$0xff] %v3585_v56  ;;  %v5920_v3 = vand.u32 4294901760, %v3582_v52  ;;  %v3608_v4 = vsub.f32 %v3474_v30, %v3489_v36  ;;  %v3611_v25 = vand.u32 4294901760, %v3576_v18  ;;  %386 = vmatprep.subr.mxu0 %v3511_v45  ;;  %543 = vmatprep.subr.mxu1 %v542_v47  ;;  %v548_v17 = vand.u32 4294901760, %v547_v23  ;;  %p3216_p0 = pnand %p3215_p13, %p3209_p7 }
  0x5f   : > { %6350 = vst [vmem:[#allocation20_spill] sm:$0xff] %v3597_v61  ;;  %v559_v16 = vsub.f32 %v3571_v42, %v5918_v57  ;;  %v5923_v59 = vand.u32 4294901760, %v3594_v58  ;;  %v3620_v51 = vsub.f32 %v3476_v31, %v3498_v40  ;;  %388 = vmatpush1.msra.mxu0 %v3532_v54  ;;  %v554_v30 = vand.u32 4294901760, %v553_v62  ;;  %v3632_v57 = vld [vmem:[#allocation6 + $0x238] sm:$0xff] }
  0x60   : > { %6351 = vst [vmem:[#allocation21_spill] sm:$0xff] %v3608_v4  ;;  %6352 = vst [vmem:[#allocation22_spill] sm:$0xff] %v3611_v25  ;;  %v565_v47 = vsub.f32 %v3582_v52, %v5920_v3  ;;  %v5925_v23 = vand.u32 4294901760, %v3608_v4  ;;  %v3630_v48 = vand.u32 4294901760, %v3599_v24  ;;  %549 = vmatpush1.msra.mxu1 %v548_v17  ;;  %390 = vmatprep.subr.mxu0 %v3551_v0 }
  0x61   : > { %6353 = vst [vmem:[#allocation23_spill] sm:$0xff] %v3620_v51  ;;  %v560_v31 = vand.u32 4294901760, %v559_v16  ;;  %v571_v43 = vsub.f32 %v3594_v58, %v5923_v59  ;;  %v5928_v62 = vand.u32 4294901760, %v3620_v51  ;;  %v3641_v3 = vsub.f32 %v3478_v32, %v3511_v45  ;;  %555 = vmatprep.subr.mxu1 %v554_v30  ;;  %392 = vmatpush1.msra.mxu0 %v3563_v11 }
  0x62   : > { %6354 = vst [vmem:[#allocation24_spill] sm:$0xff] %v3630_v48  ;;  %v566_v37 = vand.u32 4294901760, %v565_v47  ;;  %v577_v17 = vsub.f32 %v3608_v4, %v5925_v23  ;;  %v3650_v16 = vand.u32 4294901760, %v3622_v53  ;;  %v3654_v59 = vsub.f32 %v3500_v41, %v3532_v54  ;;  %394 = vmatprep.subr.mxu0 %v3574_v46 }
  0x63   : > { %6355 = vst [vmem:[#allocation25_spill] sm:$0xff] %v3641_v3  ;;  %561 = vmatpush1.msra.mxu1 %v560_v31  ;;  %v572_v32 = vand.u32 4294901760, %v571_v43  ;;  %v583_v30 = vsub.f32 %v3620_v51, %v5928_v62  ;;  %v3664_v23 = vand.u32 4294901760, %v3632_v57  ;;  %396 = vmatpush1.msra.mxu0 %v3585_v56  ;;  %v3672_v43 = vsub.f32 %v3524_v50, %v3551_v0  ;;  %v3677_v62 = vld [vmem:[#allocation6 + $0x218] sm:$0xff] }
  0x64   : > { %6356 = vst [vmem:[#allocation26_spill] sm:$0xff] %v3650_v16  ;;  %6357 = vst [vmem:[#allocation27_spill] sm:$0xff] %v3654_v59  ;;  %567 = vmatprep.subr.mxu1 %v566_v37  ;;  %v578_v41 = vand.u32 4294901760, %v577_v17  ;;  %v5935_v31 = vand.u32 4294901760, %v3654_v59  ;;  %v3675_v54 = vand.u32 4294901760, %v3643_v38  ;;  %398 = vmatprep.subr.mxu0 %v3597_v61  ;;  %v6361_v37 = vand.u32 4294901760, %v3641_v3 }
  0x65   : > { %6358 = vst [vmem:[#allocation28_spill] sm:$0xff] %v3664_v23  ;;  %6359 = vst [vmem:[#allocation29_spill] sm:$0xff] %v3672_v43  ;;  %573 = vmatpush1.msra.mxu1 %v572_v32  ;;  %v584_v47 = vand.u32 4294901760, %v583_v30  ;;  %v3685_v17 = vsub.f32 %v3534_v55, %v3563_v11  ;;  %v3688_v50 = vand.u32 4294901760, %v3656_v33  ;;  %400 = vmatpush1.msra.mxu0 %v3611_v25  ;;  %v3702_v55 = vld [vmem:[#allocation6 + $0x210] sm:$0xff]  ;;  %v3711_v30 = vand.u32 4294901760, %v3677_v62 }
  0x66   : > { %6360 = vst [vmem:[#allocation30_spill] sm:$0xff] %v3675_v54  ;;  %v589_v51 = vsub.f32 %v3641_v3, %v6361_v37  ;;  %579 = vmatprep.subr.mxu1 %v578_v41  ;;  %v595_v32 = vsub.f32 %v3654_v59, %v5935_v31  ;;  %v3697_v0 = vsub.f32 %v3541_v60, %v3574_v46  ;;  %v3700_v37 = vand.u32 4294901760, %v3666_v6  ;;  %v3713_v60 = vld [vmem:[#allocation6 + $0x208] sm:$0xff] }
  0x67   : > { %6362 = vst [vmem:[#allocation31_spill] sm:$0xff] %v3685_v17  ;;  %6363 = vst [vmem:[#allocation32_spill] sm:$0xff] %v3688_v50  ;;  %585 = vmatpush1.msra.mxu1 %v584_v47  ;;  %402 = vmatprep.subr.mxu0 %v3630_v48  ;;  %v3708_v31 = vsub.f32 %v3553_v2, %v3585_v56  ;;  %v6368_v59 = vand.u32 4294901760, %v3672_v43  ;;  %v3722_v11 = vsub.f32 %v3565_v12, %v3597_v61 }
  0x68   : > { %6364 = vst [vmem:[#allocation33_spill] sm:$0xff] %v3697_v0  ;;  %6365 = vst [vmem:[#allocation34_spill] sm:$0xff] %v3700_v37  ;;  %v590_v41 = vand.u32 4294901760, %v589_v51  ;;  %404 = vmatpush1.msra.mxu0 %v3650_v16  ;;  %v596_v46 = vand.u32 4294901760, %v595_v32  ;;  %v6370_v2 = vand.u32 4294901760, %v3685_v17  ;;  %v3730_v32 = vand.u32 4294901760, %v3702_v55 }
  0x69   : > { %6366 = vst [vmem:[#allocation35_spill] sm:$0xff] %v3708_v31  ;;  %6367 = vst [vmem:[#allocation36_spill] sm:$0xff] %v3711_v30  ;;  %v601_v47 = vsub.f32 %v3672_v43, %v6368_v59  ;;  %406 = vmatprep.subr.mxu0 %v3664_v23  ;;  %v3734_v59 = vsub.f32 %v3576_v18, %v3611_v25  ;;  %v3736_v51 = vld [vmem:[#allocation6 + $0x200] sm:$0xff]  ;;  %v3744_v3 = vand.u32 4294901760, %v3713_v60  ;;  %v6375_v18 = vand.u32 4294901760, %v3708_v31 }
  0x6a   : > { %6369 = vst [vmem:[#allocation37_spill] sm:$0xff] %v3722_v11  ;;  %591 = vmatprep.subr.mxu1 %v590_v41  ;;  %v607_v56 = vsub.f32 %v3685_v17, %v6370_v2  ;;  %6371 = vst [vmem:[#allocation38_spill] sm:$0xff] %v3730_v32  ;;  %408 = vmatpush1.msra.mxu0 %v3675_v54  ;;  %v6373_v41 = vand.u32 4294901760, %v3697_v0  ;;  %v3746_v17 = vld [vmem:[#allocation6 + $0x3f8] sm:$0xff]  ;;  %v3755_v25 = vsub.f32 %v3599_v24, %v3630_v48 }
  0x6b   : > { %6372 = vst [vmem:[#allocation39_spill] sm:$0xff] %v3734_v59  ;;  %597 = vmatpush1.msra.mxu1 %v596_v46  ;;  %v602_v12 = vand.u32 4294901760, %v601_v47  ;;  %6374 = vst [vmem:[#allocation40_spill] sm:$0xff] %v3744_v3  ;;  %410 = vmatprep.subr.mxu0 %v3688_v50  ;;  %v619_v46 = vsub.f32 %v3708_v31, %v6375_v18  ;;  %v3764_v45 = vand.u32 4294901760, %v3736_v51  ;;  %v3770_v47 = vld [vmem:[#allocation6 + $0x3e8] sm:$0xff] }
  0x6c   : > { %v613_v61 = vsub.f32 %v3697_v0, %v6373_v41  ;;  %v608_v43 = vand.u32 4294901760, %v607_v56  ;;  %6376 = vst [vmem:[#allocation41_spill] sm:$0xff] %v3755_v25  ;;  %v3757_v41 = vld [vmem:[#allocation6 + $0x3f0] sm:$0xff]  ;;  %412 = vmatpush1.msra.mxu0 %v3700_v37  ;;  %v6377_v56 = vand.u32 4294901760, %v3722_v11  ;;  %v3768_v18 = vsub.f32 %v3622_v53, %v3650_v16 }
  0x6d   : > { %603 = vmatprep.subr.mxu1 %v602_v12  ;;  %6378 = vst [vmem:[#allocation42_spill] sm:$0xff] %v3764_v45  ;;  %v620_v24 = vand.u32 4294901760, %v619_v46  ;;  %414 = vmatprep.subr.mxu0 %v3711_v30  ;;  %v3786_v46 = vsub.f32 %v3632_v57, %v3664_v23  ;;  %v3789_v16 = vand.u32 4294901760, %v3757_v41  ;;  %v3802_v57 = vand.u32 4294901760, %v3770_v47 }
  0x6e   : > { %v614_v2 = vand.u32 4294901760, %v613_v61  ;;  %v625_v0 = vsub.f32 %v3722_v11, %v6377_v56  ;;  %6379 = vst [vmem:[#allocation43_spill] sm:$0xff] %v3768_v18  ;;  %609 = vmatpush1.msra.mxu1 %v608_v43  ;;  %v6380_v61 = vand.u32 4294901760, %v3734_v59  ;;  %v3778_v56 = vand.u32 4294901760, %v3746_v17  ;;  %v3780_v11 = vld [vmem:[#allocation6 + $0x3e0] sm:$0xff]  ;;  %416 = vmatpush1.msra.mxu0 %v3730_v32 }
  0x6f   : > { %6382 = vst [vmem:[#allocation45_spill] sm:$0xff] %v3786_v46  ;;  %6383 = vst [vmem:[#allocation46_spill] sm:$0xff] %v3789_v16  ;;  %418 = vmatprep.subr.mxu0 %v3744_v3  ;;  %v3799_v43 = vsub.f32 %v3643_v38, %v3675_v54  ;;  %v6387_v23 = vand.u32 4294901760, %v3768_v18  ;;  %v3816_v38 = vld [vmem:[#allocation6 + $0x3d0] sm:$0xff] }
  0x70   : > { %v631_v12 = vsub.f32 %v3734_v59, %v6380_v61  ;;  %6381 = vst [vmem:[#allocation44_spill] sm:$0xff] %v3778_v56  ;;  %615 = vmatprep.subr.mxu1 %v614_v2  ;;  %v626_v53 = vand.u32 4294901760, %v625_v0  ;;  %v3791_v61 = vld [vmem:[#allocation6 + $0x3d8] sm:$0xff]  ;;  %v6384_v2 = vand.u32 4294901760, %v3755_v25  ;;  %6386 = vst [vmem:[#allocation48_spill] sm:$0xff] %v3802_v57  ;;  %420 = vmatpush1.msra.mxu0 %v3764_v45 }
  0x71   : > { %621 = vmatpush1.msra.mxu1 %v620_v24  ;;  %6385 = vst [vmem:[#allocation47_spill] sm:$0xff] %v3799_v43  ;;  %v643_v24 = vsub.f32 %v3768_v18, %v6387_v23  ;;  %v3811_v59 = vsub.f32 %v3656_v33, %v3688_v50  ;;  %422 = vmatprep.subr.mxu0 %v3778_v56  ;;  %v3827_v33 = vld [vmem:[#allocation6 + $0x3c8] sm:$0xff]  ;;  %v6392_v18 = vand.u32 4294901760, %v3786_v46 }
  0x72   : > { %v632_v48 = vand.u32 4294901760, %v631_v12  ;;  %v637_v0 = vsub.f32 %v3755_v25, %v6384_v2  ;;  %627 = vmatprep.subr.mxu1 %v626_v53  ;;  %v3814_v2 = vand.u32 4294901760, %v3780_v11  ;;  %v5978_v53 = vand.u32 4294901760, %v3799_v43  ;;  %424 = vmatpush2.msra.mxu0 %v3789_v16 }
  0x73   : > { %6388 = vst [vmem:[#allocation49_spill] sm:$0xff] %v3811_v59  ;;  %v3822_v23 = vsub.f32 %v3666_v6, %v3700_v37  ;;  %v3825_v12 = vand.u32 4294901760, %v3791_v61  ;;  %v644_v50 = vand.u32 4294901760, %v643_v24  ;;  %v649_v25 = vsub.f32 %v3786_v46, %v6392_v18  ;;  %426 = vmatprep.subr.mxu0 %v3802_v57 }
  0x74   : > { %6389 = vst [vmem:[#allocation50_spill] sm:$0xff] %v3814_v2  ;;  %633 = vmatpush1.msra.mxu1 %v632_v48  ;;  %v638_v54 = vand.u32 4294901760, %v637_v0  ;;  %v3836_v0 = vsub.f32 %v3677_v62, %v3711_v30  ;;  %v655_v6 = vsub.f32 %v3799_v43, %v5978_v53  ;;  %v3844_v37 = vand.u32 4294901760, %v3816_v38  ;;  %v3850_v48 = vld [vmem:[#allocation6 + $0x3c0] sm:$0xff]  ;;  %428 = vmatpush2.msra.mxu0 %v3814_v2  ;;  %v3860_v43 = vld [vmem:[#allocation6 + $0x3b8] sm:$0xff] }
  0x75   : > { %6390 = vst [vmem:[#allocation51_spill] sm:$0xff] %v3822_v23  ;;  %6391 = vst [vmem:[#allocation52_spill] sm:$0xff] %v3825_v12  ;;  %v3848_v18 = vsub.f32 %v3702_v55, %v3730_v32  ;;  %v650_v62 = vand.u32 4294901760, %v649_v25  ;;  %v3858_v24 = vand.u32 4294901760, %v3827_v33  ;;  %v6398_v55 = vand.u32 4294901760, %v3822_v23  ;;  %430 = vmatprep.subr.mxu0 %v3825_v12 }
  0x76   : > { %6393 = vst [vmem:[#allocation53_spill] sm:$0xff] %v3836_v0  ;;  %639 = vmatprep.subr.mxu1 %v638_v54  ;;  %6394 = vst [vmem:[#allocation54_spill] sm:$0xff] %v3844_v37  ;;  %v6396_v54 = vand.u32 4294901760, %v3811_v59  ;;  %v656_v46 = vand.u32 4294901760, %v655_v6  ;;  %432 = vmatpush2.msra.mxu0 %v3844_v37  ;;  %v3882_v25 = vsub.f32 %v3736_v51, %v3764_v45  ;;  %v3905_v45 = vld [vmem:[#allocation6 + $0x398] sm:$0xff] }
  0x77   : > { %6395 = vst [vmem:[#allocation55_spill] sm:$0xff] %v3848_v18  ;;  %645 = vmatpush1.msra.mxu1 %v644_v50  ;;  %6397 = vst [vmem:[#allocation56_spill] sm:$0xff] %v3858_v24  ;;  %v667_v32 = vsub.f32 %v3822_v23, %v6398_v55  ;;  %v3869_v50 = vsub.f32 %v3713_v60, %v3744_v3  ;;  %v3878_v55 = vand.u32 4294901760, %v3850_v48  ;;  %v3884_v23 = vld [vmem:[#allocation6 + $0x3a8] sm:$0xff]  ;;  %434 = vmatprep.subr.mxu0 %v3858_v24 }
  0x78   : > { %v661_v30 = vsub.f32 %v3811_v59, %v6396_v54  ;;  %v3871_v54 = vld [vmem:[#allocation6 + $0x3b0] sm:$0xff]  ;;  %651 = vmatprep.subr.mxu1 %v650_v62  ;;  %v6400_v59 = vand.u32 4294901760, %v3836_v0  ;;  %6402 = vst [vmem:[#allocation59_spill] sm:$0xff] %v3882_v25  ;;  %v6403_v62 = vand.u32 4294901760, %v3848_v18  ;;  %v3892_v3 = vand.u32 4294901760, %v3860_v43 }
  0x79   : > { %6399 = vst [vmem:[#allocation57_spill] sm:$0xff] %v3869_v50  ;;  %6401 = vst [vmem:[#allocation58_spill] sm:$0xff] %v3878_v55  ;;  %657 = vmatpush1.msra.mxu1 %v656_v46  ;;  %v668_v60 = vand.u32 4294901760, %v667_v32  ;;  %436 = vmatpush2.msra.mxu0 %v3878_v55  ;;  %v6001_v46 = vand.u32 4294901760, %v3882_v25  ;;  %v3900_v32 = vsub.f32 %v3746_v17, %v3778_v56  ;;  %v3916_v17 = vand.u32 4294901760, %v3884_v23 }
  0x7a   : > { %v662_v53 = vand.u32 4294901760, %v661_v30  ;;  %v673_v6 = vsub.f32 %v3836_v0, %v6400_v59  ;;  %v679_v30 = vsub.f32 %v3848_v18, %v6403_v62  ;;  %6404 = vst [vmem:[#allocation60_spill] sm:$0xff] %v3892_v3  ;;  %v3894_v0 = vld [vmem:[#allocation6 + $0x3a0] sm:$0xff]  ;;  %v3903_v62 = vand.u32 4294901760, %v3871_v54  ;;  %438 = vmatprep.subr.mxu0 %v3892_v3 }
  0x7b   : > { %6405 = vst [vmem:[#allocation61_spill] sm:$0xff] %v3900_v32  ;;  %v6407_v18 = vand.u32 4294901760, %v3869_v50  ;;  %6409 = vst [vmem:[#allocation64_spill] sm:$0xff] %v3916_v17  ;;  %v691_v56 = vsub.f32 %v3882_v25, %v6001_v46  ;;  %v3936_v46 = vsub.f32 %v3780_v11, %v3814_v2  ;;  %v6414_v25 = vand.u32 4294901760, %v3900_v32 }
  0x7c   : > { %663 = vmatprep.subr.mxu1 %v662_v53  ;;  %v674_v51 = vand.u32 4294901760, %v673_v6  ;;  %6406 = vst [vmem:[#allocation62_spill] sm:$0xff] %v3903_v62  ;;  %v680_v59 = vand.u32 4294901760, %v679_v30  ;;  %v3913_v6 = vsub.f32 %v3757_v41, %v3789_v16  ;;  %440 = vmatpush2.msra.mxu0 %v3903_v62  ;;  %v3928_v30 = vand.u32 4294901760, %v3894_v0  ;;  %v3930_v41 = vld [vmem:[#allocation6 + $0x390] sm:$0xff] }
  0x7d   : > { %669 = vmatpush1.msra.mxu1 %v668_v60  ;;  %v685_v53 = vsub.f32 %v3869_v50, %v6407_v18  ;;  %v3925_v18 = vsub.f32 %v3770_v47, %v3802_v57  ;;  %442 = vmatprep.subr.mxu0 %v3916_v17  ;;  %6412 = vst [vmem:[#allocation67_spill] sm:$0xff] %v3936_v46  ;;  %v3939_v60 = vand.u32 4294901760, %v3905_v45  ;;  %v3941_v47 = vld [vmem:[#allocation6 + $0x388] sm:$0xff]  ;;  %v692_v57 = vand.u32 4294901760, %v691_v56 }
  0x7e   : > { %6408 = vst [vmem:[#allocation63_spill] sm:$0xff] %v3913_v6  ;;  %675 = vmatprep.subr.mxu1 %v674_v51  ;;  %6411 = vst [vmem:[#allocation66_spill] sm:$0xff] %v3928_v30  ;;  %v6012_v51 = vand.u32 4294901760, %v3913_v6  ;;  %v697_v50 = vsub.f32 %v3900_v32, %v6414_v25  ;;  %444 = vmatpush2.msra.mxu0 %v3928_v30  ;;  %v3958_v56 = vand.u32 4294901760, %v3930_v41  ;;  %v3971_v2 = vand.u32 4294901760, %v3941_v47 }
  0x7f   : > { %6410 = vst [vmem:[#allocation65_spill] sm:$0xff] %v3925_v18  ;;  %681 = vmatpush1.msra.mxu1 %v680_v59  ;;  %v686_v16 = vand.u32 4294901760, %v685_v53  ;;  %6413 = vst [vmem:[#allocation68_spill] sm:$0xff] %v3939_v60  ;;  %v3950_v53 = vsub.f32 %v3791_v61, %v3825_v12  ;;  %446 = vmatprep.subr.mxu0 %v3939_v60  ;;  %v3962_v25 = vsub.f32 %v3816_v38, %v3844_v37  ;;  %v3964_v59 = vld [vmem:[#allocation6 + $0x380] sm:$0xff] }
  0x80   : > { %v703_v11 = vsub.f32 %v3913_v6, %v6012_v51  ;;  %6416 = vst [vmem:[#allocation70_spill] sm:$0xff] %v3958_v56  ;;  %v698_v61 = vand.u32 4294901760, %v697_v50  ;;  %6419 = vst [vmem:[#allocation72_spill] sm:$0xff] %v3971_v2  ;;  %v3973_v6 = vld [vmem:[#allocation6 + $0x378] sm:$0xff]  ;;  %v6420_v31 = vand.u32 4294901760, %v3936_v46  ;;  %448 = vmatpush2.msra.mxu0 %v3958_v56  ;;  %v3982_v50 = vsub.f32 %v3827_v33, %v3858_v24 }
  0x81   : > { %6415 = vst [vmem:[#allocation69_spill] sm:$0xff] %v3950_v53  ;;  %687 = vmatprep.subr.mxu1 %v686_v16  ;;  %6417 = vst [vmem:[#allocation71_spill] sm:$0xff] %v3962_v25  ;;  %v6418_v16 = vand.u32 4294901760, %v3925_v18  ;;  %v6422_v37 = vand.u32 4294901760, %v3950_v53  ;;  %450 = vmatprep.subr.mxu0 %v3971_v2 }
  0x82   : > { %693 = vmatpush1.msra.mxu1 %v692_v57  ;;  %v704_v32 = vand.u32 4294901760, %v703_v11  ;;  %v715_v38 = vsub.f32 %v3936_v46, %v6420_v31  ;;  %6421 = vst [vmem:[#allocation73_spill] sm:$0xff] %v3982_v50  ;;  %v3991_v31 = vand.u32 4294901760, %v3964_v59  ;;  %v3995_v57 = vsub.f32 %v3850_v48, %v3878_v55  ;;  %v3997_v46 = vld [vmem:[#allocation6 + $0x368] sm:$0xff] }
  0x83   : > { %v709_v12 = vsub.f32 %v3925_v18, %v6418_v16  ;;  %v3984_v16 = vld [vmem:[#allocation6 + $0x370] sm:$0xff]  ;;  %699 = vmatprep.subr.mxu1 %v698_v61  ;;  %v721_v11 = vsub.f32 %v3950_v53, %v6422_v37  ;;  %v6425_v61 = vand.u32 4294901760, %v3962_v25  ;;  %v4004_v37 = vand.u32 4294901760, %v3973_v6  ;;  %v4006_v53 = vld [vmem:[#allocation6 + $0x360] sm:$0xff] }
  0x84   : > { %6423 = vst [vmem:[#allocation74_spill] sm:$0xff] %v3991_v31  ;;  %6424 = vst [vmem:[#allocation75_spill] sm:$0xff] %v3995_v57  ;;  %705 = vmatpush2.msra.mxu1 %v704_v32  ;;  %v716_v33 = vand.u32 4294901760, %v715_v38  ;;  %452 = vmatpush2.msra.mxu0 %v3991_v31  ;;  %v6035_v48 = vand.u32 4294901760, %v3995_v57  ;;  %v4012_v32 = vsub.f32 %v3860_v43, %v3892_v3  ;;  %v4015_v38 = vand.u32 4294901760, %v3984_v16 }
  0x85   : > { %v710_v51 = vand.u32 4294901760, %v709_v12  ;;  %v727_v12 = vsub.f32 %v3962_v25, %v6425_v61  ;;  %6426 = vst [vmem:[#allocation76_spill] sm:$0xff] %v4004_v37  ;;  %v722_v18 = vand.u32 4294901760, %v721_v11  ;;  %v4017_v61 = vld [vmem:[#allocation6 + $0x358] sm:$0xff]  ;;  %v6429_v55 = vand.u32 4294901760, %v3982_v50  ;;  %454 = vmatprep.subr.mxu0 %v4004_v37 }
  0x86   : > { %6427 = vst [vmem:[#allocation77_spill] sm:$0xff] %v4012_v32  ;;  %6428 = vst [vmem:[#allocation78_spill] sm:$0xff] %v4015_v38  ;;  %v4025_v11 = vsub.f32 %v3871_v54, %v3903_v62  ;;  %v4028_v43 = vand.u32 4294901760, %v3997_v46  ;;  %v739_v3 = vsub.f32 %v3995_v57, %v6035_v48  ;;  %456 = vmatpush2.msra.mxu0 %v4015_v38  ;;  %v4042_v54 = vld [vmem:[#allocation6 + $0x350] sm:$0xff]  ;;  %v6436_v57 = vand.u32 4294901760, %v4012_v32 }
  0x87   : > { %711 = vmatprep.subr.mxu1 %v710_v51  ;;  %v728_v24 = vand.u32 4294901760, %v727_v12  ;;  %v733_v51 = vsub.f32 %v3982_v50, %v6429_v55  ;;  %v4037_v55 = vsub.f32 %v3884_v23, %v3916_v17  ;;  %v4040_v12 = vand.u32 4294901760, %v4006_v53  ;;  %v4053_v23 = vld [vmem:[#allocation6 + $0x348] sm:$0xff] }
  0x88   : > { %717 = vmatpush2.msra.mxu1 %v716_v33  ;;  %6430 = vst [vmem:[#allocation79_spill] sm:$0xff] %v4025_v11  ;;  %6431 = vst [vmem:[#allocation80_spill] sm:$0xff] %v4028_v43  ;;  %458 = vmatprep.subr.mxu0 %v4028_v43  ;;  %v4048_v48 = vsub.f32 %v3894_v0, %v3928_v30  ;;  %v4051_v33 = vand.u32 4294901760, %v4017_v61  ;;  %v740_v17 = vand.u32 4294901760, %v739_v3  ;;  %v4070_v3 = vand.u32 4294901760, %v4042_v54 }
  0x89   : > { %723 = vmatprep.subr.mxu1 %v722_v18  ;;  %6432 = vst [vmem:[#allocation81_spill] sm:$0xff] %v4037_v55  ;;  %6433 = vst [vmem:[#allocation82_spill] sm:$0xff] %v4040_v12  ;;  %v734_v62 = vand.u32 4294901760, %v733_v51  ;;  %v6046_v18 = vand.u32 4294901760, %v4025_v11  ;;  %v745_v50 = vsub.f32 %v4012_v32, %v6436_v57  ;;  %460 = vmatpush2.msra.mxu0 %v4040_v12  ;;  %v4083_v30 = vand.u32 4294901760, %v4053_v23 }
  0x8a   : > { %729 = vmatpush2.msra.mxu1 %v728_v24  ;;  %6434 = vst [vmem:[#allocation83_spill] sm:$0xff] %v4048_v48  ;;  %6435 = vst [vmem:[#allocation84_spill] sm:$0xff] %v4051_v33  ;;  %v4062_v51 = vsub.f32 %v3905_v45, %v3939_v60  ;;  %462 = vmatprep.subr.mxu0 %v4051_v33  ;;  %v4074_v57 = vsub.f32 %v3930_v41, %v3958_v56  ;;  %v4076_v24 = vld [vmem:[#allocation6 + $0x340] sm:$0xff]  ;;  %v6442_v25 = vand.u32 4294901760, %v4048_v48 }
  0x8b   : > { %735 = vmatprep.subr.mxu1 %v734_v62  ;;  %v751_v0 = vsub.f32 %v4025_v11, %v6046_v18  ;;  %6438 = vst [vmem:[#allocation86_spill] sm:$0xff] %v4070_v3  ;;  %v746_v45 = vand.u32 4294901760, %v745_v50  ;;  %v6440_v62 = vand.u32 4294901760, %v4037_v55  ;;  %6441 = vst [vmem:[#allocation88_spill] sm:$0xff] %v4083_v30  ;;  %v4085_v11 = vld [vmem:[#allocation6 + $0x338] sm:$0xff]  ;;  %464 = vmatpush2.msra.mxu0 %v4070_v3 }
  0x8c   : > { %6437 = vst [vmem:[#allocation85_spill] sm:$0xff] %v4062_v51  ;;  %6439 = vst [vmem:[#allocation87_spill] sm:$0xff] %v4074_v57  ;;  %741 = vmatpush2.msra.mxu1 %v740_v17  ;;  %v763_v41 = vsub.f32 %v4048_v48, %v6442_v25  ;;  %v4094_v50 = vsub.f32 %v3941_v47, %v3971_v2  ;;  %v6444_v56 = vand.u32 4294901760, %v4062_v51  ;;  %466 = vmatprep.subr.mxu0 %v4083_v30  ;;  %v4109_v48 = vld [vmem:[#allocation6 + $0x328] sm:$0xff] }
  0x8d   : > { %v757_v60 = vsub.f32 %v4037_v55, %v6440_v62  ;;  %v752_v32 = vand.u32 4294901760, %v751_v0  ;;  %v4096_v62 = vld [vmem:[#allocation6 + $0x330] sm:$0xff]  ;;  %747 = vmatprep.subr.mxu1 %v746_v45  ;;  %v4103_v25 = vand.u32 4294901760, %v4076_v24  ;;  %v4107_v17 = vsub.f32 %v3964_v59, %v3991_v31 }
  0x8e   : > { %6443 = vst [vmem:[#allocation89_spill] sm:$0xff] %v4094_v50  ;;  %v769_v0 = vsub.f32 %v4062_v51, %v6444_v56  ;;  %v764_v47 = vand.u32 4294901760, %v763_v41  ;;  %v6447_v45 = vand.u32 4294901760, %v4074_v57  ;;  %v4116_v56 = vand.u32 4294901760, %v4085_v11  ;;  %v4118_v51 = vld [vmem:[#allocation6 + $0x320] sm:$0xff] }
  0x8f   : > { %v758_v18 = vand.u32 4294901760, %v757_v60  ;;  %6445 = vst [vmem:[#allocation90_spill] sm:$0xff] %v4103_v25  ;;  %6446 = vst [vmem:[#allocation91_spill] sm:$0xff] %v4107_v17  ;;  %753 = vmatpush2.msra.mxu1 %v752_v32  ;;  %468 = vmatpush2.msra.mxu0 %v4103_v25  ;;  %v6069_v59 = vand.u32 4294901760, %v4107_v17  ;;  %v4124_v32 = vsub.f32 %v3973_v6, %v4004_v37  ;;  %v4127_v41 = vand.u32 4294901760, %v4096_v62 }
  0x90   : > { %v775_v60 = vsub.f32 %v4074_v57, %v6447_v45  ;;  %v770_v55 = vand.u32 4294901760, %v769_v0  ;;  %v4129_v45 = vld [vmem:[#allocation6 + $0x318] sm:$0xff]  ;;  %v6449_v31 = vand.u32 4294901760, %v4094_v50  ;;  %470 = vmatprep.subr.mxu0 %v4116_v56  ;;  %v4137_v0 = vsub.f32 %v3984_v16, %v4015_v38  ;;  %v4154_v16 = vld [vmem:[#allocation6 + $0x310] sm:$0xff] }
  0x91   : > { %759 = vmatprep.subr.mxu1 %v758_v18  ;;  %6448 = vst [vmem:[#allocation92_spill] sm:$0xff] %v4124_v32  ;;  %v4140_v6 = vand.u32 4294901760, %v4109_v48  ;;  %v787_v37 = vsub.f32 %v4107_v17, %v6069_v59  ;;  %472 = vmatpush2.msra.mxu0 %v4127_v41  ;;  %v4160_v59 = vsub.f32 %v4006_v53, %v4040_v12  ;;  %v6456_v17 = vand.u32 4294901760, %v4124_v32  ;;  %v4188_v12 = vld [vmem:[#allocation6 + $0x300] sm:$0xff] }
  0x92   : > { %765 = vmatpush2.msra.mxu1 %v764_v47  ;;  %v776_v2 = vand.u32 4294901760, %v775_v60  ;;  %v781_v18 = vsub.f32 %v4094_v50, %v6449_v31  ;;  %6450 = vst [vmem:[#allocation93_spill] sm:$0xff] %v4137_v0  ;;  %v4149_v31 = vsub.f32 %v3997_v46, %v4028_v43  ;;  %v4152_v60 = vand.u32 4294901760, %v4118_v51  ;;  %v4165_v46 = vld [vmem:[#allocation6 + $0x308] sm:$0xff] }
  0x93   : > { %6451 = vst [vmem:[#allocation94_spill] sm:$0xff] %v4140_v6  ;;  %771 = vmatprep.subr.mxu1 %v770_v55  ;;  %v6078_v55 = vand.u32 4294901760, %v4137_v0  ;;  %474 = vmatprep.subr.mxu0 %v4140_v6  ;;  %6454 = vst [vmem:[#allocation97_spill] sm:$0xff] %v4160_v59  ;;  %v4163_v47 = vand.u32 4294901760, %v4129_v45  ;;  %v788_v43 = vand.u32 4294901760, %v787_v37  ;;  %v793_v50 = vsub.f32 %v4124_v32, %v6456_v17 }
  0x94   : > { %6452 = vst [vmem:[#allocation95_spill] sm:$0xff] %v4149_v31  ;;  %6453 = vst [vmem:[#allocation96_spill] sm:$0xff] %v4152_v60  ;;  %777 = vmatpush2.msra.mxu1 %v776_v2  ;;  %v782_v38 = vand.u32 4294901760, %v781_v18  ;;  %476 = vmatpush2.msra.mxu0 %v4152_v60  ;;  %v4174_v18 = vsub.f32 %v4017_v61, %v4051_v33  ;;  %v4182_v17 = vand.u32 4294901760, %v4154_v16  ;;  %v6459_v61 = vand.u32 4294901760, %v4149_v31 }
  0x95   : > { %6455 = vst [vmem:[#allocation98_spill] sm:$0xff] %v4163_v47  ;;  %v799_v53 = vsub.f32 %v4137_v0, %v6078_v55  ;;  %478 = vmatprep.subr.mxu0 %v4163_v47  ;;  %v4186_v2 = vsub.f32 %v4042_v54, %v4070_v3  ;;  %v4195_v33 = vand.u32 4294901760, %v4165_v46  ;;  %v203_v0 = vld [vmem:[%s3417_s26] ss:$4 sm:$0x3]  ;;  %v6461_v57 = vand.u32 4294901760, %v4160_v59 }
  0x96   : > { %6457 = vst [vmem:[#allocation99_spill] sm:$0xff] %v4174_v18  ;;  %783 = vmatprep.subr.mxu1 %v782_v38  ;;  %6458 = vst [vmem:[#allocation100_spill] sm:$0xff] %v4182_v17  ;;  %v794_v38 = vand.u32 4294901760, %v793_v50  ;;  %v805_v55 = vsub.f32 %v4149_v31, %v6459_v61  ;;  %480 = vmatpush2.msra.mxu0 %v4182_v17  ;;  %v4205_v50 = vsub.f32 %v4053_v23, %v4083_v30  ;;  %v3073_v61 = vld [vmem:[%s3417_s26 + $0x1] ss:$4 sm:$0x3] }
  0x97   : > { %789 = vmatpush2.msra.mxu1 %v788_v43  ;;  %6460 = vst [vmem:[#allocation101_spill] sm:$0xff] %v4195_v33  ;;  %v800_v32 = vand.u32 4294901760, %v799_v53  ;;  %v811_v54 = vsub.f32 %v4160_v59, %v6461_v57  ;;  %v6099_v43 = vand.u32 4294901760, %v4186_v2  ;;  %v6462_v3 = vand.u32 4294901760, %v4174_v18  ;;  %482 = vmatprep.subr.mxu0 %v4195_v33 }
  0x98   : > { %795 = vmatprep.subr.mxu1 %v794_v38  ;;  %v806_v37 = vand.u32 4294901760, %v805_v55  ;;  %v4213_v57 = vand.u32 4294901760, %v4188_v12  ;;  %v4217_v59 = vsub.f32 %v4076_v24, %v4103_v25  ;;  %v6102_v38 = vand.u32 4294901760, %v4205_v50  ;;  %v3075_v25 = vld [vmem:[%s3417_s26 + $0x3] ss:$4 sm:$0x3] }
  0x99   : > { %v817_v53 = vsub.f32 %v4174_v18, %v6462_v3  ;;  %801 = vmatpush2.msra.mxu1 %v800_v32  ;;  %v812_v23 = vand.u32 4294901760, %v811_v54  ;;  %v823_v55 = vsub.f32 %v4186_v2, %v6099_v43  ;;  %v206_v30 = vmax.f32 %v203_v0, %v3073_v61  ;;  %v3074_v3 = vld [vmem:[%s3417_s26 + $0x2] ss:$4 sm:$0x3] }
  0x9a   : > { %6463 = vst [vmem:[#allocation102_spill] sm:$0xff] %v4213_v57  ;;  %807 = vmatprep.subr.mxu1 %v806_v37  ;;  %484 = vmatpush2.msra.mxu0 %v4213_v57  ;;  %v6110_v31 = vand.u32 4294901760, %v4217_v59  ;;  %v207_v4 = vadd.f32 %v3073_v61, %v203_v0  ;;  %v4228_v24 = vsub.f32 %v4085_v11, %v4116_v56 }
  0x9b   : > { %v818_v18 = vand.u32 4294901760, %v817_v53  ;;  %813 = vmatpush2.msra.mxu1 %v812_v23  ;;  %v824_v32 = vand.u32 4294901760, %v823_v55  ;;  %v829_v54 = vsub.f32 %v4205_v50, %v6102_v38  ;;  %v210_v43 = vmax.f32 %v206_v30, %v3074_v3  ;;  %897 = vmatprep.subr.mxu0 %v3453_v22 }
  0x9c   : > { %v4237_v37 = vsub.f32 %v4096_v62, %v4127_v41  ;;  %v835_v11 = vsub.f32 %v4217_v59, %v6110_v31  ;;  %v211_v0 = vadd.f32 %v3074_v3, %v207_v4  ;;  %v6105_v61 = vand.u32 4294901760, %v4228_v24 }
  0x9d   : > { %819 = vmatprep.subr.mxu1 %v818_v18  ;;  %v4245_v53 = vsub.f32 %v4109_v48, %v4140_v6  ;;  %v830_v30 = vand.u32 4294901760, %v829_v54  ;;  %v4247_v23 = vmax.f32 %v210_v43, %v3075_v25  ;;  %v4252_v62 = vsub.f32 %v4118_v51, %v4152_v60 }
  0x9e   : > { %825 = vmatpush2.msra.mxu1 %v824_v32  ;;  %v6103_v55 = vand.u32 4294901760, %v4237_v37  ;;  %v836_v18 = vand.u32 4294901760, %v835_v11  ;;  %v215_v38 = vadd.f32 %v3075_v25, %v211_v0  ;;  %v841_v4 = vsub.f32 %v4228_v24, %v6105_v61 }
  0x9f   : > { %6464 = vst [vmem:[#allocation103_spill] sm:$0xff] %v4247_v23  ;;  %v6104_v3 = vand.u32 4294901760, %v4245_v53  ;;  %831 = vmatprep.subr.mxu1 %v830_v30  ;;  %v6106_v43 = vand.u32 4294901760, %v4252_v62  ;;  %v4264_v32 = vsub.f32 %v4129_v45, %v4163_v47  ;;  %v4271_v11 = vsub.f32 %v4154_v16, %v4182_v17  ;;  %v6483_v23 = vld [vmem:[#allocation22_spill] sm:$0xff] }
  0xa0   : > { %v847_v48 = vsub.f32 %v4237_v37, %v6103_v55  ;;  %837 = vmatpush2.msra.mxu1 %v836_v18  ;;  %v216_v51 = vmul.f32 0.25, %v215_v38  ;;  %v842_v25 = vand.u32 4294901760, %v841_v4  ;;  %v6465_v45 = vsub.s32 1, %v3427_v1  ;;  %v6480_v1 = vld [vmem:[#allocation33_spill] sm:$0xff] }
  0xa1   : > { %v853_v54 = vsub.f32 %v4245_v53, %v6104_v3  ;;  %v859_v30 = vsub.f32 %v4252_v62, %v6106_v43  ;;  %v6107_v55 = vand.u32 4294901760, %v4264_v32  ;;  %v6108_v3 = vand.u32 4294901760, %v4271_v11 }
  0xa2   : > { %v848_v0 = vand.u32 4294901760, %v847_v48  ;;  %v354_v18 = vrot.slane %v216_v51, %v6465_v45  ;;  %843 = vmatprep.subr.mxu1 %v842_v25  ;;  %v350_v38 = vrot.slane %v216_v51, %v3430_v5  ;;  %v4286_v48 = vsub.f32 %v4165_v46, %v4195_v33  ;;  %v6484_v5 = vld [vmem:[#allocation37_spill] sm:$0xff] }
  0xa3   : > { %v854_v4 = vand.u32 4294901760, %v853_v54  ;;  %v860_v61 = vand.u32 4294901760, %v859_v30  ;;  %v865_v16 = vsub.f32 %v4264_v32, %v6107_v55  ;;  %v4290_v43 = vsub.f32 %v4188_v12, %v4213_v57 }
  0xa4   : > { %849 = vmatpush2.msra.mxu1 %v848_v0  ;;  %v4292_v25 = vand.u32 4294901760, %v354_v18  ;;  %v4294_v51 = vand.u32 4294901760, %v350_v38  ;;  %v871_v54 = vsub.f32 %v4271_v11, %v6108_v3  ;;  %v6109_v30 = vand.u32 4294901760, %v4286_v48 }
  0xa5   : > { %855 = vmatprep.subr.mxu1 %v854_v4  ;;  %v866_v0 = vand.u32 4294901760, %v865_v16  ;;  %v6111_v46 = vand.u32 4294901760, %v4290_v43 }
  0xa6   : > { %6466 = vst [vmem:[#allocation104_spill] sm:$0xff] %v4292_v25  ;;  %6467 = vst [vmem:[#allocation105_spill] sm:$0xff] %v4294_v51  ;;  %861 = vmatpush2.msra.mxu1 %v860_v61  ;;  %v4302_v45 = vsub.f32 %v354_v18, %v4292_v25  ;;  %v4305_v12 = vsub.f32 %v350_v38, %v4294_v51  ;;  %v872_v55 = vand.u32 4294901760, %v871_v54  ;;  %887 = vmatprep.mubr.f32.mxu1 %v4292_v25  ;;  %v6482_v25 = vld [vmem:[#allocation35_spill] sm:$0xff] }
  0xa7   : > { %867 = vmatprep.subr.mxu1 %v866_v0  ;;  %v877_v4 = vsub.f32 %v4286_v48, %v6109_v30  ;;  %v883_v61 = vsub.f32 %v4290_v43, %v6111_v46  ;;  %v6477_v46 = vld [vmem:[#allocation18_spill] sm:$0xff] }
  0xa8   : > { %v6113_v16 = vand.u32 4294901760, %v4302_v45  ;;  %v6112_v18 = vand.u32 4294901760, %v4305_v12  ;;  %873 = vmatpush2.msra.mxu1 %v872_v55  ;;  %v6469_v55 = vld [vmem:[#allocation14_spill] sm:$0xff] }
  0xa9   : > { %v878_v3 = vand.u32 4294901760, %v877_v4  ;;  %v884_v38 = vand.u32 4294901760, %v883_v61  ;;  %v6472_v4 = vld [vmem:[#allocation25_spill] sm:$0xff]  ;;  %v6473_v61 = vld [vmem:[#allocation16_spill] sm:$0xff] }
  0xaa   : > { %v488_v54 = vsub.f32 %v4302_v45, %v6113_v16  ;;  %v494_v0 = vsub.f32 %v4305_v12, %v6112_v18  ;;  %v6478_v18 = vld [vmem:[#allocation31_spill] sm:$0xff] }
  0xab   : > { %879 = vmatprep.subr.mxu1 %v878_v3  ;;  %v6470_v3 = vld [vmem:[#allocation23_spill] sm:$0xff] }
  0xac   : > { %v489_v30 = vand.u32 4294901760, %v488_v54  ;;  %v495_v31 = vand.u32 4294901760, %v494_v0  ;;  %885 = vmatpush2.msra.mxu1 %v884_v38  ;;  %v6474_v38 = vld [vmem:[#allocation27_spill] sm:$0xff]  ;;  %v6475_v54 = vld [vmem:[#allocation17_spill] sm:$0xff] }
  0xad   : > { %889 = vmatmul.mubr.f32.vlgmr.msra.gmra.mxu1 %v4294_v51  ;;  %1099 = vmatprep.subr.mxu1 %v3433_v7  ;;  %v6476_v0 = vld [vmem:[#allocation29_spill] sm:$0xff]  ;;  %v6479_v16 = vld [vmem:[#allocation19_spill] sm:$0xff]  ;;  %v6481_v51 = vld [vmem:[#allocation20_spill] sm:$0xff] }
  0xae   : > { %490 = vmatprep.mubr.f32.mxu0 %v489_v30  ;;  %1101 = vmatpush1.msra.mxu1 %v3435_v8  ;;  %v6471_v30 = vld [vmem:[#allocation15_spill] sm:$0xff] }
  0xaf   : > { %496 = vmatmul.mubr.f32.vlgmr.msra.gmra.mxu0 %v495_v31  ;;  %1103 = vmatprep.subr.mxu1 %v3437_v9  ;;  %v6468_v31 = vld [vmem:[#allocation21_spill] sm:$0xff] }
  0xb0   : > { %900 = vmatpush1.msra.mxu0 %v3466_v27  ;;  %1105 = vmatpush1.msra.mxu1 %v3439_v13 }
  0xb1   : > { %903 = vmatprep.subr.mxu0 %v3472_v29  ;;  %1107 = vmatprep.subr.mxu1 %v3441_v14 }
  0xb2   : > { %906 = vmatpush1.msra.mxu0 %v3486_v35  ;;  %1109 = vmatpush1.msra.mxu1 %v3443_v15 }
  0xb3   : > { %909 = vmatprep.subr.mxu0 %v3495_v39  ;;  %1111 = vmatprep.subr.mxu1 %v3446_v19 }
  0xb4   : > { %912 = vmatpush1.msra.mxu0 %v3508_v44  ;;  %1113 = vmatpush1.msra.mxu1 %v3448_v20 }
  0xb5   : > { %915 = vmatprep.subr.mxu0 %v3522_v49  ;;  %1115 = vmatprep.subr.mxu1 %v3450_v21 }
  0xb6   : > { %918 = vmatpush1.msra.mxu0 %v3548_v63  ;;  %1117 = vmatpush1.msra.mxu1 %v3463_v26 }
  0xb7   : > { %921 = vmatprep.subr.mxu0 %v3560_v10  ;;  %1119 = vmatprep.subr.mxu1 %v3469_v28 }
  0xb8   : > { %924 = vmatpush1.msra.mxu0 %v3571_v42  ;;  %1121 = vmatpush1.msra.mxu1 %v3483_v34 }
  0xb9   : > { %927 = vmatprep.subr.mxu0 %v3582_v52  ;;  %1123 = vmatprep.subr.mxu1 %v3489_v36 }
  0xba   : > { %930 = vmatpush1.msra.mxu0 %v3594_v58  ;;  %1125 = vmatpush1.msra.mxu1 %v3498_v40 }
  0xbb   : > { %933 = vmatprep.subr.mxu0 %v6468_v31  ;;  %1127 = vmatprep.subr.mxu1 %v6469_v55 }
  0xbc   : > { %936 = vmatpush1.msra.mxu0 %v6470_v3  ;;  %1129 = vmatpush1.msra.mxu1 %v6471_v30  ;;  %v6487_v30 = vld [vmem:[#allocation26_spill] sm:$0xff] }
  0xbd   : > { %939 = vmatprep.subr.mxu0 %v6472_v4  ;;  %1131 = vmatprep.subr.mxu1 %v6473_v61  ;;  %v6485_v61 = vld [vmem:[#allocation24_spill] sm:$0xff] }
  0xbe   : > { %942 = vmatpush1.msra.mxu0 %v6474_v38  ;;  %1133 = vmatpush1.msra.mxu1 %v6475_v54  ;;  %v6486_v54 = vld [vmem:[#allocation39_spill] sm:$0xff] }
  0xbf   : > { %945 = vmatprep.subr.mxu0 %v6476_v0  ;;  %1135 = vmatprep.subr.mxu1 %v6477_v46  ;;  %v6488_v46 = vld [vmem:[#allocation41_spill] sm:$0xff] }
  0xc0   : > { %948 = vmatpush1.msra.mxu0 %v6478_v18  ;;  %1137 = vmatpush1.msra.mxu1 %v6479_v16  ;;  %v6489_v18 = vld [vmem:[#allocation28_spill] sm:$0xff]  ;;  %v6490_v16 = vld [vmem:[#allocation43_spill] sm:$0xff] }
  0xc1   : > { %951 = vmatprep.subr.mxu0 %v6480_v1  ;;  %1139 = vmatprep.subr.mxu1 %v6481_v51  ;;  %v6491_v1 = vld [vmem:[#allocation30_spill] sm:$0xff]  ;;  %v6492_v51 = vld [vmem:[#allocation45_spill] sm:$0xff] }
  0xc2   : > { %954 = vmatpush1.msra.mxu0 %v6482_v25  ;;  %1141 = vmatpush1.msra.mxu1 %v6483_v23  ;;  %v6493_v25 = vld [vmem:[#allocation32_spill] sm:$0xff]  ;;  %v6494_v23 = vld [vmem:[#allocation47_spill] sm:$0xff] }
  0xc3   : > { %957 = vmatprep.subr.mxu0 %v6484_v5  ;;  %1143 = vmatprep.subr.mxu1 %v6485_v61  ;;  %v6495_v5 = vld [vmem:[#allocation34_spill] sm:$0xff]  ;;  %v6496_v61 = vld [vmem:[#allocation49_spill] sm:$0xff] }
  0xc4   : > { %960 = vmatpush1.msra.mxu0 %v6486_v54  ;;  %1145 = vmatpush1.msra.mxu1 %v6487_v30  ;;  %v6497_v54 = vld [vmem:[#allocation36_spill] sm:$0xff]  ;;  %v6498_v30 = vld [vmem:[#allocation51_spill] sm:$0xff] }
  0xc5   : > { %963 = vmatprep.subr.mxu0 %v6488_v46  ;;  %1147 = vmatprep.subr.mxu1 %v6489_v18  ;;  %v6499_v46 = vld [vmem:[#allocation38_spill] sm:$0xff]  ;;  %v6500_v18 = vld [vmem:[#allocation53_spill] sm:$0xff] }
  0xc6   : > { %966 = vmatpush1.msra.mxu0 %v6490_v16  ;;  %1149 = vmatpush1.msra.mxu1 %v6491_v1  ;;  %v6501_v16 = vld [vmem:[#allocation40_spill] sm:$0xff]  ;;  %v6502_v1 = vld [vmem:[#allocation55_spill] sm:$0xff] }
  0xc7   : > { %969 = vmatprep.subr.mxu0 %v6492_v51  ;;  %1151 = vmatprep.subr.mxu1 %v6493_v25  ;;  %v6503_v51 = vld [vmem:[#allocation42_spill] sm:$0xff]  ;;  %v6504_v25 = vld [vmem:[#allocation57_spill] sm:$0xff] }
  0xc8   : > { %972 = vmatpush1.msra.mxu0 %v6494_v23  ;;  %1153 = vmatpush1.msra.mxu1 %v6495_v5  ;;  %v6505_v23 = vld [vmem:[#allocation44_spill] sm:$0xff]  ;;  %v6506_v5 = vld [vmem:[#allocation59_spill] sm:$0xff] }
  0xc9   : > { %975 = vmatprep.subr.mxu0 %v6496_v61  ;;  %1155 = vmatprep.subr.mxu1 %v6497_v54  ;;  %v6507_v61 = vld [vmem:[#allocation46_spill] sm:$0xff]  ;;  %v6508_v54 = vld [vmem:[#allocation61_spill] sm:$0xff] }
  0xca   : > { %978 = vmatpush1.msra.mxu0 %v6498_v30  ;;  %1157 = vmatpush1.msra.mxu1 %v6499_v46  ;;  %v6509_v30 = vld [vmem:[#allocation48_spill] sm:$0xff]  ;;  %v6510_v46 = vld [vmem:[#allocation63_spill] sm:$0xff] }
  0xcb   : > { %981 = vmatprep.subr.mxu0 %v6500_v18  ;;  %1159 = vmatprep.subr.mxu1 %v6501_v16  ;;  %v6511_v18 = vld [vmem:[#allocation50_spill] sm:$0xff]  ;;  %v6512_v16 = vld [vmem:[#allocation65_spill] sm:$0xff] }
  0xcc   : > { %984 = vmatpush1.msra.mxu0 %v6502_v1  ;;  %1161 = vmatpush1.msra.mxu1 %v6503_v51  ;;  %v6513_v1 = vld [vmem:[#allocation52_spill] sm:$0xff]  ;;  %v6514_v51 = vld [vmem:[#allocation67_spill] sm:$0xff] }
  0xcd   : > { %987 = vmatprep.subr.mxu0 %v6504_v25  ;;  %1163 = vmatprep.subr.mxu1 %v6505_v23  ;;  %v6515_v25 = vld [vmem:[#allocation54_spill] sm:$0xff]  ;;  %v6516_v23 = vld [vmem:[#allocation69_spill] sm:$0xff] }
  0xce   : > { %990 = vmatpush1.msra.mxu0 %v6506_v5  ;;  %1165 = vmatpush2.msra.mxu1 %v6507_v61  ;;  %v6517_v5 = vld [vmem:[#allocation56_spill] sm:$0xff]  ;;  %v6518_v61 = vld [vmem:[#allocation71_spill] sm:$0xff] }
  0xcf   : > { %993 = vmatprep.subr.mxu0 %v6508_v54  ;;  %1167 = vmatprep.subr.mxu1 %v6509_v30  ;;  %v6519_v54 = vld [vmem:[#allocation58_spill] sm:$0xff]  ;;  %v6520_v30 = vld [vmem:[#allocation73_spill] sm:$0xff] }
  0xd0   : > { %996 = vmatpush2.msra.mxu0 %v6510_v46  ;;  %1169 = vmatpush2.msra.mxu1 %v6511_v18  ;;  %v6521_v46 = vld [vmem:[#allocation60_spill] sm:$0xff]  ;;  %v6522_v18 = vld [vmem:[#allocation75_spill] sm:$0xff] }
  0xd1   : > { %999 = vmatprep.subr.mxu0 %v6512_v16  ;;  %1171 = vmatprep.subr.mxu1 %v6513_v1  ;;  %v6523_v16 = vld [vmem:[#allocation62_spill] sm:$0xff]  ;;  %v6524_v1 = vld [vmem:[#allocation77_spill] sm:$0xff] }
  0xd2   : > { %1002 = vmatpush2.msra.mxu0 %v6514_v51  ;;  %1173 = vmatpush2.msra.mxu1 %v6515_v25  ;;  %v6525_v51 = vld [vmem:[#allocation64_spill] sm:$0xff]  ;;  %v6526_v25 = vld [vmem:[#allocation79_spill] sm:$0xff] }
  0xd3   : > { %1005 = vmatprep.subr.mxu0 %v6516_v23  ;;  %1175 = vmatprep.subr.mxu1 %v6517_v5  ;;  %v6527_v23 = vld [vmem:[#allocation66_spill] sm:$0xff]  ;;  %v6528_v5 = vld [vmem:[#allocation81_spill] sm:$0xff] }
  0xd4   : > { %1008 = vmatpush2.msra.mxu0 %v6518_v61  ;;  %1177 = vmatpush2.msra.mxu1 %v6519_v54  ;;  %v6529_v61 = vld [vmem:[#allocation68_spill] sm:$0xff]  ;;  %v6530_v54 = vld [vmem:[#allocation83_spill] sm:$0xff] }
  0xd5   : > { %1011 = vmatprep.subr.mxu0 %v6520_v30  ;;  %1179 = vmatprep.subr.mxu1 %v6521_v46  ;;  %v6531_v30 = vld [vmem:[#allocation70_spill] sm:$0xff]  ;;  %v6532_v46 = vld [vmem:[#allocation85_spill] sm:$0xff] }
  0xd6   : > { %1014 = vmatpush2.msra.mxu0 %v6522_v18  ;;  %1181 = vmatpush2.msra.mxu1 %v6523_v16  ;;  %v6533_v18 = vld [vmem:[#allocation72_spill] sm:$0xff]  ;;  %v6534_v16 = vld [vmem:[#allocation87_spill] sm:$0xff] }
  0xd7   : > { %1017 = vmatprep.subr.mxu0 %v6524_v1  ;;  %1183 = vmatprep.subr.mxu1 %v6525_v51  ;;  %v6535_v1 = vld [vmem:[#allocation74_spill] sm:$0xff]  ;;  %v6536_v51 = vld [vmem:[#allocation89_spill] sm:$0xff] }
  0xd8   : > { %1020 = vmatpush2.msra.mxu0 %v6526_v25  ;;  %1185 = vmatpush2.msra.mxu1 %v6527_v23  ;;  %v6537_v25 = vld [vmem:[#allocation76_spill] sm:$0xff]  ;;  %v6538_v23 = vld [vmem:[#allocation91_spill] sm:$0xff] }
  0xd9   : > { %1023 = vmatprep.subr.mxu0 %v6528_v5  ;;  %1187 = vmatprep.subr.mxu1 %v6529_v61  ;;  %v6539_v5 = vld [vmem:[#allocation78_spill] sm:$0xff]  ;;  %v6540_v61 = vld [vmem:[#allocation92_spill] sm:$0xff] }
  0xda   : > { %1026 = vmatpush2.msra.mxu0 %v6530_v54  ;;  %1189 = vmatpush2.msra.mxu1 %v6531_v30  ;;  %v6541_v54 = vld [vmem:[#allocation80_spill] sm:$0xff]  ;;  %v6542_v30 = vld [vmem:[#allocation93_spill] sm:$0xff] }
  0xdb   : > { %1029 = vmatprep.subr.mxu0 %v6532_v46  ;;  %1191 = vmatprep.subr.mxu1 %v6533_v18  ;;  %v6543_v46 = vld [vmem:[#allocation82_spill] sm:$0xff]  ;;  %v6544_v18 = vld [vmem:[#allocation95_spill] sm:$0xff] }
  0xdc   : > { %1032 = vmatpush2.msra.mxu0 %v6534_v16  ;;  %1193 = vmatpush2.msra.mxu1 %v6535_v1  ;;  %v6545_v16 = vld [vmem:[#allocation84_spill] sm:$0xff]  ;;  %v6546_v1 = vld [vmem:[#allocation97_spill] sm:$0xff] }
  0xdd   : > { %1035 = vmatprep.subr.mxu0 %v6536_v51  ;;  %1195 = vmatprep.subr.mxu1 %v6537_v25  ;;  %v6547_v51 = vld [vmem:[#allocation86_spill] sm:$0xff]  ;;  %v6548_v25 = vld [vmem:[#allocation99_spill] sm:$0xff] }
  0xde   : > { %1038 = vmatpush2.msra.mxu0 %v6538_v23  ;;  %1197 = vmatpush2.msra.mxu1 %v6539_v5  ;;  %v6549_v23 = vld [vmem:[#allocation88_spill] sm:$0xff] }
  0xdf   : > { %1041 = vmatprep.subr.mxu0 %v6540_v61  ;;  %1199 = vmatprep.subr.mxu1 %v6541_v54  ;;  %v6550_v54 = vld [vmem:[#allocation90_spill] sm:$0xff] }
  0xe0   : > { %1044 = vmatpush2.msra.mxu0 %v6542_v30  ;;  %1201 = vmatpush2.msra.mxu1 %v6543_v46 }
  0xe1   : > { %1047 = vmatprep.subr.mxu0 %v6544_v18  ;;  %1203 = vmatprep.subr.mxu1 %v6545_v16 }
  0xe2   : > { %1050 = vmatpush2.msra.mxu0 %v6546_v1  ;;  %1205 = vmatpush2.msra.mxu1 %v6547_v51 }
  0xe3   : > { %1053 = vmatprep.subr.mxu0 %v6548_v25  ;;  %1207 = vmatprep.subr.mxu1 %v6549_v23 }
  0xe4   : > { %1056 = vmatpush2.msra.mxu0 %v4186_v2  ;;  %1089 = vmatprep.mubr.f32.mxu0 %v4302_v45 }
  0xe5   : > { %1059 = vmatprep.subr.mxu0 %v4205_v50  ;;  %1209 = vmatpush2.msra.mxu1 %v6550_v54 }
  0xe6   : > { %1062 = vmatpush2.msra.mxu0 %v4217_v59  ;;  %1211 = vmatprep.subr.mxu1 %v4116_v56 }
  0xe7   : > { %1065 = vmatprep.subr.mxu0 %v4228_v24  ;;  %1213 = vmatpush2.msra.mxu1 %v4127_v41 }
  0xe8   : > { %1068 = vmatpush2.msra.mxu0 %v4237_v37  ;;  %1215 = vmatprep.subr.mxu1 %v4140_v6  ;;  %v6554_v6 = vand.u32 4294901760, %v4305_v12 }
  0xe9   : > { %1071 = vmatprep.subr.mxu0 %v4245_v53  ;;  %1217 = vmatpush2.msra.mxu1 %v4152_v60  ;;  %v6551_v60 = vand.u32 4294901760, %v4302_v45 }
  0xea   : > { %1074 = vmatpush2.msra.mxu0 %v4252_v62  ;;  %1219 = vmatprep.subr.mxu1 %v4163_v47  ;;  %v6552_v47 = vand.u32 4294901760, %v3453_v22  ;;  %v6558_v22 = vand.u32 4294901760, %v3508_v44  ;;  %v6575_v44 = vld [vmem:[#allocation16_spill] sm:$0xff] }
  0xeb   : > { %1077 = vmatprep.subr.mxu0 %v4264_v32  ;;  %1221 = vmatpush2.msra.mxu1 %v4182_v17  ;;  %v6553_v17 = vand.u32 4294901760, %v3466_v27  ;;  %v6559_v27 = vand.u32 4294901760, %v3522_v49 }
  0xec   : > { %1080 = vmatpush2.msra.mxu0 %v4271_v11  ;;  %1223 = vmatprep.subr.mxu1 %v4195_v33  ;;  %v6555_v33 = vand.u32 4294901760, %v3472_v29 }
  0xed   : > { %1083 = vmatprep.subr.mxu0 %v4286_v48  ;;  %1225 = vmatpush2.msra.mxu1 %v4213_v57  ;;  %v6556_v57 = vand.u32 4294901760, %v3486_v35  ;;  %v6572_v35 = vld [vmem:[#allocation15_spill] sm:$0xff] }
  0xee   : > { %1086 = vmatpush2.msra.mxu0 %v4290_v43  ;;  %1229 = vmatprep.mubr.f32.mxu1 %v6551_v60  ;;  %v6557_v60 = vand.u32 4294901760, %v3495_v39 }
  0xef   : > { %1092 = vmatmul.mubr.f32.vlgmr.msra.gmra.mxu0 %v4305_v12  ;;  %1242 = vmatprep.subr.mxu0 %v6552_v47  ;;  %v6590_v12 = vld [vmem:[#allocation22_spill] sm:$0xff] }
  0xf0   : > { %1246 = vmatpush1.msra.mxu0 %v6553_v17  ;;  %1233 = vmatmul.mubr.f32.vlgmr.msra.gmra.mxu1 %v6554_v6  ;;  %v6585_v6 = vld [vmem:[#allocation41_spill] sm:$0xff]  ;;  %v6587_v17 = vld [vmem:[#allocation20_spill] sm:$0xff] }
  0xf1   : > { %1250 = vmatprep.subr.mxu0 %v6555_v33  ;;  %1505 = vmatprep.subr.mxu1 %v3433_v7  ;;  %v6560_v7 = vand.u32 4294901760, %v3548_v63  ;;  %v6578_v63 = vld [vmem:[#allocation17_spill] sm:$0xff]  ;;  %v6584_v33 = vld [vmem:[#allocation19_spill] sm:$0xff]  ;;  %v6586_v47 = vand.u32 4294901760, %v6585_v6  ;;  %v6623_v6 = vld [vmem:[#allocation44_spill] sm:$0xff] }
  0xf2   : > { %1254 = vmatpush1.msra.mxu0 %v6556_v57  ;;  %1507 = vmatpush1.msra.mxu1 %v3435_v8  ;;  %v6561_v8 = vand.u32 4294901760, %v3560_v10  ;;  %v6588_v57 = vld [vmem:[#allocation43_spill] sm:$0xff] }
  0xf3   : > { %1258 = vmatprep.subr.mxu0 %v6557_v60  ;;  %1509 = vmatprep.subr.mxu1 %v3437_v9  ;;  %v6562_v9 = vand.u32 4294901760, %v3571_v42  ;;  %v6581_v42 = vld [vmem:[#allocation18_spill] sm:$0xff]  ;;  %v6589_v45 = vand.u32 4294901760, %v6588_v57  ;;  %v6597_v60 = vld [vmem:[#allocation49_spill] sm:$0xff] }
  0xf4   : > { %1262 = vmatpush1.msra.mxu0 %v6558_v22  ;;  %1511 = vmatpush1.msra.mxu1 %v3439_v13  ;;  %v6563_v13 = vand.u32 4294901760, %v3582_v52  ;;  %v6582_v52 = vld [vmem:[#allocation39_spill] sm:$0xff]  ;;  %v6598_v22 = vand.u32 4294901760, %v6597_v60  ;;  %v6626_v57 = vld [vmem:[#allocation46_spill] sm:$0xff] }
  0xf5   : > { %1266 = vmatprep.subr.mxu0 %v6559_v27  ;;  %1513 = vmatprep.subr.mxu1 %v3441_v14  ;;  %v6564_v14 = vand.u32 4294901760, %v3594_v58  ;;  %v6583_v58 = vand.u32 4294901760, %v6582_v52  ;;  %v6599_v27 = vld [vmem:[#allocation28_spill] sm:$0xff]  ;;  %v6634_v60 = vld [vmem:[#allocation50_spill] sm:$0xff] }
  0xf6   : > { %1270 = vmatpush1.msra.mxu0 %v6560_v7  ;;  %1515 = vmatpush1.msra.mxu1 %v3443_v15  ;;  %v6565_v15 = vand.u32 4294901760, %v6468_v31  ;;  %v6591_v31 = vld [vmem:[#allocation45_spill] sm:$0xff]  ;;  %v6600_v7 = vld [vmem:[#allocation51_spill] sm:$0xff]  ;;  %v247_v52 = vld [vmem:[#allocation6 + $0xf0] sm:$0xff] }
  0xf7   : > { %1274 = vmatprep.subr.mxu0 %v6561_v8  ;;  %1517 = vmatprep.subr.mxu1 %v3446_v19  ;;  %v6566_v19 = vand.u32 4294901760, %v6470_v3  ;;  %v6593_v3 = vld [vmem:[#allocation24_spill] sm:$0xff]  ;;  %v6601_v8 = vand.u32 4294901760, %v6600_v7 }
  0xf8   : > { %1278 = vmatpush1.msra.mxu0 %v6562_v9  ;;  %1519 = vmatpush1.msra.mxu1 %v3448_v20  ;;  %v6567_v20 = vand.u32 4294901760, %v6472_v4  ;;  %v6594_v4 = vld [vmem:[#allocation47_spill] sm:$0xff]  ;;  %v6602_v9 = vld [vmem:[#allocation30_spill] sm:$0xff] }
  0xf9   : > { %1282 = vmatprep.subr.mxu0 %v6563_v13  ;;  %1521 = vmatprep.subr.mxu1 %v3450_v21  ;;  %v6568_v21 = vand.u32 4294901760, %v6474_v38  ;;  %v6595_v38 = vand.u32 4294901760, %v6594_v4  ;;  %v6603_v13 = vld [vmem:[#allocation53_spill] sm:$0xff]  ;;  %v4567_v4 = vand.u32 4294901760, %v247_v52 }
  0xfa   : > { %1286 = vmatpush1.msra.mxu0 %v6564_v14  ;;  %1523 = vmatpush1.msra.mxu1 %v3463_v26  ;;  %v6569_v26 = vand.u32 4294901760, %v6476_v0  ;;  %v6596_v0 = vld [vmem:[#allocation26_spill] sm:$0xff]  ;;  %v6604_v14 = vand.u32 4294901760, %v6603_v13  ;;  %v244_v13 = vld [vmem:[#allocation6 + $0xd8] sm:$0xff] }
  0xfb   : > { %1290 = vmatprep.subr.mxu0 %v6565_v15  ;;  %1525 = vmatprep.subr.mxu1 %v3469_v28  ;;  %v6570_v28 = vld [vmem:[#allocation31_spill] sm:$0xff]  ;;  %v6605_v15 = vld [vmem:[#allocation32_spill] sm:$0xff]  ;;  %6631 = vst [vmem:[#allocation14_spill] sm:$0xff] %v4567_v4 }
  0xfc   : > { %1294 = vmatpush1.msra.mxu0 %v6566_v19  ;;  %1527 = vmatpush1.msra.mxu1 %v3483_v34  ;;  %v6571_v29 = vand.u32 4294901760, %v6570_v28  ;;  %v6573_v34 = vld [vmem:[#allocation33_spill] sm:$0xff]  ;;  %v6606_v19 = vld [vmem:[#allocation55_spill] sm:$0xff] }
  0xfd   : > { %1298 = vmatprep.subr.mxu0 %v6567_v20  ;;  %1529 = vmatprep.subr.mxu1 %v3489_v36  ;;  %v6574_v39 = vand.u32 4294901760, %v6573_v34  ;;  %v6576_v36 = vld [vmem:[#allocation35_spill] sm:$0xff]  ;;  %v6607_v20 = vand.u32 4294901760, %v6606_v19 }
  0xfe   : > { %1302 = vmatpush1.msra.mxu0 %v6568_v21  ;;  %1531 = vmatpush1.msra.mxu1 %v3498_v40  ;;  %v6577_v49 = vand.u32 4294901760, %v6576_v36  ;;  %v6579_v40 = vld [vmem:[#allocation37_spill] sm:$0xff]  ;;  %v6608_v21 = vld [vmem:[#allocation34_spill] sm:$0xff] }
  0xff   : > { %1306 = vmatprep.subr.mxu0 %v6569_v26  ;;  %1533 = vmatprep.subr.mxu1 %v6469_v55  ;;  %v6580_v10 = vand.u32 4294901760, %v6579_v40  ;;  %v6592_v55 = vand.u32 4294901760, %v6591_v31  ;;  %v6609_v26 = vld [vmem:[#allocation57_spill] sm:$0xff] }
 0x100   : > { %1310 = vmatpush1.msra.mxu0 %v6571_v29  ;;  %1535 = vmatpush1.msra.mxu1 %v6572_v35  ;;  %v6610_v28 = vand.u32 4294901760, %v6609_v26  ;;  %v6611_v29 = vld [vmem:[#allocation36_spill] sm:$0xff]  ;;  %v6612_v35 = vld [vmem:[#allocation59_spill] sm:$0xff] }
 0x101   : > { %1314 = vmatprep.subr.mxu0 %v6574_v39  ;;  %1537 = vmatprep.subr.mxu1 %v6575_v44  ;;  %v6613_v34 = vand.u32 4294901760, %v6612_v35  ;;  %v6614_v39 = vld [vmem:[#allocation38_spill] sm:$0xff]  ;;  %v6615_v44 = vld [vmem:[#allocation61_spill] sm:$0xff] }
 0x102   : > { %1318 = vmatpush1.msra.mxu0 %v6577_v49  ;;  %1539 = vmatpush1.msra.mxu1 %v6578_v63  ;;  %v6616_v36 = vand.u32 4294901760, %v6615_v44  ;;  %v6617_v49 = vld [vmem:[#allocation40_spill] sm:$0xff]  ;;  %v6618_v63 = vld [vmem:[#allocation63_spill] sm:$0xff] }
 0x103   : > { %1322 = vmatprep.subr.mxu0 %v6580_v10  ;;  %1541 = vmatprep.subr.mxu1 %v6581_v42  ;;  %v6619_v40 = vand.u32 4294901760, %v6618_v63  ;;  %v6620_v10 = vld [vmem:[#allocation42_spill] sm:$0xff]  ;;  %v248_v42 = vld [vmem:[#allocation6 + $0xf8] sm:$0xff]  ;;  %v6647_v44 = vld [vmem:[#allocation79_spill] sm:$0xff]  ;;  %v4594_v63 = vand.u32 4294901760, %v244_v13 }
 0x104   : > { %1326 = vmatpush1.msra.mxu0 %v6583_v58  ;;  %1543 = vmatpush1.msra.mxu1 %v6584_v33  ;;  %v6621_v58 = vld [vmem:[#allocation65_spill] sm:$0xff] }
 0x105   : > { %1330 = vmatprep.subr.mxu0 %v6586_v47  ;;  %1545 = vmatprep.subr.mxu1 %v6587_v17  ;;  %v6622_v33 = vand.u32 4294901760, %v6621_v58  ;;  %v6624_v47 = vld [vmem:[#allocation67_spill] sm:$0xff]  ;;  %6650 = vst [vmem:[#allocation29_spill] sm:$0xff] %v4594_v63 }
 0x106   : > { %1334 = vmatpush1.msra.mxu0 %v6589_v45  ;;  %1547 = vmatpush1.msra.mxu1 %v6590_v12  ;;  %v6625_v17 = vand.u32 4294901760, %v6624_v47  ;;  %v246_v45 = vld [vmem:[#allocation6 + $0xe8] sm:$0xff]  ;;  %v6627_v12 = vld [vmem:[#allocation69_spill] sm:$0xff] }
 0x107   : > { %1338 = vmatprep.subr.mxu0 %v6592_v55  ;;  %1549 = vmatprep.subr.mxu1 %v6593_v3  ;;  %v6628_v31 = vand.u32 4294901760, %v6627_v12  ;;  %v6629_v55 = vld [vmem:[#allocation48_spill] sm:$0xff]  ;;  %v4565_v3 = vand.u32 4294901760, %v248_v42  ;;  %v240_v12 = vld [vmem:[#allocation6 + $0xb8] sm:$0xff] }
 0x108   : > { %1342 = vmatpush1.msra.mxu0 %v6595_v38  ;;  %1551 = vmatpush1.msra.mxu1 %v6596_v0  ;;  %v6632_v38 = vld [vmem:[#allocation71_spill] sm:$0xff] }
 0x109   : > { %1346 = vmatprep.subr.mxu0 %v6598_v22  ;;  %1553 = vmatprep.subr.mxu1 %v6599_v27  ;;  %6630 = vst [vmem:[#allocation21_spill] sm:$0xff] %v4565_v3  ;;  %v6633_v0 = vand.u32 4294901760, %v6632_v38  ;;  %v245_v22 = vld [vmem:[#allocation6 + $0xe0] sm:$0xff]  ;;  %v6635_v27 = vld [vmem:[#allocation73_spill] sm:$0xff] }
 0x10a   : > { %1350 = vmatpush1.msra.mxu0 %v6601_v8  ;;  %1555 = vmatpush1.msra.mxu1 %v6602_v9  ;;  %v6636_v7 = vand.u32 4294901760, %v6635_v27  ;;  %v6637_v8 = vld [vmem:[#allocation52_spill] sm:$0xff]  ;;  %v4575_v9 = vand.u32 4294901760, %v246_v45  ;;  %v4586_v35 = vand.u32 4294901760, %v245_v22 }
 0x10b   : > { %1354 = vmatprep.subr.mxu0 %v6604_v14  ;;  %1557 = vmatprep.subr.mxu1 %v6605_v15  ;;  %v243_v14 = vld [vmem:[#allocation6 + $0xd0] sm:$0xff]  ;;  %v6639_v15 = vld [vmem:[#allocation75_spill] sm:$0xff] }
 0x10c   : > { %1358 = vmatpush1.msra.mxu0 %v6607_v20  ;;  %1559 = vmatpush1.msra.mxu1 %v6608_v21  ;;  %6638 = vst [vmem:[#allocation23_spill] sm:$0xff] %v4575_v9  ;;  %v6640_v19 = vand.u32 4294901760, %v6639_v15  ;;  %v6641_v20 = vld [vmem:[#allocation54_spill] sm:$0xff]  ;;  %v6642_v21 = vld [vmem:[#allocation77_spill] sm:$0xff]  ;;  %6646 = vst [vmem:[#allocation27_spill] sm:$0xff] %v4586_v35 }
 0x10d   : > { %1362 = vmatprep.subr.mxu0 %v6610_v28  ;;  %1561 = vmatprep.subr.mxu1 %v6611_v29  ;;  %v6643_v26 = vand.u32 4294901760, %v6642_v21  ;;  %v6644_v28 = vld [vmem:[#allocation56_spill] sm:$0xff]  ;;  %v4584_v29 = vsub.f32 %v247_v52, %v4567_v4  ;;  %v6666_v15 = vld [vmem:[#allocation66_spill] sm:$0xff]  ;;  %v238_v21 = vld [vmem:[#allocation6 + $0xa8] sm:$0xff] }
 0x10e   : > { %1366 = vmatpush1.msra.mxu0 %v6613_v34  ;;  %1563 = vmatpush1.msra.mxu1 %v6614_v39  ;;  %v241_v34 = vld [vmem:[#allocation6 + $0xc0] sm:$0xff]  ;;  %v4589_v39 = vsub.f32 %v248_v42, %v4565_v3  ;;  %v6654_v52 = vld [vmem:[#allocation60_spill] sm:$0xff]  ;;  %v6656_v42 = vld [vmem:[#allocation83_spill] sm:$0xff] }
 0x10f   : > { %1370 = vmatprep.subr.mxu0 %v6616_v36  ;;  %1565 = vmatprep.subr.mxu1 %v6617_v49  ;;  %6645 = vst [vmem:[#allocation25_spill] sm:$0xff] %v4584_v29  ;;  %v6648_v36 = vand.u32 4294901760, %v6647_v44  ;;  %v6649_v49 = vld [vmem:[#allocation58_spill] sm:$0xff]  ;;  %v6657_v47 = vand.u32 4294901760, %v6656_v42  ;;  %v6128_v27 = vand.u32 4294901760, %v4584_v29  ;;  %v6672_v44 = vld [vmem:[#allocation68_spill] sm:$0xff] }
 0x110   : > { %1374 = vmatpush2.msra.mxu0 %v6619_v40  ;;  %1567 = vmatpush1.msra.mxu1 %v6620_v10  ;;  %v4596_v40 = vand.u32 4294901760, %v243_v14  ;;  %v6652_v10 = vld [vmem:[#allocation81_spill] sm:$0xff] }
 0x111   : > { %1378 = vmatprep.subr.mxu0 %v6622_v33  ;;  %1569 = vmatprep.subr.mxu1 %v6623_v6  ;;  %v6653_v58 = vand.u32 4294901760, %v6652_v10  ;;  %v242_v33 = vld [vmem:[#allocation6 + $0xc8] sm:$0xff]  ;;  %v4602_v6 = vsub.f32 %v246_v45, %v4575_v9  ;;  %v6129_v45 = vand.u32 4294901760, %v4589_v39 }
 0x112   : > { %1382 = vmatpush2.msra.mxu0 %v6625_v17  ;;  %1571 = vmatpush2.msra.mxu1 %v6626_v57  ;;  %6651 = vst [vmem:[#allocation78_spill] sm:$0xff] %v4596_v40  ;;  %v6658_v17 = vld [vmem:[#allocation62_spill] sm:$0xff]  ;;  %v4607_v57 = vand.u32 4294901760, %v241_v34 }
 0x113   : > { %1386 = vmatprep.subr.mxu0 %v6628_v31  ;;  %1573 = vmatprep.subr.mxu1 %v6629_v55  ;;  %6655 = vst [vmem:[#allocation92_spill] sm:$0xff] %v4602_v6  ;;  %v239_v31 = vld [vmem:[#allocation6 + $0xb0] sm:$0xff]  ;;  %v6660_v55 = vld [vmem:[#allocation85_spill] sm:$0xff]  ;;  %v6130_v10 = vand.u32 4294901760, %v4602_v6 }
 0x114   : > { %1390 = vmatpush2.msra.mxu0 %v6633_v0  ;;  %1575 = vmatpush2.msra.mxu1 %v6634_v60  ;;  %6659 = vst [vmem:[#allocation93_spill] sm:$0xff] %v4607_v57  ;;  %v6661_v38 = vand.u32 4294901760, %v6660_v55  ;;  %v6662_v0 = vld [vmem:[#allocation64_spill] sm:$0xff]  ;;  %v4613_v60 = vsub.f32 %v245_v22, %v4586_v35  ;;  %v6670_v22 = vld [vmem:[#allocation89_spill] sm:$0xff]  ;;  %v4644_v55 = vsub.f32 %v241_v34, %v4607_v57 }
 0x115   : > { %1394 = vmatprep.subr.mxu0 %v6636_v7  ;;  %1577 = vmatprep.subr.mxu1 %v6637_v8  ;;  %v6664_v7 = vld [vmem:[#allocation87_spill] sm:$0xff] }
 0x116   : > { %1398 = vmatpush2.msra.mxu0 %v6640_v19  ;;  %1579 = vmatpush2.msra.mxu1 %v6641_v20  ;;  %6663 = vst [vmem:[#allocation82_spill] sm:$0xff] %v4613_v60  ;;  %v6665_v8 = vand.u32 4294901760, %v6664_v7  ;;  %v4621_v19 = vsub.f32 %v243_v14, %v4596_v40  ;;  %v4623_v20 = vand.u32 4294901760, %v242_v33  ;;  %v6675_v14 = vld [vmem:[#allocation13_spill] sm:$0xff]  ;;  %6680 = vst [vmem:[#allocation88_spill] sm:$0xff] %v4644_v55  ;;  %v6131_v34 = vand.u32 4294901760, %v4613_v60 }
 0x117   : > { %1402 = vmatprep.subr.mxu0 %v6643_v26  ;;  %1581 = vmatprep.subr.mxu1 %v6644_v28  ;;  %v4626_v26 = vsub.f32 %v244_v13, %v4594_v63  ;;  %v6671_v28 = vand.u32 4294901760, %v6670_v22  ;;  %v6679_v13 = vld [vmem:[#allocation70_spill] sm:$0xff]  ;;  %v4652_v7 = vsub.f32 %v4589_v39, %v6129_v45  ;;  %v236_v22 = vld [vmem:[#allocation6 + $0x98] sm:$0xff] }
 0x118   : > { %1406 = vmatpush2.msra.mxu0 %v6648_v36  ;;  %1583 = vmatpush2.msra.mxu1 %v6649_v49  ;;  %6667 = vst [vmem:[#allocation95_spill] sm:$0xff] %v4621_v19  ;;  %6668 = vst [vmem:[#allocation84_spill] sm:$0xff] %v4623_v20  ;;  %v4631_v36 = vand.u32 4294901760, %v240_v12  ;;  %v4633_v49 = vand.u32 4294901760, %v239_v31 }
 0x119   : > { %1410 = vmatprep.subr.mxu0 %v6653_v58  ;;  %1585 = vmatprep.subr.mxu1 %v6654_v52  ;;  %6669 = vst [vmem:[#allocation97_spill] sm:$0xff] %v4626_v26  ;;  %v237_v58 = vld [vmem:[#allocation6 + $0xa0] sm:$0xff]  ;;  %v6676_v52 = vld [vmem:[#allocation103_spill] sm:$0xff] }
 0x11a   : > { %1414 = vmatpush2.msra.mxu0 %v6657_v47  ;;  %1587 = vmatpush2.msra.mxu1 %v6658_v17  ;;  %6673 = vst [vmem:[#allocation86_spill] sm:$0xff] %v4631_v36  ;;  %6674 = vst [vmem:[#allocation99_spill] sm:$0xff] %v4633_v49  ;;  %v4638_v42 = vrot.slane %v6676_v52, %v6675_v14  ;;  %v6677_v47 = vld [vmem:[#allocation91_spill] sm:$0xff]  ;;  %v4676_v45 = vsub.f32 %v239_v31, %v4633_v49  ;;  %v6710_v14 = vand.u32 4294901760, %v4228_v24 }
 0x11b   : > { %1418 = vmatprep.subr.mxu0 %v6661_v38  ;;  %1589 = vmatprep.subr.mxu1 %v6662_v0  ;;  %v6678_v17 = vand.u32 4294901760, %v6677_v47  ;;  %v6681_v38 = vand.u32 4294901760, %v6540_v61  ;;  %v6682_v0 = vld [vmem:[#allocation72_spill] sm:$0xff]  ;;  %v6684_v61 = vand.u32 4294901760, %v6542_v30  ;;  %v4665_v47 = vand.u32 4294901760, %v237_v58 }
 0x11c   : > { %1422 = vmatpush2.msra.mxu0 %v6665_v8  ;;  %1591 = vmatpush2.msra.mxu1 %v6666_v15  ;;  %v4657_v8 = vsub.f32 %v4584_v29, %v6128_v27  ;;  %v4659_v15 = vand.u32 4294901760, %v238_v21  ;;  %v6689_v27 = vld [vmem:[#allocation76_spill] sm:$0xff]  ;;  %6690 = vst [vmem:[#allocation33_spill] sm:$0xff] %v4676_v45  ;;  %v4681_v30 = vsub.f32 %v4602_v6, %v6130_v10  ;;  %v6696_v10 = vand.u32 4294901760, %v6548_v25 }
 0x11d   : > { %1426 = vmatprep.subr.mxu0 %v6671_v28  ;;  %1593 = vmatprep.subr.mxu1 %v6672_v44  ;;  %v235_v28 = vld [vmem:[#allocation6 + $0x90] sm:$0xff]  ;;  %v6685_v44 = vld [vmem:[#allocation74_spill] sm:$0xff]  ;;  %6686 = vst [vmem:[#allocation31_spill] sm:$0xff] %v4665_v47  ;;  %v4714_v25 = vsub.f32 %v237_v58, %v4665_v47  ;;  %v6717_v24 = vand.u32 4294901760, %v4676_v45 }
 0x11e   : > { %1430 = vmatpush2.msra.mxu0 %v6678_v17  ;;  %1595 = vmatpush2.msra.mxu1 %v6679_v13  ;;  %6683 = vst [vmem:[#allocation90_spill] sm:$0xff] %v4659_v15  ;;  %v4694_v31 = vand.u32 4294901760, %v235_v28  ;;  %v232_v13 = vld [vmem:[#allocation6 + $0x78] sm:$0xff] }
 0x11f   : > { %1434 = vmatprep.subr.mxu0 %v6681_v38  ;;  %1597 = vmatprep.subr.mxu1 %v6682_v0  ;;  %v4670_v38 = vsub.f32 %v242_v33, %v4623_v20  ;;  %v6688_v0 = vand.u32 4294901760, %v6544_v18  ;;  %v6693_v33 = vand.u32 4294901760, %v6546_v1  ;;  %v4692_v18 = vand.u32 4294901760, %v236_v22  ;;  %6700 = vst [vmem:[#allocation39_spill] sm:$0xff] %v4714_v25 }
 0x120   : > { %1438 = vmatpush2.msra.mxu0 %v6684_v61  ;;  %1599 = vmatpush2.msra.mxu1 %v6685_v44  ;;  %v4684_v61 = vsub.f32 %v240_v12, %v4631_v36  ;;  %v4687_v44 = vand.u32 4294901760, %v4638_v42  ;;  %6695 = vst [vmem:[#allocation37_spill] sm:$0xff] %v4694_v31  ;;  %v6697_v12 = vld [vmem:[#allocation80_spill] sm:$0xff]  ;;  %v4705_v1 = vsub.f32 %v4613_v60, %v6131_v34  ;;  %v6702_v34 = vand.u32 4294901760, %v4621_v19 }
 0x121   : > { %6687 = vst [vmem:[#allocation15_spill] sm:$0xff] %v4670_v38  ;;  %1442 = vmatprep.subr.mxu0 %v6688_v0  ;;  %1601 = vmatprep.subr.mxu1 %v6689_v27  ;;  %6694 = vst [vmem:[#allocation17_spill] sm:$0xff] %v4692_v18  ;;  %v234_v27 = vld [vmem:[#allocation6 + $0x88] sm:$0xff]  ;;  %v6699_v0 = vand.u32 4294901760, %v4186_v2  ;;  %v231_v2 = vld [vmem:[#allocation6 + $0x70] sm:$0xff] }
 0x122   : > { %6691 = vst [vmem:[#allocation16_spill] sm:$0xff] %v4684_v61  ;;  %6692 = vst [vmem:[#allocation35_spill] sm:$0xff] %v4687_v44  ;;  %1446 = vmatpush2.msra.mxu0 %v6693_v33  ;;  %1603 = vmatpush2.msra.mxu1 %v6539_v5  ;;  %v233_v5 = vld [vmem:[#allocation6 + $0x80] sm:$0xff]  ;;  %v4708_v33 = vsub.f32 %v238_v21, %v4659_v15  ;;  %v4724_v17 = vsub.f32 %v4621_v19, %v6702_v34  ;;  %v4731_v58 = vand.u32 4294901760, %v234_v27  ;;  %v223_v60 = vld [vmem:[#allocation6 + $0x30] sm:$0xff] }
 0x123   : > { %1450 = vmatprep.subr.mxu0 %v6696_v10  ;;  %1605 = vmatprep.subr.mxu1 %v6697_v12  ;;  %v6701_v10 = vand.u32 4294901760, %v4626_v26  ;;  %v6705_v34 = vand.u32 4294901760, %v4217_v59  ;;  %v4739_v21 = vsub.f32 %v235_v28, %v4694_v31  ;;  %v4757_v28 = vand.u32 4294901760, %v231_v2  ;;  %v230_v59 = vld [vmem:[#allocation6 + $0x68] sm:$0xff] }
 0x124   : > { %6698 = vst [vmem:[#allocation18_spill] sm:$0xff] %v4708_v33  ;;  %1454 = vmatpush2.msra.mxu0 %v6699_v0  ;;  %1607 = vmatpush2.msra.mxu1 %v6543_v46  ;;  %v6703_v0 = vand.u32 4294901760, %v4205_v50  ;;  %6704 = vst [vmem:[#allocation19_spill] sm:$0xff] %v4731_v58  ;;  %v4741_v50 = vand.u32 4294901760, %v233_v5  ;;  %v229_v46 = vld [vmem:[#allocation6 + $0x60] sm:$0xff]  ;;  %v4787_v19 = vsub.f32 %v234_v27, %v4731_v58 }
 0x125   : > { %v4719_v12 = vsub.f32 %v4626_v26, %v6701_v10  ;;  %1609 = vmatprep.subr.mxu1 %v6545_v16  ;;  %6706 = vst [vmem:[#allocation41_spill] sm:$0xff] %v4739_v21  ;;  %v6708_v16 = vand.u32 4294901760, %v4644_v55  ;;  %v4749_v10 = vsub.f32 %v236_v22, %v4692_v18  ;;  %6711 = vst [vmem:[#allocation22_spill] sm:$0xff] %v4757_v28  ;;  %v6715_v26 = vand.u32 4294901760, %v4245_v53 }
 0x126   : > { %1458 = vmatprep.subr.mxu0 %v6703_v0  ;;  %1611 = vmatpush2.msra.mxu1 %v6547_v51  ;;  %6707 = vst [vmem:[#allocation20_spill] sm:$0xff] %v4741_v50  ;;  %v4755_v51 = vand.u32 4294901760, %v232_v13  ;;  %v4782_v22 = vsub.f32 %v4676_v45, %v6717_v24  ;;  %6719 = vst [vmem:[#allocation24_spill] sm:$0xff] %v4787_v19  ;;  %v6720_v53 = vand.u32 4294901760, %v4252_v62  ;;  %v6722_v45 = vand.u32 4294901760, %v4264_v32  ;;  %v6728_v32 = vld [vmem:[#allocation94_spill] sm:$0xff] }
 0x127   : > { %1462 = vmatpush2.msra.mxu0 %v6705_v34  ;;  %v4746_v0 = vsub.f32 %v4644_v55, %v6708_v16  ;;  %6709 = vst [vmem:[#allocation43_spill] sm:$0xff] %v4749_v10  ;;  %1613 = vmatprep.subr.mxu1 %v6549_v23  ;;  %v6712_v16 = vand.u32 4294901760, %v4237_v37  ;;  %v6713_v55 = vld [vmem:[#allocation104_spill] sm:$0xff]  ;;  %v6716_v37 = vand.u32 4294901760, %v4684_v61  ;;  %v228_v34 = vld [vmem:[#allocation6 + $0x58] sm:$0xff]  ;;  %v4802_v27 = vsub.f32 %v231_v2, %v4757_v28 }
 0x128   : > { %1466 = vmatprep.subr.mxu0 %v6710_v14  ;;  %1496 = vmatprep.mubr.f32.mxu0 %v6713_v55  ;;  %v6714_v14 = vand.u32 4294901760, %v4670_v38  ;;  %v4804_v62 = vand.u32 4294901760, %v230_v59  ;;  %v4823_v24 = vand.u32 4294901760, %v228_v34 }
 0x129   : > { %1470 = vmatpush2.msra.mxu0 %v6712_v16  ;;  %1615 = vmatpush2.msra.mxu1 %v6550_v54  ;;  %v4777_v16 = vsub.f32 %v4684_v61, %v6716_v37  ;;  %v4793_v54 = vsub.f32 %v233_v5, %v4741_v50  ;;  %6723 = vst [vmem:[#allocation26_spill] sm:$0xff] %v4802_v27  ;;  %v6727_v37 = vand.u32 4294901760, %v4271_v11  ;;  %v6736_v61 = vld [vmem:[#allocation98_spill] sm:$0xff]  ;;  %v4880_v11 = vand.u32 4294901760, %v223_v60 }
 0x12a   : > { %v4768_v23 = vsub.f32 %v4670_v38, %v6714_v14  ;;  %1474 = vmatprep.subr.mxu0 %v6715_v26  ;;  %v4784_v14 = vand.u32 4294901760, %v229_v46  ;;  %v227_v38 = vld [vmem:[#allocation6 + $0x50] sm:$0xff]  ;;  %1617 = vmatprep.subr.mxu1 %v4116_v56  ;;  %6724 = vst [vmem:[#allocation49_spill] sm:$0xff] %v4804_v62  ;;  %v6725_v56 = vand.u32 4294901760, %v4708_v33  ;;  %v4812_v26 = vsub.f32 %v232_v13, %v4755_v51 }
 0x12b   : > { %1478 = vmatpush2.msra.mxu0 %v6720_v53  ;;  %6721 = vst [vmem:[#allocation47_spill] sm:$0xff] %v4793_v54  ;;  %1619 = vmatpush2.msra.mxu1 %v4127_v41  ;;  %v225_v53 = vld [vmem:[#allocation6 + $0x40] sm:$0xff]  ;;  %6730 = vst [vmem:[#allocation51_spill] sm:$0xff] %v4823_v24  ;;  %v6733_v13 = vld [vmem:[#allocation96_spill] sm:$0xff] }
 0x12c   : > { %6718 = vst [vmem:[#allocation45_spill] sm:$0xff] %v4784_v14  ;;  %1482 = vmatprep.subr.mxu0 %v6722_v45  ;;  %v4809_v5 = vsub.f32 %v4708_v33, %v6725_v56  ;;  %6726 = vst [vmem:[#allocation28_spill] sm:$0xff] %v4812_v26  ;;  %1621 = vmatprep.subr.mxu1 %v6728_v32  ;;  %v6729_v45 = vand.u32 4294901760, %v4714_v25  ;;  %v4825_v56 = vand.u32 4294901760, %v227_v38  ;;  %v6732_v33 = vand.u32 4294901760, %v4286_v48  ;;  %v226_v41 = vld [vmem:[#allocation6 + $0x48] sm:$0xff] }
 0x12d   : > { %1486 = vmatpush2.msra.mxu0 %v6727_v37  ;;  %1623 = vmatpush2.msra.mxu1 %v6733_v13  ;;  %v4833_v32 = vsub.f32 %v229_v46, %v4784_v14  ;;  %v6737_v48 = vand.u32 4294901760, %v4749_v10  ;;  %v6738_v13 = vand.u32 4294901760, %v4739_v21  ;;  %v4849_v46 = vand.u32 4294901760, %v225_v53  ;;  %6749 = vst [vmem:[#allocation38_spill] sm:$0xff] %v4880_v11 }
 0x12e   : > { %v4821_v2 = vsub.f32 %v4714_v25, %v6729_v45  ;;  %6731 = vst [vmem:[#allocation30_spill] sm:$0xff] %v4825_v56  ;;  %1490 = vmatprep.subr.mxu0 %v6732_v33  ;;  %v6735_v25 = vand.u32 4294901760, %v4290_v43  ;;  %1625 = vmatprep.subr.mxu1 %v6736_v61  ;;  %v224_v45 = vld [vmem:[#allocation6 + $0x38] sm:$0xff]  ;;  %v4866_v6 = vand.u32 4294901760, %v226_v41  ;;  %v4869_v61 = vsub.f32 %v228_v34, %v4823_v24  ;;  %v6750_v34 = vld [vmem:[#allocation102_spill] sm:$0xff] }
 0x12f   : > { %6734 = vst [vmem:[#allocation53_spill] sm:$0xff] %v4833_v32  ;;  %v4842_v33 = vsub.f32 %v4749_v10, %v6737_v48  ;;  %v4847_v37 = vsub.f32 %v4739_v21, %v6738_v13  ;;  %6739 = vst [vmem:[#allocation32_spill] sm:$0xff] %v4849_v46  ;;  %v6740_v43 = vld [vmem:[#allocation105_spill] sm:$0xff]  ;;  %v4858_v10 = vsub.f32 %v230_v59, %v4804_v62  ;;  %v6742_v13 = vld [vmem:[#allocation100_spill] sm:$0xff]  ;;  %v6747_v59 = vand.u32 4294901760, %v4787_v19 }
 0x130   : > { %1494 = vmatpush2.msra.mxu0 %v6735_v25  ;;  %1627 = vmatpush2.msra.mxu1 %v6742_v13  ;;  %v4864_v21 = vsub.f32 %v227_v38, %v4825_v56  ;;  %6744 = vst [vmem:[#allocation57_spill] sm:$0xff] %v4866_v6  ;;  %6745 = vst [vmem:[#allocation36_spill] sm:$0xff] %v4869_v61  ;;  %v6746_v48 = vld [vmem:[#allocation101_spill] sm:$0xff]  ;;  %v4878_v13 = vand.u32 4294901760, %v224_v45  ;;  %v222_v38 = vld [vmem:[#allocation6 + $0x28] sm:$0xff]  ;;  %v4888_v29 = vsub.f32 %v225_v53, %v4849_v46 }
 0x131   : > { %1498 = vmatmul.mubr.f32.vlgmr.msra.gmra.mxu0 %v6740_v43  ;;  %1653 = vmatprep.subr.mxu0 %v4565_v3  ;;  %6741 = vst [vmem:[#allocation55_spill] sm:$0xff] %v4858_v10  ;;  %v221_v3 = vld [vmem:[#allocation6 + $0x20] sm:$0xff]  ;;  %v4876_v25 = vsub.f32 %v4787_v19, %v6747_v59  ;;  %v6752_v59 = vand.u32 4294901760, %v4793_v54  ;;  %v218_v53 = vld [vmem:[#allocation6 + $0x8] sm:$0xff] }
 0x132   : > { %1655 = vmatpush1.msra.mxu0 %v4567_v4  ;;  %6743 = vst [vmem:[#allocation34_spill] sm:$0xff] %v4864_v21  ;;  %1629 = vmatprep.subr.mxu1 %v6746_v48  ;;  %6748 = vst [vmem:[#allocation59_spill] sm:$0xff] %v4878_v13  ;;  %v6753_v4 = vand.u32 4294901760, %v4812_v26 }
 0x133   : > { %1657 = vmatprep.subr.mxu0 %v4575_v9  ;;  %1631 = vmatpush2.msra.mxu1 %v6750_v34  ;;  %6751 = vst [vmem:[#allocation61_spill] sm:$0xff] %v4888_v29  ;;  %v4893_v19 = vsub.f32 %v4793_v54, %v6752_v59  ;;  %v6754_v9 = vand.u32 4294901760, %v4802_v27  ;;  %v220_v59 = vld [vmem:[#allocation6 + $0x18] sm:$0xff]  ;;  %v219_v54 = vld [vmem:[#allocation6 + $0x10] sm:$0xff] }
 0x134   : > { %1659 = vmatpush1.msra.mxu0 %v4586_v35  ;;  %1633 = vmatprep.mubr.f32.mxu1 %v6713_v55  ;;  %v4900_v34 = vsub.f32 %v4812_v26, %v6753_v4  ;;  %v4908_v35 = vand.u32 4294901760, %v221_v3  ;;  %v4912_v55 = vand.u32 4294901760, %v222_v38  ;;  %v217_v4 = vld [vmem:[#allocation6] sm:$0xff]  ;;  %v4932_v26 = vsub.f32 %v224_v45, %v4878_v13 }
 0x135   : > { %1661 = vmatprep.subr.mxu0 %v4594_v63  ;;  %v4905_v48 = vsub.f32 %v4802_v27, %v6754_v9  ;;  %1635 = vmatmul.mubr.f32.vlgmr.msra.gmra.mxu1 %v6740_v43  ;;  %v4917_v63 = vsub.f32 %v226_v41, %v4866_v6  ;;  %v6758_v9 = vand.u32 4294901760, %v4652_v7  ;;  %v4924_v27 = vsub.f32 %v223_v60, %v4880_v11 }
 0x136   : > { %6755 = vst [vmem:[#allocation40_spill] sm:$0xff] %v4908_v35  ;;  %1663 = vmatpush1.msra.mxu0 %v4596_v40  ;;  %6756 = vst [vmem:[#allocation63_spill] sm:$0xff] %v4912_v55  ;;  %v6760_v43 = vand.u32 4294901760, %v4833_v32  ;;  %v6762_v41 = vand.u32 4294901760, %v4657_v8  ;;  %v4940_v60 = vand.u32 4294901760, %v219_v54  ;;  %v6766_v8 = vand.u32 4294901760, %v4858_v10 }
 0x137   : > { %6757 = vst [vmem:[#allocation42_spill] sm:$0xff] %v4917_v63  ;;  %1665 = vmatprep.subr.mxu0 %v4623_v20  ;;  %1802 = vmatprep.subr.mxu1 %v6758_v9  ;;  %6759 = vst [vmem:[#allocation65_spill] sm:$0xff] %v4924_v27  ;;  %v4938_v9 = vand.u32 4294901760, %v220_v59  ;;  %v4954_v7 = vsub.f32 %v221_v3, %v4908_v35  ;;  %v6768_v20 = vand.u32 4294901760, %v4705_v1  ;;  %v280_v3 = vld [vmem:[#allocation6 + $0x1f8] sm:$0xff]  ;;  %v6782_v1 = vand.u32 4294901760, %v4746_v0 }
 0x138   : > { %v4929_v40 = vsub.f32 %v4833_v32, %v6760_v43  ;;  %6761 = vst [vmem:[#allocation44_spill] sm:$0xff] %v4932_v26  ;;  %1667 = vmatpush1.msra.mxu0 %v4607_v57  ;;  %1808 = vmatpush1.msra.mxu1 %v6762_v41  ;;  %6764 = vst [vmem:[#allocation46_spill] sm:$0xff] %v4940_v60  ;;  %v6765_v43 = vand.u32 4294901760, %v4681_v30  ;;  %v4951_v41 = vsub.f32 %v4858_v10, %v6766_v8 }
 0x139   : > { %6763 = vst [vmem:[#allocation67_spill] sm:$0xff] %v4938_v9  ;;  %1669 = vmatprep.subr.mxu0 %v4631_v36  ;;  %6767 = vst [vmem:[#allocation69_spill] sm:$0xff] %v4954_v7  ;;  %v6769_v30 = vand.u32 4294901760, %v4869_v61  ;;  %v6770_v32 = vand.u32 4294901760, %v4864_v21  ;;  %v4970_v10 = vand.u32 4294901760, %v217_v4  ;;  %v279_v36 = vld [vmem:[#allocation6 + $0x1f0] sm:$0xff] }
 0x13a   : > { %1814 = vmatprep.subr.mxu1 %v6765_v43  ;;  %1671 = vmatpush1.msra.mxu0 %v4633_v49  ;;  %v6775_v8 = vand.u32 4294901760, %v4724_v17  ;;  %v6779_v17 = vand.u32 4294901760, %v4768_v23  ;;  %v6783_v23 = vand.u32 4294901760, %v4917_v63  ;;  %v6786_v0 = vand.u32 4294901760, %v4932_v26 }
 0x13b   : > { %1820 = vmatpush1.msra.mxu1 %v6768_v20  ;;  %v4962_v43 = vsub.f32 %v4869_v61, %v6769_v30  ;;  %v4967_v45 = vsub.f32 %v4864_v21, %v6770_v32  ;;  %6771 = vst [vmem:[#allocation48_spill] sm:$0xff] %v4970_v10  ;;  %1673 = vmatprep.subr.mxu0 %v4659_v15  ;;  %v6772_v20 = vand.u32 4294901760, %v4719_v12  ;;  %v4976_v30 = vand.u32 4294901760, %v218_v53  ;;  %v278_v15 = vld [vmem:[#allocation6 + $0x1e8] sm:$0xff]  ;;  %v277_v61 = vld [vmem:[#allocation6 + $0x1e0] sm:$0xff] }
 0x13c   : > { %v4980_v32 = vsub.f32 %v222_v38, %v4912_v55  ;;  %1675 = vmatpush1.msra.mxu0 %v4665_v47  ;;  %v4986_v21 = vsub.f32 %v219_v54, %v4940_v60  ;;  %v6777_v12 = vand.u32 4294901760, %v4888_v29  ;;  %v4995_v38 = vsub.f32 %v220_v59, %v4938_v9 }
 0x13d   : > { %1826 = vmatprep.subr.mxu1 %v6772_v20  ;;  %6773 = vst [vmem:[#allocation71_spill] sm:$0xff] %v4976_v30  ;;  %1677 = vmatprep.subr.mxu0 %v4692_v18  ;;  %v5003_v47 = vand.u32 4294901760, %v279_v36  ;;  %v5017_v54 = vsub.f32 %v217_v4, %v4970_v10  ;;  %v5027_v59 = vand.u32 4294901760, %v278_v15  ;;  %v6789_v4 = vand.u32 4294901760, %v4782_v22 }
 0x13e   : > { %6774 = vst [vmem:[#allocation50_spill] sm:$0xff] %v4980_v32  ;;  %1832 = vmatpush1.msra.mxu1 %v6775_v8  ;;  %6776 = vst [vmem:[#allocation73_spill] sm:$0xff] %v4986_v21  ;;  %v4991_v20 = vsub.f32 %v4888_v29, %v6777_v12  ;;  %v5001_v8 = vand.u32 4294901760, %v280_v3  ;;  %1679 = vmatpush1.msra.mxu0 %v4694_v31  ;;  %v6785_v12 = vand.u32 4294901760, %v4777_v16  ;;  %v5030_v31 = vand.u32 4294901760, %v277_v61 }
 0x13f   : > { %6778 = vst [vmem:[#allocation52_spill] sm:$0xff] %v4995_v38  ;;  %1838 = vmatprep.subr.mxu1 %v6779_v17  ;;  %6781 = vst [vmem:[#allocation54_spill] sm:$0xff] %v5003_v47  ;;  %v5014_v17 = vsub.f32 %v4917_v63, %v6783_v23  ;;  %1681 = vmatprep.subr.mxu0 %v4731_v58  ;;  %v276_v23 = vld [vmem:[#allocation6 + $0x1d8] sm:$0xff]  ;;  %v275_v63 = vld [vmem:[#allocation6 + $0x1d0] sm:$0xff]  ;;  %v5043_v29 = vsub.f32 %v218_v53, %v4976_v30 }
 0x140   : > { %6780 = vst [vmem:[#allocation75_spill] sm:$0xff] %v5001_v8  ;;  %1844 = vmatpush1.msra.mxu1 %v6782_v1  ;;  %6784 = vst [vmem:[#allocation77_spill] sm:$0xff] %v5017_v54  ;;  %v5025_v1 = vsub.f32 %v4932_v26, %v6786_v0  ;;  %1683 = vmatpush1.msra.mxu0 %v4741_v50  ;;  %v273_v58 = vld [vmem:[#allocation6 + $0x1c0] sm:$0xff]  ;;  %v6792_v50 = vand.u32 4294901760, %v4809_v5  ;;  %v5049_v22 = vsub.f32 %v279_v36, %v5003_v47  ;;  %v274_v26 = vld [vmem:[#allocation6 + $0x1c8] sm:$0xff] }
 0x141   : > { %1850 = vmatprep.subr.mxu1 %v6785_v12  ;;  %6787 = vst [vmem:[#allocation56_spill] sm:$0xff] %v5027_v59  ;;  %6788 = vst [vmem:[#allocation79_spill] sm:$0xff] %v5030_v31  ;;  %v6790_v12 = vand.u32 4294901760, %v4924_v27  ;;  %1685 = vmatprep.subr.mxu0 %v4755_v51  ;;  %v5058_v53 = vsub.f32 %v280_v3, %v5001_v8  ;;  %v5064_v36 = vand.u32 4294901760, %v276_v23  ;;  %v5066_v5 = vand.u32 4294901760, %v275_v63 }
 0x142   : > { %1856 = vmatpush1.msra.mxu1 %v6789_v4  ;;  %6791 = vst [vmem:[#allocation58_spill] sm:$0xff] %v5043_v29  ;;  %6793 = vst [vmem:[#allocation81_spill] sm:$0xff] %v5049_v22  ;;  %v6794_v4 = vand.u32 4294901760, %v4954_v7  ;;  %1687 = vmatpush1.msra.mxu0 %v4757_v28 }
 0x143   : > { %v5039_v0 = vsub.f32 %v4924_v27, %v6790_v12  ;;  %1862 = vmatprep.subr.mxu1 %v6792_v50  ;;  %6795 = vst [vmem:[#allocation60_spill] sm:$0xff] %v5058_v53  ;;  %v6796_v27 = vand.u32 4294901760, %v4821_v2  ;;  %6797 = vst [vmem:[#allocation83_spill] sm:$0xff] %v5064_v36  ;;  %1689 = vmatprep.subr.mxu0 %v4804_v62  ;;  %v6799_v12 = vand.u32 4294901760, %v4842_v33  ;;  %v5081_v50 = vand.u32 4294901760, %v273_v58 }
 0x144   : > { %v5054_v16 = vsub.f32 %v4954_v7, %v6794_v4  ;;  %6798 = vst [vmem:[#allocation62_spill] sm:$0xff] %v5066_v5  ;;  %v6800_v7 = vand.u32 4294901760, %v4980_v32  ;;  %1691 = vmatpush1.msra.mxu0 %v4784_v14  ;;  %v6803_v4 = vand.u32 4294901760, %v4847_v37  ;;  %v5092_v62 = vand.u32 4294901760, %v274_v26  ;;  %v272_v14 = vld [vmem:[#allocation6 + $0x1b8] sm:$0xff] }
 0x145   : > { %1868 = vmatpush1.msra.mxu1 %v6796_v27  ;;  %v5079_v27 = vsub.f32 %v277_v61, %v5030_v31  ;;  %6802 = vst [vmem:[#allocation64_spill] sm:$0xff] %v5081_v50  ;;  %v271_v61 = vld [vmem:[#allocation6 + $0x1b0] sm:$0xff]  ;;  %1693 = vmatprep.subr.mxu0 %v4823_v24  ;;  %v6809_v24 = vand.u32 4294901760, %v4893_v19  ;;  %v5142_v19 = vand.u32 4294901760, %v272_v14 }
 0x146   : > { %1874 = vmatprep.subr.mxu1 %v6799_v12  ;;  %v5076_v2 = vsub.f32 %v4980_v32, %v6800_v7  ;;  %v6804_v12 = vand.u32 4294901760, %v4995_v38  ;;  %6805 = vst [vmem:[#allocation87_spill] sm:$0xff] %v5092_v62  ;;  %v6806_v32 = vand.u32 4294901760, %v4876_v25  ;;  %v269_v7 = vld [vmem:[#allocation6 + $0x1a0] sm:$0xff]  ;;  %1695 = vmatpush1.msra.mxu0 %v4825_v56  ;;  %v5112_v25 = vsub.f32 %v275_v63, %v5066_v5  ;;  %v270_v56 = vld [vmem:[#allocation6 + $0x1a8] sm:$0xff] }
 0x147   : > { %6801 = vst [vmem:[#allocation85_spill] sm:$0xff] %v5079_v27  ;;  %1880 = vmatpush1.msra.mxu1 %v6803_v4  ;;  %v6807_v4 = vand.u32 4294901760, %v4986_v21  ;;  %1697 = vmatprep.subr.mxu0 %v4866_v6  ;;  %v5128_v63 = vsub.f32 %v273_v58, %v5081_v50  ;;  %6818 = vst [vmem:[#allocation70_spill] sm:$0xff] %v5142_v19  ;;  %v5144_v58 = vand.u32 4294901760, %v269_v7  ;;  %v6823_v6 = vand.u32 4294901760, %v4929_v40 }
 0x148   : > { %v5090_v3 = vsub.f32 %v4995_v38, %v6804_v12  ;;  %1886 = vmatprep.subr.mxu1 %v6806_v32  ;;  %v5106_v38 = vsub.f32 %v278_v15, %v5027_v59  ;;  %6810 = vst [vmem:[#allocation89_spill] sm:$0xff] %v5112_v25  ;;  %v6811_v32 = vand.u32 4294901760, %v5017_v54  ;;  %v5121_v12 = vsub.f32 %v276_v23, %v5064_v36 }
 0x149   : > { %v5102_v33 = vsub.f32 %v4986_v21, %v6807_v4  ;;  %1892 = vmatpush1.msra.mxu1 %v6809_v24  ;;  %v6813_v15 = vand.u32 4294901760, %v4900_v34  ;;  %6814 = vst [vmem:[#allocation103_spill] sm:$0xff] %v5128_v63  ;;  %v5130_v24 = vand.u32 4294901760, %v271_v61  ;;  %1699 = vmatpush1.msra.mxu0 %v4849_v46  ;;  %v6816_v23 = vand.u32 4294901760, %v4905_v48  ;;  %6819 = vst [vmem:[#allocation72_spill] sm:$0xff] %v5144_v58 }
 0x14a   : > { %6808 = vst [vmem:[#allocation66_spill] sm:$0xff] %v5106_v38  ;;  %v5117_v4 = vsub.f32 %v5017_v54, %v6811_v32  ;;  %6812 = vst [vmem:[#allocation68_spill] sm:$0xff] %v5121_v12  ;;  %v6817_v34 = vand.u32 4294901760, %v5043_v29  ;;  %v267_v54 = vld [vmem:[#allocation6 + $0x190] sm:$0xff]  ;;  %1701 = vmatprep.subr.mxu0 %v4878_v13  ;;  %v6820_v32 = vand.u32 4294901760, %v4951_v41  ;;  %v5157_v46 = vsub.f32 %v274_v26, %v5092_v62 }
 0x14b   : > { %1898 = vmatprep.subr.mxu1 %v6813_v15  ;;  %6815 = vst [vmem:[#allocation91_spill] sm:$0xff] %v5130_v24  ;;  %1703 = vmatpush1.msra.mxu0 %v4880_v11  ;;  %v5168_v13 = vand.u32 4294901760, %v270_v56  ;;  %v6826_v26 = vand.u32 4294901760, %v4962_v43  ;;  %v5175_v40 = vsub.f32 %v271_v61, %v5130_v24  ;;  %v5190_v61 = vsub.f32 %v269_v7, %v5144_v58 }
 0x14c   : > { %1904 = vmatpush1.msra.mxu1 %v6816_v23  ;;  %v5140_v15 = vsub.f32 %v5043_v29, %v6817_v34  ;;  %v6821_v23 = vand.u32 4294901760, %v5058_v53  ;;  %6822 = vst [vmem:[#allocation74_spill] sm:$0xff] %v5157_v46  ;;  %1705 = vmatprep.subr.mxu0 %v4912_v55  ;;  %v6830_v34 = vand.u32 4294901760, %v4967_v45  ;;  %v6833_v11 = vand.u32 4294901760, %v5014_v17  ;;  %v263_v55 = vld [vmem:[#allocation6 + $0x170] sm:$0xff] }
 0x14d   : > { %1910 = vmatprep.subr.mxu1 %v6820_v32  ;;  %v6824_v32 = vand.u32 4294901760, %v5049_v22  ;;  %6825 = vst [vmem:[#allocation76_spill] sm:$0xff] %v5168_v13  ;;  %6827 = vst [vmem:[#allocation80_spill] sm:$0xff] %v5175_v40  ;;  %1707 = vmatpush1.msra.mxu0 %v4908_v35  ;;  %v6834_v45 = vand.u32 4294901760, %v5106_v38  ;;  %v6842_v17 = vand.u32 4294901760, %v5112_v25 }
 0x14e   : > { %v5153_v37 = vsub.f32 %v5058_v53, %v6821_v23  ;;  %1916 = vmatpush1.msra.mxu1 %v6823_v6  ;;  %v268_v23 = vld [vmem:[#allocation6 + $0x198] sm:$0xff]  ;;  %v6828_v6 = vand.u32 4294901760, %v5079_v27  ;;  %v1981_v43 = vand.u32 4294901760, %v5140_v15  ;;  %6831 = vst [vmem:[#allocation94_spill] sm:$0xff] %v5190_v61  ;;  %1709 = vmatprep.subr.mxu0 %v4938_v9 }
 0x14f   : > { %v5166_v48 = vsub.f32 %v5049_v22, %v6824_v32  ;;  %1922 = vmatprep.subr.mxu1 %v6826_v26  ;;  %v5182_v32 = vand.u32 4294901760, %v267_v54  ;;  %v265_v22 = vld [vmem:[#allocation6 + $0x180] sm:$0xff]  ;;  %v266_v26 = vld [vmem:[#allocation6 + $0x188] sm:$0xff]  ;;  %v5203_v15 = vsub.f32 %v5106_v38, %v6834_v45  ;;  %v5205_v7 = vand.u32 4294901760, %v268_v23  ;;  %1711 = vmatpush1.msra.mxu0 %v4940_v60 }
 0x150   : > { %v5180_v41 = vsub.f32 %v5079_v27, %v6828_v6  ;;  %1928 = vmatpush1.msra.mxu1 %v6830_v34  ;;  %v5194_v6 = vsub.f32 %v272_v14, %v5142_v19  ;;  %v6836_v14 = vand.u32 4294901760, %v4991_v20  ;;  %v5217_v9 = vand.u32 4294901760, %v265_v22  ;;  %1713 = vmatprep.subr.mxu0 %v4976_v30  ;;  %v262_v30 = vld [vmem:[#allocation6 + $0x168] sm:$0xff] }
 0x151   : > { %6829 = vst [vmem:[#allocation104_spill] sm:$0xff] %v5182_v32  ;;  %1934 = vmatprep.subr.mxu1 %v6833_v11  ;;  %6835 = vst [vmem:[#allocation98_spill] sm:$0xff] %v5205_v7  ;;  %v6837_v11 = vand.u32 4294901760, %v5121_v12  ;;  %v5220_v45 = vsub.f32 %v270_v56, %v5168_v13  ;;  %v6840_v34 = vand.u32 4294901760, %v5025_v1  ;;  %v5234_v60 = vand.u32 4294901760, %v266_v26  ;;  %1715 = vmatpush1.msra.mxu0 %v4970_v10 }
 0x152   : > { %6832 = vst [vmem:[#allocation96_spill] sm:$0xff] %v5194_v6  ;;  %1940 = vmatpush1.msra.mxu1 %v6836_v14  ;;  %6838 = vst [vmem:[#allocation105_spill] sm:$0xff] %v5217_v9  ;;  %v5227_v14 = vsub.f32 %v267_v54, %v5182_v32  ;;  %v6844_v56 = vand.u32 4294901760, %v5039_v0  ;;  %v6845_v1 = vand.u32 4294901760, %v5128_v63  ;;  %v5245_v20 = vand.u32 4294901760, %v263_v55  ;;  %1717 = vmatprep.subr.mxu0 %v5001_v8  ;;  %v260_v8 = vld [vmem:[#allocation6 + $0x158] sm:$0xff] }
 0x153   : > { %v5215_v35 = vsub.f32 %v5121_v12, %v6837_v11  ;;  %6839 = vst [vmem:[#allocation100_spill] sm:$0xff] %v5220_v45  ;;  %1946 = vmatprep.subr.mxu1 %v6840_v34  ;;  %v5232_v11 = vsub.f32 %v5112_v25, %v6842_v17  ;;  %6843 = vst [vmem:[#allocation102_spill] sm:$0xff] %v5234_v60  ;;  %v264_v12 = vld [vmem:[#allocation6 + $0x178] sm:$0xff]  ;;  %v261_v25 = vld [vmem:[#allocation6 + $0x160] sm:$0xff]  ;;  %v6847_v10 = vand.u32 4294901760, %v5076_v2  ;;  %v2005_v0 = vand.u32 4294901760, %v5203_v15 }
 0x154   : > { %6841 = vst [vmem:[#allocation101_spill] sm:$0xff] %v5227_v14  ;;  %1952 = vmatpush1.msra.mxu1 %v6844_v56  ;;  %v5242_v34 = vsub.f32 %v5128_v63, %v6845_v1  ;;  %6846 = vst [vmem:[#allocation106_spill] sm:$0xff] %v5245_v20  ;;  %v6848_v56 = vand.u32 4294901760, %v5157_v46  ;;  %v5259_v63 = vsub.f32 %v268_v23, %v5205_v7  ;;  %1719 = vmatpush2.msra.mxu0 %v5003_v47 }
 0x155   : > { %1958 = vmatprep.subr.mxu1 %v6847_v10  ;;  %v6850_v17 = vand.u32 4294901760, %v5054_v16  ;;  %v2017_v2 = vand.u32 4294901760, %v5215_v35  ;;  %v5266_v10 = vsub.f32 %v265_v22, %v5217_v9  ;;  %v5268_v15 = vand.u32 4294901760, %v264_v12  ;;  %1721 = vmatprep.subr.mxu0 %v5027_v59 }
 0x156   : > { %v5255_v1 = vsub.f32 %v5157_v46, %v6848_v56  ;;  %6849 = vst [vmem:[#allocation107_spill] sm:$0xff] %v5259_v63  ;;  %v6853_v54 = vand.u32 4294901760, %v5090_v3  ;;  %v2023_v23 = vand.u32 4294901760, %v5232_v11  ;;  %v5275_v47 = vand.u32 4294901760, %v262_v30  ;;  %1723 = vmatpush2.msra.mxu0 %v5030_v31  ;;  %v258_v31 = vld [vmem:[#allocation6 + $0x148] sm:$0xff] }
 0x157   : > { %1964 = vmatpush1.msra.mxu1 %v6850_v17  ;;  %6851 = vst [vmem:[#allocation108_spill] sm:$0xff] %v5266_v10  ;;  %6852 = vst [vmem:[#allocation109_spill] sm:$0xff] %v5268_v15  ;;  %v5277_v16 = vand.u32 4294901760, %v261_v25  ;;  %v259_v17 = vld [vmem:[#allocation6 + $0x150] sm:$0xff]  ;;  %v5280_v35 = vsub.f32 %v266_v26, %v5234_v60  ;;  %v6857_v22 = vand.u32 4294901760, %v5102_v33  ;;  %v6858_v3 = vand.u32 4294901760, %v5194_v6  ;;  %1725 = vmatprep.subr.mxu0 %v5064_v36 }
 0x158   : > { %1970 = vmatprep.subr.mxu1 %v6853_v54  ;;  %6854 = vst [vmem:[#allocation110_spill] sm:$0xff] %v5275_v47  ;;  %v5292_v11 = vsub.f32 %v263_v55, %v5245_v20  ;;  %v6860_v59 = vand.u32 4294901760, %v5175_v40  ;;  %v2029_v33 = vand.u32 4294901760, %v5255_v1  ;;  %1727 = vmatpush2.msra.mxu0 %v5066_v5  ;;  %v5316_v36 = vand.u32 4294901760, %v259_v17 }
 0x159   : > { %6855 = vst [vmem:[#allocation111_spill] sm:$0xff] %v5277_v16  ;;  %6856 = vst [vmem:[#allocation112_spill] sm:$0xff] %v5280_v35  ;;  %1976 = vmatpush1.msra.mxu1 %v6857_v22  ;;  %v5289_v54 = vsub.f32 %v5194_v6, %v6858_v3  ;;  %v6861_v22 = vand.u32 4294901760, %v5190_v61  ;;  %v257_v6 = vld [vmem:[#allocation6 + $0x140] sm:$0xff]  ;;  %v6866_v3 = vld [vmem:[#allocation12_spill] sm:$0xff]  ;;  %1729 = vmatprep.subr.mxu0 %v5092_v62  ;;  %v6868_v5 = vand.u32 4294901760, %v5153_v37 }
 0x15a   : > { %6859 = vst [vmem:[#allocation113_spill] sm:$0xff] %v5292_v11  ;;  %v5297_v26 = vsub.f32 %v5175_v40, %v6860_v59  ;;  %1982 = vmatprep.subr.mxu1 %v1981_v43  ;;  %v6862_v59 = vand.u32 4294901760, %v5117_v4  ;;  %v6863_v43 = vand.u32 4294901760, %v5220_v45  ;;  %6864 = vst [vmem:[#allocation114_spill] sm:$0xff] %v5316_v36  ;;  %v5328_v4 = vsub.f32 %v261_v25, %v5277_v16  ;;  %v255_v25 = vld [vmem:[#allocation6 + $0x130] sm:$0xff] }
 0x15b   : > { %v5304_v56 = vsub.f32 %v5190_v61, %v6861_v22  ;;  %v5319_v22 = vsub.f32 %v264_v12, %v5268_v15  ;;  %v6867_v61 = vsub.s32 1, %v6866_v3  ;;  %1731 = vmatpush2.msra.mxu0 %v5081_v50  ;;  %v6871_v12 = vand.u32 4294901760, %v5166_v48  ;;  %v253_v50 = vld [vmem:[#allocation6 + $0x120] sm:$0xff] }
 0x15c   : > { %1988 = vmatpush1.msra.mxu1 %v6862_v59  ;;  %v5314_v1 = vsub.f32 %v5220_v45, %v6863_v43  ;;  %6869 = vst [vmem:[#allocation12_spill] sm:$0xff] %v5328_v4  ;;  %v5330_v59 = vand.u32 4294901760, %v260_v8  ;;  %v5339_v37 = vand.u32 4294901760, %v258_v31  ;;  %1733 = vmatprep.subr.mxu0 %v5142_v19  ;;  %v6873_v45 = vand.u32 4294901760, %v5259_v63 }
 0x15d   : > { %6865 = vst [vmem:[#allocation115_spill] sm:$0xff] %v5319_v22  ;;  %v1649_v55 = vrot.slane %v6676_v52, %v6867_v61  ;;  %1994 = vmatprep.subr.mxu1 %v6868_v5  ;;  %v2041_v52 = vand.u32 4294901760, %v5289_v54  ;;  %v2047_v61 = vand.u32 4294901760, %v5297_v26  ;;  %v5341_v5 = vand.u32 4294901760, %v257_v6  ;;  %v256_v26 = vld [vmem:[#allocation6 + $0x138] sm:$0xff]  ;;  %1735 = vmatpush2.msra.mxu0 %v5130_v24 }
 0x15e   : > { %6870 = vst [vmem:[#allocation116_spill] sm:$0xff] %v5330_v59  ;;  %2000 = vmatpush2.msra.mxu1 %v6871_v12  ;;  %v2059_v3 = vand.u32 4294901760, %v5304_v56  ;;  %v5348_v43 = vsub.f32 %v5259_v63, %v6873_v45  ;;  %v6874_v48 = vand.u32 4294901760, %v5227_v14  ;;  %v5356_v12 = vsub.f32 %v262_v30, %v5275_v47  ;;  %1737 = vmatprep.subr.mxu0 %v5168_v13 }
 0x15f   : > { %6872 = vst [vmem:[#allocation117_spill] sm:$0xff] %v5341_v5  ;;  %2006 = vmatprep.subr.mxu1 %v2005_v0  ;;  %v6876_v0 = vand.u32 4294901760, %v5180_v41  ;;  %v2053_v56 = vand.u32 4294901760, %v5314_v1  ;;  %v5363_v45 = vsub.f32 %v259_v17, %v5316_v36  ;;  %v5366_v62 = vand.u32 4294901760, %v1649_v55  ;;  %v254_v17 = vld [vmem:[#allocation6 + $0x128] sm:$0xff]  ;;  %1739 = vmatpush2.msra.mxu0 %v5144_v58 }
 0x160   : > { %v5353_v54 = vsub.f32 %v5227_v14, %v6874_v48  ;;  %6875 = vst [vmem:[#allocation118_spill] sm:$0xff] %v5356_v12  ;;  %v6879_v30 = vand.u32 4294901760, %v5280_v35  ;;  %v6880_v41 = vand.u32 4294901760, %v5266_v10  ;;  %v5379_v1 = vand.u32 4294901760, %v255_v25  ;;  %1741 = vmatprep.subr.mxu0 %v5205_v7 }
 0x161   : > { %2012 = vmatpush2.msra.mxu1 %v6876_v0  ;;  %6877 = vst [vmem:[#allocation119_spill] sm:$0xff] %v5363_v45  ;;  %6878 = vst [vmem:[#allocation120_spill] sm:$0xff] %v5366_v62  ;;  %v5382_v19 = vsub.f32 %v260_v8, %v5330_v59  ;;  %v5388_v13 = vand.u32 4294901760, %v256_v26  ;;  %v5391_v24 = vand.u32 4294901760, %v253_v50  ;;  %1743 = vmatpush2.msra.mxu0 %v5182_v32  ;;  %v5406_v7 = vand.u32 4294901760, %v254_v17 }
 0x162   : > { %2018 = vmatprep.subr.mxu1 %v2017_v2  ;;  %v5372_v48 = vsub.f32 %v5280_v35, %v6879_v30  ;;  %v5377_v0 = vsub.f32 %v5266_v10, %v6880_v41  ;;  %v5386_v2 = vsub.f32 %v257_v6, %v5341_v5  ;;  %v2065_v41 = vand.u32 4294901760, %v5348_v43  ;;  %v252_v43 = vld [vmem:[#allocation6 + $0x118] sm:$0xff]  ;;  %1745 = vmatprep.subr.mxu0 %v5234_v60  ;;  %v251_v10 = vld [vmem:[#allocation6 + $0x110] sm:$0xff] }
 0x163   : > { %6881 = vst [vmem:[#allocation121_spill] sm:$0xff] %v5382_v19  ;;  %2024 = vmatpush2.msra.mxu1 %v2023_v23  ;;  %v2071_v8 = vand.u32 4294901760, %v5353_v54  ;;  %v5398_v23 = vsub.f32 %v258_v31, %v5339_v37  ;;  %v6883_v6 = vand.u32 4294901760, %v5242_v34  ;;  %v6884_v30 = vand.u32 4294901760, %v5319_v22  ;;  %1747 = vmatpush2.msra.mxu0 %v5217_v9  ;;  %v249_v9 = vld [vmem:[#allocation6 + $0x100] sm:$0xff] }
 0x164   : > { %2030 = vmatprep.subr.mxu1 %v2029_v33  ;;  %v5410_v54 = vsub.f32 %v1649_v55, %v5366_v62  ;;  %v2077_v31 = vand.u32 4294901760, %v5372_v48  ;;  %v2083_v34 = vand.u32 4294901760, %v5377_v0  ;;  %v6885_v33 = vand.u32 4294901760, %v5292_v11  ;;  %v250_v48 = vld [vmem:[#allocation6 + $0x108] sm:$0xff]  ;;  %1749 = vmatprep.subr.mxu0 %v5268_v15 }
 0x165   : > { %6882 = vst [vmem:[#allocation122_spill] sm:$0xff] %v5398_v23  ;;  %2036 = vmatpush2.msra.mxu1 %v6883_v6  ;;  %v2088_v58 = vsub.f32 %v5319_v22, %v6884_v30  ;;  %v5416_v6 = vsub.f32 %v255_v25, %v5379_v1  ;;  %v5424_v60 = vsub.f32 %v253_v50, %v5391_v24  ;;  %v6886_v25 = vand.u32 4294901760, %v5356_v12 }
 0x166   : > { %2042 = vmatprep.subr.mxu1 %v2041_v52  ;;  %v2094_v55 = vsub.f32 %v5292_v11, %v6885_v33  ;;  %v5428_v0 = vsub.f32 %v256_v26, %v5388_v13  ;;  %v5434_v30 = vand.u32 4294901760, %v252_v43  ;;  %v5439_v50 = vsub.f32 %v4638_v42, %v4687_v44  ;;  %1751 = vmatpush2.msra.mxu0 %v5245_v20 }
 0x167   : > { %2048 = vmatpush2.msra.mxu1 %v2047_v61  ;;  %v2100_v61 = vsub.f32 %v5356_v12, %v6886_v25  ;;  %v2089_v26 = vand.u32 4294901760, %v2088_v58  ;;  %v6887_v52 = vand.u32 4294901760, %v5328_v4  ;;  %v5445_v15 = vand.u32 4294901760, %v251_v10  ;;  %1753 = vmatprep.subr.mxu0 %v5275_v47 }
 0x168   : > { %2054 = vmatprep.subr.mxu1 %v2053_v56  ;;  %v6888_v33 = vand.u32 4294901760, %v5382_v19  ;;  %v5452_v32 = vand.u32 4294901760, %v250_v48  ;;  %v5456_v58 = vsub.f32 %v254_v17, %v5406_v7  ;;  %1755 = vmatpush2.msra.mxu0 %v5277_v16  ;;  %v6889_v25 = vand.u32 4294901760, %v5363_v45 }
 0x169   : > { %2060 = vmatpush2.msra.mxu1 %v2059_v3  ;;  %v2106_v56 = vsub.f32 %v5328_v4, %v6887_v52  ;;  %v2095_v52 = vand.u32 4294901760, %v2094_v55  ;;  %1757 = vmatprep.subr.mxu0 %v5330_v59  ;;  %v6891_v3 = vand.u32 4294901760, %v5398_v23  ;;  %v6892_v20 = vand.u32 4294901760, %v5410_v54 }
 0x16a   : > { %2066 = vmatprep.subr.mxu1 %v2065_v41  ;;  %v2112_v42 = vsub.f32 %v5382_v19, %v6888_v33  ;;  %v2118_v47 = vsub.f32 %v5363_v45, %v6889_v25  ;;  %v5462_v41 = vand.u32 4294901760, %v249_v9  ;;  %v2101_v33 = vand.u32 4294901760, %v2100_v61  ;;  %1759 = vmatpush2.msra.mxu0 %v5316_v36 }
 0x16b   : > { %2072 = vmatpush2.msra.mxu1 %v2071_v8  ;;  %v2124_v17 = vsub.f32 %v5398_v23, %v6891_v3  ;;  %v5471_v8 = vsub.f32 %v252_v43, %v5434_v30  ;;  %v2107_v55 = vand.u32 4294901760, %v2106_v56  ;;  %v5475_v25 = vsub.f32 %v251_v10, %v5445_v15  ;;  %1761 = vmatprep.subr.mxu0 %v5339_v37 }
 0x16c   : > { %6890 = vst [vmem:[#allocation123_spill] sm:$0xff] %v5462_v41  ;;  %2078 = vmatprep.subr.mxu1 %v2077_v31  ;;  %v1783_v31 = vsub.f32 %v5410_v54, %v6892_v20  ;;  %v2113_v3 = vand.u32 4294901760, %v2112_v42  ;;  %v6893_v43 = vand.u32 4294901760, %v5386_v2  ;;  %v5487_v56 = vsub.f32 %v250_v48, %v5452_v32  ;;  %1763 = vmatpush2.msra.mxu0 %v5341_v5 }
 0x16d   : > { %2084 = vmatpush2.msra.mxu1 %v2083_v34  ;;  %v2119_v10 = vand.u32 4294901760, %v2118_v47  ;;  %v5491_v20 = vsub.f32 %v249_v9, %v5462_v41  ;;  %v6895_v61 = vand.u32 4294901760, %v5428_v0  ;;  %1765 = vmatprep.subr.mxu0 %v5388_v13  ;;  %v6896_v48 = vand.u32 4294901760, %v5439_v50 }
 0x16e   : > { %2090 = vmatprep.subr.mxu1 %v2089_v26  ;;  %v2130_v16 = vsub.f32 %v5386_v2, %v6893_v43  ;;  %v2125_v43 = vand.u32 4294901760, %v2124_v17  ;;  %1767 = vmatpush2.msra.mxu0 %v5379_v1  ;;  %v1784_v47 = vand.u32 4294901760, %v1783_v31  ;;  %v6897_v9 = vand.u32 4294901760, %v5416_v6 }
 0x16f   : > { %2096 = vmatpush2.msra.mxu1 %v2095_v52  ;;  %6894 = vst [vmem:[#allocation124_spill] sm:$0xff] %v5491_v20  ;;  %v2136_v26 = vsub.f32 %v5428_v0, %v6895_v61  ;;  %v1789_v34 = vsub.f32 %v5439_v50, %v6896_v48  ;;  %1769 = vmatprep.subr.mxu0 %v5406_v7  ;;  %v6898_v17 = vand.u32 4294901760, %v5456_v58  ;;  %v6899_v31 = vand.u32 4294901760, %v5424_v60 }
 0x170   : > { %2102 = vmatprep.subr.mxu1 %v2101_v33  ;;  %v2142_v61 = vsub.f32 %v5416_v6, %v6897_v9  ;;  %v2131_v33 = vand.u32 4294901760, %v2130_v16  ;;  %1771 = vmatpush2.msra.mxu0 %v5391_v24  ;;  %v6902_v42 = vand.u32 4294901760, %v5487_v56 }
 0x171   : > { %2108 = vmatpush2.msra.mxu1 %v2107_v55  ;;  %v2148_v48 = vsub.f32 %v5456_v58, %v6898_v17  ;;  %v2137_v55 = vand.u32 4294901760, %v2136_v26  ;;  %v2154_v9 = vsub.f32 %v5424_v60, %v6899_v31  ;;  %1773 = vmatprep.subr.mxu0 %v5434_v30  ;;  %v1790_v16 = vand.u32 4294901760, %v1789_v34 }
 0x172   : > { %2114 = vmatprep.subr.mxu1 %v2113_v3  ;;  %v6900_v3 = vand.u32 4294901760, %v5471_v8  ;;  %1775 = vmatpush2.msra.mxu0 %v5445_v15  ;;  %v2143_v52 = vand.u32 4294901760, %v2142_v61  ;;  %v2172_v34 = vsub.f32 %v5487_v56, %v6902_v42 }
 0x173   : > { %2120 = vmatpush2.msra.mxu1 %v2119_v10  ;;  %1785 = vmatprep.mubr.f32.mxu0 %v1784_v47  ;;  %v6901_v10 = vand.u32 4294901760, %v5475_v25  ;;  %v2149_v31 = vand.u32 4294901760, %v2148_v48  ;;  %v6905_v48 = vld [vmem:[#allocation92_spill] sm:$0xff] }
 0x174   : > { %2126 = vmatprep.subr.mxu1 %v2125_v43  ;;  %v2160_v17 = vsub.f32 %v5471_v8, %v6900_v3  ;;  %1777 = vmatprep.subr.mxu0 %v5452_v32  ;;  %v2155_v43 = vand.u32 4294901760, %v2154_v9  ;;  %v6903_v3 = vand.u32 4294901760, %v5491_v20  ;;  %v2173_v42 = vand.u32 4294901760, %v2172_v34  ;;  %v6907_v9 = vld [vmem:[#allocation97_spill] sm:$0xff] }
 0x175   : > { %v2166_v26 = vsub.f32 %v5475_v25, %v6901_v10  ;;  %2132 = vmatpush2.msra.mxu1 %v2131_v33  ;;  %1779 = vmatpush2.msra.mxu0 %v5462_v41  ;;  %v6904_v10 = vld [vmem:[#allocation25_spill] sm:$0xff]  ;;  %v6906_v41 = vld [vmem:[#allocation82_spill] sm:$0xff] }
 0x176   : > { %2138 = vmatprep.subr.mxu1 %v2137_v55  ;;  %v2178_v47 = vsub.f32 %v5491_v20, %v6903_v3  ;;  %1791 = vmatmul.mubr.f32.vlgmr.msra.gmra.mxu0 %v1790_v16  ;;  %v2161_v61 = vand.u32 4294901760, %v2160_v17  ;;  %v6908_v16 = vld [vmem:[#allocation95_spill] sm:$0xff]  ;;  %v6913_v34 = vld [vmem:[#allocation33_spill] sm:$0xff]  ;;  %v6915_v3 = vld [vmem:[#allocation18_spill] sm:$0xff] }
 0x177   : > { %2192 = vmatprep.subr.mxu0 %v4589_v39  ;;  %2144 = vmatpush2.msra.mxu1 %v2143_v52  ;;  %v2167_v33 = vand.u32 4294901760, %v2166_v26  ;;  %v6909_v17 = vld [vmem:[#allocation15_spill] sm:$0xff]  ;;  %v6910_v52 = vld [vmem:[#allocation88_spill] sm:$0xff] }
 0x178   : > { %2195 = vmatpush1.msra.mxu0 %v6904_v10  ;;  %2150 = vmatprep.subr.mxu1 %v2149_v31  ;;  %v2179_v55 = vand.u32 4294901760, %v2178_v47  ;;  %v6911_v26 = vld [vmem:[#allocation16_spill] sm:$0xff]  ;;  %v6912_v31 = vld [vmem:[#allocation21_spill] sm:$0xff]  ;;  %v6916_v47 = vld [vmem:[#allocation23_spill] sm:$0xff] }
 0x179   : > { %2198 = vmatprep.subr.mxu0 %v6905_v48  ;;  %2156 = vmatpush2.msra.mxu1 %v2155_v43  ;;  %v6914_v43 = vld [vmem:[#allocation14_spill] sm:$0xff] }
 0x17a   : > { %2201 = vmatpush1.msra.mxu0 %v6906_v41  ;;  %2162 = vmatprep.subr.mxu1 %v2161_v61  ;;  %v6917_v61 = vld [vmem:[#allocation39_spill] sm:$0xff] }
 0x17b   : > { %2204 = vmatprep.subr.mxu0 %v6907_v9  ;;  %2168 = vmatpush2.msra.mxu1 %v2167_v33  ;;  %v6918_v33 = vld [vmem:[#allocation27_spill] sm:$0xff] }
 0x17c   : > { %2207 = vmatpush1.msra.mxu0 %v6908_v16  ;;  %2174 = vmatprep.subr.mxu1 %v2173_v42  ;;  %v6919_v42 = vld [vmem:[#allocation43_spill] sm:$0xff] }
 0x17d   : > { %2210 = vmatprep.subr.mxu0 %v6909_v17  ;;  %2180 = vmatpush2.msra.mxu1 %v2179_v55  ;;  %v6920_v55 = vld [vmem:[#allocation29_spill] sm:$0xff] }
 0x17e   : > { %2182 = vmatprep.mubr.f32.mxu1 %v5366_v62  ;;  %2213 = vmatpush1.msra.mxu0 %v6910_v52  ;;  %v6922_v62 = vld [vmem:[#allocation78_spill] sm:$0xff] }
 0x17f   : > { %2184 = vmatmul.mubr.f32.vlgmr.msra.gmra.mxu1 %v4687_v44  ;;  %2216 = vmatprep.subr.mxu0 %v6911_v26  ;;  %v6921_v44 = vld [vmem:[#allocation41_spill] sm:$0xff] }
 0x180   : > { %2394 = vmatprep.subr.mxu1 %v6912_v31  ;;  %2219 = vmatpush1.msra.mxu0 %v6913_v34  ;;  %v6923_v31 = vld [vmem:[#allocation24_spill] sm:$0xff] }
 0x181   : > { %2396 = vmatpush1.msra.mxu1 %v6914_v43  ;;  %2222 = vmatprep.subr.mxu0 %v6915_v3  ;;  %v6924_v34 = vld [vmem:[#allocation84_spill] sm:$0xff]  ;;  %v6925_v43 = vld [vmem:[#allocation47_spill] sm:$0xff] }
 0x182   : > { %2398 = vmatprep.subr.mxu1 %v6916_v47  ;;  %2225 = vmatpush1.msra.mxu0 %v6917_v61  ;;  %v6926_v47 = vld [vmem:[#allocation28_spill] sm:$0xff]  ;;  %v6927_v61 = vld [vmem:[#allocation86_spill] sm:$0xff] }
 0x183   : > { %2400 = vmatpush1.msra.mxu1 %v6918_v33  ;;  %2228 = vmatprep.subr.mxu0 %v6919_v42  ;;  %v6928_v33 = vld [vmem:[#allocation26_spill] sm:$0xff] }
 0x184   : > { %2402 = vmatprep.subr.mxu1 %v6920_v55  ;;  %2231 = vmatpush1.msra.mxu0 %v6921_v44  ;;  %v6929_v55 = vld [vmem:[#allocation55_spill] sm:$0xff]  ;;  %v6930_v44 = vld [vmem:[#allocation90_spill] sm:$0xff] }
 0x185   : > { %2404 = vmatpush1.msra.mxu1 %v6922_v62  ;;  %2234 = vmatprep.subr.mxu0 %v6923_v31  ;;  %v6931_v62 = vld [vmem:[#allocation53_spill] sm:$0xff]  ;;  %v6932_v31 = vld [vmem:[#allocation31_spill] sm:$0xff] }
 0x186   : > { %2406 = vmatprep.subr.mxu1 %v6924_v34  ;;  %2237 = vmatpush1.msra.mxu0 %v6925_v43  ;;  %v6933_v34 = vld [vmem:[#allocation36_spill] sm:$0xff] }
 0x187   : > { %2408 = vmatpush1.msra.mxu1 %v4607_v57  ;;  %2240 = vmatprep.subr.mxu0 %v6926_v47  ;;  %v6934_v57 = vld [vmem:[#allocation34_spill] sm:$0xff]  ;;  %v6935_v47 = vld [vmem:[#allocation37_spill] sm:$0xff] }
 0x188   : > { %2410 = vmatprep.subr.mxu1 %v6927_v61  ;;  %2243 = vmatpush1.msra.mxu0 %v6928_v33  ;;  %v6936_v61 = vld [vmem:[#allocation42_spill] sm:$0xff]  ;;  %v6937_v33 = vld [vmem:[#allocation19_spill] sm:$0xff] }
 0x189   : > { %2412 = vmatpush1.msra.mxu1 %v4633_v49  ;;  %2246 = vmatprep.subr.mxu0 %v6929_v55  ;;  %v6938_v49 = vld [vmem:[#allocation61_spill] sm:$0xff]  ;;  %v6939_v55 = vld [vmem:[#allocation20_spill] sm:$0xff] }
 0x18a   : > { %2414 = vmatprep.subr.mxu1 %v6930_v44  ;;  %2249 = vmatpush1.msra.mxu0 %v6931_v62  ;;  %v6940_v44 = vld [vmem:[#allocation44_spill] sm:$0xff] }
 0x18b   : > { %2416 = vmatpush1.msra.mxu1 %v6932_v31  ;;  %2252 = vmatprep.subr.mxu0 %v6933_v34  ;;  %v6941_v31 = vld [vmem:[#allocation65_spill] sm:$0xff] }
 0x18c   : > { %2418 = vmatprep.subr.mxu1 %v4692_v18  ;;  %2255 = vmatpush1.msra.mxu0 %v6934_v57  ;;  %v6942_v18 = vld [vmem:[#allocation50_spill] sm:$0xff]  ;;  %v6943_v57 = vld [vmem:[#allocation49_spill] sm:$0xff] }
 0x18d   : > { %2420 = vmatpush1.msra.mxu1 %v6935_v47  ;;  %2258 = vmatprep.subr.mxu0 %v6936_v61  ;;  %v6944_v47 = vld [vmem:[#allocation69_spill] sm:$0xff] }
 0x18e   : > { %2422 = vmatprep.subr.mxu1 %v6937_v33  ;;  %2261 = vmatpush1.msra.mxu0 %v6938_v49  ;;  %v6945_v61 = vld [vmem:[#allocation45_spill] sm:$0xff]  ;;  %v6946_v33 = vld [vmem:[#allocation52_spill] sm:$0xff]  ;;  %v6947_v49 = vld [vmem:[#allocation51_spill] sm:$0xff] }
 0x18f   : > { %2424 = vmatpush1.msra.mxu1 %v6939_v55  ;;  %2264 = vmatprep.subr.mxu0 %v6940_v44  ;;  %v6948_v44 = vld [vmem:[#allocation30_spill] sm:$0xff] }
 0x190   : > { %2426 = vmatprep.subr.mxu1 %v4755_v51  ;;  %2267 = vmatpush1.msra.mxu0 %v6941_v31  ;;  %v6949_v31 = vld [vmem:[#allocation57_spill] sm:$0xff] }
 0x191   : > { %2428 = vmatpush1.msra.mxu1 %v4757_v28  ;;  %2270 = vmatprep.subr.mxu0 %v6942_v18  ;;  %v6950_v28 = vld [vmem:[#allocation77_spill] sm:$0xff]  ;;  %v6951_v18 = vld [vmem:[#allocation32_spill] sm:$0xff] }
 0x192   : > { %2430 = vmatprep.subr.mxu1 %v6943_v57  ;;  %2273 = vmatpush1.msra.mxu0 %v6944_v47  ;;  %v6952_v47 = vld [vmem:[#allocation59_spill] sm:$0xff] }
 0x193   : > { %2432 = vmatpush1.msra.mxu1 %v6945_v61  ;;  %2276 = vmatprep.subr.mxu0 %v6946_v33  ;;  %v6953_v61 = vld [vmem:[#allocation81_spill] sm:$0xff]  ;;  %v6954_v33 = vld [vmem:[#allocation38_spill] sm:$0xff] }
 0x194   : > { %2434 = vmatprep.subr.mxu1 %v6947_v49  ;;  %2279 = vmatpush1.msra.mxu0 %v4986_v21  ;;  %v6955_v21 = vld [vmem:[#allocation63_spill] sm:$0xff] }
 0x195   : > { %2436 = vmatpush1.msra.mxu1 %v6948_v44  ;;  %2282 = vmatprep.subr.mxu0 %v5043_v29  ;;  %v6956_v29 = vld [vmem:[#allocation40_spill] sm:$0xff] }
 0x196   : > { %2438 = vmatprep.subr.mxu1 %v6949_v31  ;;  %2285 = vmatpush1.msra.mxu0 %v6950_v28  ;;  %v6957_v31 = vld [vmem:[#allocation68_spill] sm:$0xff]  ;;  %v6958_v28 = vld [vmem:[#allocation67_spill] sm:$0xff] }
 0x197   : > { %2440 = vmatpush1.msra.mxu1 %v6951_v18  ;;  %2288 = vmatprep.subr.mxu0 %v5058_v53  ;;  %v6959_v18 = vld [vmem:[#allocation89_spill] sm:$0xff]  ;;  %v6960_v53 = vld [vmem:[#allocation46_spill] sm:$0xff] }
 0x198   : > { %2442 = vmatprep.subr.mxu1 %v6952_v47  ;;  %2291 = vmatpush2.msra.mxu0 %v6953_v61  ;;  %v6961_v61 = vld [vmem:[#allocation71_spill] sm:$0xff] }
 0x199   : > { %2444 = vmatpush1.msra.mxu1 %v6954_v33  ;;  %2294 = vmatprep.subr.mxu0 %v5106_v38  ;;  %v6962_v33 = vld [vmem:[#allocation103_spill] sm:$0xff]  ;;  %v6963_v38 = vld [vmem:[#allocation48_spill] sm:$0xff] }
 0x19a   : > { %2446 = vmatprep.subr.mxu1 %v6955_v21  ;;  %2297 = vmatpush2.msra.mxu0 %v5079_v27  ;;  %v6964_v21 = vld [vmem:[#allocation96_spill] sm:$0xff]  ;;  %v6965_v27 = vld [vmem:[#allocation75_spill] sm:$0xff] }
 0x19b   : > { %2448 = vmatpush1.msra.mxu1 %v6956_v29  ;;  %2300 = vmatprep.subr.mxu0 %v6957_v31  ;;  %v6966_v31 = vld [vmem:[#allocation54_spill] sm:$0xff] }
 0x19c   : > { %2450 = vmatprep.subr.mxu1 %v6958_v28  ;;  %2303 = vmatpush2.msra.mxu0 %v6959_v18  ;;  %v6967_v28 = vld [vmem:[#allocation100_spill] sm:$0xff] }
 0x19d   : > { %2452 = vmatpush1.msra.mxu1 %v6960_v53  ;;  %2306 = vmatprep.subr.mxu0 %v5157_v46  ;;  %v6968_v18 = vld [vmem:[#allocation56_spill] sm:$0xff]  ;;  %v6969_v53 = vld [vmem:[#allocation94_spill] sm:$0xff]  ;;  %v6970_v46 = vld [vmem:[#allocation79_spill] sm:$0xff] }
 0x19e   : > { %2454 = vmatprep.subr.mxu1 %v6961_v61  ;;  %2309 = vmatpush2.msra.mxu0 %v6962_v33  ;;  %v6971_v33 = vld [vmem:[#allocation83_spill] sm:$0xff] }
 0x19f   : > { %2456 = vmatpush1.msra.mxu1 %v6963_v38  ;;  %2312 = vmatprep.subr.mxu0 %v6964_v21  ;;  %v6972_v21 = vld [vmem:[#allocation62_spill] sm:$0xff] }
 0x1a0   : > { %2458 = vmatprep.subr.mxu1 %v6965_v27  ;;  %2315 = vmatpush2.msra.mxu0 %v5175_v40  ;;  %v6973_v40 = vld [vmem:[#allocation87_spill] sm:$0xff] }
 0x1a1   : > { %2460 = vmatpush2.msra.mxu1 %v6966_v31  ;;  %2318 = vmatprep.subr.mxu0 %v6967_v28  ;;  %v6974_v31 = vld [vmem:[#allocation108_spill] sm:$0xff] }
 0x1a2   : > { %2462 = vmatprep.subr.mxu1 %v6968_v18  ;;  %2321 = vmatpush2.msra.mxu0 %v6969_v53  ;;  %v6975_v28 = vld [vmem:[#allocation64_spill] sm:$0xff]  ;;  %v6976_v53 = vld [vmem:[#allocation70_spill] sm:$0xff] }
 0x1a3   : > { %2464 = vmatpush2.msra.mxu1 %v6970_v46  ;;  %2324 = vmatprep.subr.mxu0 %v5259_v63  ;;  %v6977_v63 = vld [vmem:[#allocation91_spill] sm:$0xff] }
 0x1a4   : > { %2466 = vmatprep.subr.mxu1 %v6971_v33  ;;  %2327 = vmatpush2.msra.mxu0 %v5227_v14  ;;  %v6978_v14 = vld [vmem:[#allocation76_spill] sm:$0xff] }
 0x1a5   : > { %2468 = vmatpush2.msra.mxu1 %v6972_v21  ;;  %2330 = vmatprep.subr.mxu0 %v5280_v35  ;;  %v6979_v35 = vld [vmem:[#allocation72_spill] sm:$0xff] }
 0x1a6   : > { %2470 = vmatprep.subr.mxu1 %v6973_v40  ;;  %2333 = vmatpush2.msra.mxu0 %v6974_v31  ;;  %v6980_v31 = vld [vmem:[#allocation98_spill] sm:$0xff] }
 0x1a7   : > { %2472 = vmatpush2.msra.mxu1 %v6975_v28  ;;  %2336 = vmatprep.subr.mxu0 %v5319_v22  ;;  %v6981_v22 = vld [vmem:[#allocation104_spill] sm:$0xff] }
 0x1a8   : > { %2474 = vmatprep.subr.mxu1 %v6976_v53  ;;  %2339 = vmatpush2.msra.mxu0 %v5292_v11  ;;  %v6982_v11 = vld [vmem:[#allocation102_spill] sm:$0xff] }
 0x1a9   : > { %2476 = vmatpush2.msra.mxu1 %v6977_v63  ;;  %2342 = vmatprep.subr.mxu0 %v5356_v12  ;;  %v6983_v12 = vld [vmem:[#allocation105_spill] sm:$0xff] }
 0x1aa   : > { %2478 = vmatprep.subr.mxu1 %v6978_v14  ;;  %2345 = vmatpush2.msra.mxu0 %v5328_v4  ;;  %v6984_v4 = vld [vmem:[#allocation109_spill] sm:$0xff] }
 0x1ab   : > { %2480 = vmatpush2.msra.mxu1 %v6979_v35  ;;  %2348 = vmatprep.subr.mxu0 %v5382_v19  ;;  %v6985_v19 = vld [vmem:[#allocation106_spill] sm:$0xff] }
 0x1ac   : > { %2482 = vmatprep.subr.mxu1 %v6980_v31  ;;  %2351 = vmatpush2.msra.mxu0 %v5363_v45  ;;  %v6986_v45 = vld [vmem:[#allocation110_spill] sm:$0xff] }
 0x1ad   : > { %2484 = vmatpush2.msra.mxu1 %v6981_v22  ;;  %2354 = vmatprep.subr.mxu0 %v5398_v23  ;;  %v6987_v23 = vld [vmem:[#allocation111_spill] sm:$0xff] }
 0x1ae   : > { %2486 = vmatprep.subr.mxu1 %v6982_v11  ;;  %2357 = vmatpush2.msra.mxu0 %v5386_v2 }
 0x1af   : > { %2488 = vmatpush2.msra.mxu1 %v6983_v12  ;;  %2360 = vmatprep.subr.mxu0 %v5428_v0 }
 0x1b0   : > { %2490 = vmatprep.subr.mxu1 %v6984_v4  ;;  %2363 = vmatpush2.msra.mxu0 %v5416_v6 }
 0x1b1   : > { %2492 = vmatpush2.msra.mxu1 %v6985_v19  ;;  %2366 = vmatprep.subr.mxu0 %v5456_v58 }
 0x1b2   : > { %2494 = vmatprep.subr.mxu1 %v6986_v45  ;;  %2369 = vmatpush2.msra.mxu0 %v5424_v60 }
 0x1b3   : > { %2496 = vmatpush2.msra.mxu1 %v6987_v23  ;;  %2372 = vmatprep.subr.mxu0 %v5471_v8 }
 0x1b4   : > { %2498 = vmatprep.subr.mxu1 %v5330_v59  ;;  %2375 = vmatpush2.msra.mxu0 %v5475_v25  ;;  %v6988_v59 = vand.u32 4294901760, %v4589_v39  ;;  %v6992_v39 = vand.u32 4294901760, %v6907_v9  ;;  %v7000_v9 = vld [vmem:[#allocation21_spill] sm:$0xff] }
 0x1b5   : > { %2500 = vmatpush2.msra.mxu1 %v5316_v36  ;;  %2378 = vmatprep.subr.mxu0 %v5487_v56  ;;  %v6989_v36 = vand.u32 4294901760, %v6904_v10  ;;  %v6998_v10 = vand.u32 4294901760, %v5439_v50 }
 0x1b6   : > { %2502 = vmatprep.subr.mxu1 %v5339_v37  ;;  %2381 = vmatpush2.msra.mxu0 %v5491_v20  ;;  %v6990_v20 = vand.u32 4294901760, %v6905_v48  ;;  %v6999_v48 = vand.u32 4294901760, %v6911_v26  ;;  %v7009_v26 = vand.u32 4294901760, %v6919_v42 }
 0x1b7   : > { %2384 = vmatprep.mubr.f32.mxu0 %v5410_v54  ;;  %2504 = vmatpush2.msra.mxu1 %v5341_v5  ;;  %v6991_v5 = vand.u32 4294901760, %v6906_v41  ;;  %v6996_v41 = vand.u32 4294901760, %v5410_v54  ;;  %v7005_v54 = vld [vmem:[#allocation23_spill] sm:$0xff] }
 0x1b8   : > { %2387 = vmatmul.mubr.f32.vlgmr.msra.gmra.mxu0 %v5439_v50  ;;  %2506 = vmatprep.subr.mxu1 %v5388_v13  ;;  %v7008_v50 = vld [vmem:[#allocation27_spill] sm:$0xff] }
 0x1b9   : > { %2537 = vmatprep.subr.mxu0 %v6988_v59  ;;  %2508 = vmatpush2.msra.mxu1 %v5379_v1  ;;  %v6993_v59 = vand.u32 4294901760, %v6908_v16  ;;  %v7001_v16 = vld [vmem:[#allocation33_spill] sm:$0xff] }
 0x1ba   : > { %2541 = vmatpush1.msra.mxu0 %v6989_v36  ;;  %2510 = vmatprep.subr.mxu1 %v5406_v7  ;;  %v6994_v36 = vand.u32 4294901760, %v6909_v17  ;;  %v7003_v17 = vld [vmem:[#allocation14_spill] sm:$0xff] }
 0x1bb   : > { %2545 = vmatprep.subr.mxu0 %v6990_v20  ;;  %2512 = vmatpush2.msra.mxu1 %v5391_v24  ;;  %v6995_v20 = vld [vmem:[#allocation123_spill] sm:$0xff] }
 0x1bc   : > { %2549 = vmatpush1.msra.mxu0 %v6991_v5  ;;  %2514 = vmatprep.subr.mxu1 %v5434_v30  ;;  %v6997_v5 = vand.u32 4294901760, %v6910_v52  ;;  %v7006_v52 = vld [vmem:[#allocation39_spill] sm:$0xff] }
 0x1bd   : > { %2553 = vmatprep.subr.mxu0 %v6992_v39  ;;  %2516 = vmatpush2.msra.mxu1 %v5445_v15  ;;  %v7002_v39 = vand.u32 4294901760, %v7001_v16  ;;  %v7016_v16 = vld [vmem:[#allocation84_spill] sm:$0xff] }
 0x1be   : > { %2557 = vmatpush1.msra.mxu0 %v6993_v59  ;;  %2518 = vmatprep.subr.mxu1 %v5452_v32  ;;  %v7004_v59 = vand.u32 4294901760, %v6915_v3 }
 0x1bf   : > { %2561 = vmatprep.subr.mxu0 %v6994_v36  ;;  %2520 = vmatpush2.msra.mxu1 %v6995_v20  ;;  %v7007_v36 = vand.u32 4294901760, %v7006_v52  ;;  %v7022_v52 = vld [vmem:[#allocation26_spill] sm:$0xff] }
 0x1c0   : > { %2524 = vmatprep.mubr.f32.mxu1 %v6996_v41  ;;  %2565 = vmatpush1.msra.mxu0 %v6997_v5  ;;  %v7010_v41 = vld [vmem:[#allocation29_spill] sm:$0xff] }
 0x1c1   : > { %2528 = vmatmul.mubr.f32.vlgmr.msra.gmra.mxu1 %v6998_v10  ;;  %2569 = vmatprep.subr.mxu0 %v6999_v48  ;;  %v7011_v5 = vld [vmem:[#allocation41_spill] sm:$0xff]  ;;  %v7013_v48 = vld [vmem:[#allocation78_spill] sm:$0xff] }
 0x1c2   : > { %2800 = vmatprep.subr.mxu1 %v7000_v9  ;;  %2573 = vmatpush1.msra.mxu0 %v7002_v39  ;;  %v7012_v10 = vand.u32 4294901760, %v7011_v5  ;;  %v7014_v9 = vld [vmem:[#allocation24_spill] sm:$0xff]  ;;  %v7017_v39 = vand.u32 4294901760, %v6925_v43  ;;  %v7027_v5 = vld [vmem:[#allocation90_spill] sm:$0xff]  ;;  %v7028_v43 = vand.u32 4294901760, %v6931_v62 }
 0x1c3   : > { %2802 = vmatpush1.msra.mxu1 %v7003_v17  ;;  %2577 = vmatprep.subr.mxu0 %v7004_v59  ;;  %v7015_v3 = vand.u32 4294901760, %v7014_v9  ;;  %v7018_v17 = vld [vmem:[#allocation93_spill] sm:$0xff]  ;;  %v7019_v59 = vld [vmem:[#allocation28_spill] sm:$0xff] }
 0x1c4   : > { %2804 = vmatprep.subr.mxu1 %v7005_v54  ;;  %2581 = vmatpush1.msra.mxu0 %v7007_v36  ;;  %v7020_v42 = vand.u32 4294901760, %v7019_v59  ;;  %v7021_v54 = vld [vmem:[#allocation86_spill] sm:$0xff]  ;;  %v7023_v36 = vand.u32 4294901760, %v7022_v52  ;;  %v7031_v9 = vld [vmem:[#allocation17_spill] sm:$0xff]  ;;  %v7040_v52 = vld [vmem:[#allocation44_spill] sm:$0xff] }
 0x1c5   : > { %2806 = vmatpush1.msra.mxu1 %v7008_v50  ;;  %2585 = vmatprep.subr.mxu0 %v7009_v26  ;;  %v7024_v50 = vld [vmem:[#allocation99_spill] sm:$0xff] }
 0x1c6   : > { %2808 = vmatprep.subr.mxu1 %v7010_v41  ;;  %2589 = vmatpush1.msra.mxu0 %v7012_v10  ;;  %v7025_v26 = vld [vmem:[#allocation55_spill] sm:$0xff] }
 0x1c7   : > { %2810 = vmatpush1.msra.mxu1 %v7013_v48  ;;  %2593 = vmatprep.subr.mxu0 %v7015_v3  ;;  %v7026_v41 = vand.u32 4294901760, %v7025_v26  ;;  %v7029_v10 = vld [vmem:[#allocation31_spill] sm:$0xff]  ;;  %v7030_v48 = vand.u32 4294901760, %v6933_v34  ;;  %v7032_v3 = vld [vmem:[#allocation34_spill] sm:$0xff]  ;;  %v7041_v34 = vand.u32 4294901760, %v7040_v52 }
 0x1c8   : > { %2812 = vmatprep.subr.mxu1 %v7016_v16  ;;  %2597 = vmatpush1.msra.mxu0 %v7017_v39  ;;  %v7033_v16 = vand.u32 4294901760, %v7032_v3  ;;  %v7034_v39 = vld [vmem:[#allocation37_spill] sm:$0xff]  ;;  %v7044_v26 = vld [vmem:[#allocation22_spill] sm:$0xff] }
 0x1c9   : > { %2814 = vmatpush1.msra.mxu1 %v7018_v17  ;;  %2601 = vmatprep.subr.mxu0 %v7020_v42  ;;  %v7035_v17 = vld [vmem:[#allocation42_spill] sm:$0xff]  ;;  %v7037_v42 = vld [vmem:[#allocation19_spill] sm:$0xff] }
 0x1ca   : > { %2816 = vmatprep.subr.mxu1 %v7021_v54  ;;  %2605 = vmatpush1.msra.mxu0 %v7023_v36  ;;  %v7036_v59 = vand.u32 4294901760, %v7035_v17  ;;  %v7038_v54 = vld [vmem:[#allocation61_spill] sm:$0xff] }
 0x1cb   : > { %2818 = vmatpush1.msra.mxu1 %v7024_v50  ;;  %2609 = vmatprep.subr.mxu0 %v7026_v41  ;;  %v7039_v62 = vand.u32 4294901760, %v7038_v54  ;;  %v7042_v36 = vld [vmem:[#allocation65_spill] sm:$0xff]  ;;  %v7045_v41 = vld [vmem:[#allocation50_spill] sm:$0xff]  ;;  %v7060_v54 = vld [vmem:[#allocation60_spill] sm:$0xff] }
 0x1cc   : > { %2820 = vmatprep.subr.mxu1 %v7027_v5  ;;  %2613 = vmatpush1.msra.mxu0 %v7028_v43  ;;  %v7043_v50 = vand.u32 4294901760, %v7042_v36  ;;  %v7046_v5 = vand.u32 4294901760, %v7045_v41  ;;  %v7047_v43 = vld [vmem:[#allocation69_spill] sm:$0xff] }
 0x1cd   : > { %2822 = vmatpush1.msra.mxu1 %v7029_v10  ;;  %2617 = vmatprep.subr.mxu0 %v7030_v48  ;;  %v7048_v10 = vand.u32 4294901760, %v7047_v43  ;;  %v7049_v48 = vld [vmem:[#allocation45_spill] sm:$0xff] }
 0x1ce   : > { %2824 = vmatprep.subr.mxu1 %v7031_v9  ;;  %2621 = vmatpush1.msra.mxu0 %v7033_v16  ;;  %v7054_v16 = vld [vmem:[#allocation58_spill] sm:$0xff]  ;;  %v7056_v17 = vld [vmem:[#allocation57_spill] sm:$0xff] }
 0x1cf   : > { %2826 = vmatpush1.msra.mxu1 %v7034_v39  ;;  %2625 = vmatprep.subr.mxu0 %v7036_v59  ;;  %v7055_v39 = vand.u32 4294901760, %v7054_v16 }
 0x1d0   : > { %2828 = vmatprep.subr.mxu1 %v7037_v42  ;;  %2629 = vmatpush1.msra.mxu0 %v7039_v62  ;;  %v7059_v42 = vld [vmem:[#allocation32_spill] sm:$0xff]  ;;  %v7061_v62 = vand.u32 4294901760, %v7060_v54 }
 0x1d1   : > { %2830 = vmatpush1.msra.mxu1 %v6939_v55  ;;  %2633 = vmatprep.subr.mxu0 %v7041_v34  ;;  %v7050_v55 = vld [vmem:[#allocation52_spill] sm:$0xff]  ;;  %v7064_v34 = vld [vmem:[#allocation38_spill] sm:$0xff] }
 0x1d2   : > { %2832 = vmatprep.subr.mxu1 %v4755_v51  ;;  %2637 = vmatpush1.msra.mxu0 %v7043_v50  ;;  %v7051_v9 = vand.u32 4294901760, %v7050_v55  ;;  %v7052_v51 = vld [vmem:[#allocation73_spill] sm:$0xff]  ;;  %v7067_v50 = vld [vmem:[#allocation63_spill] sm:$0xff]  ;;  %v7075_v55 = vld [vmem:[#allocation46_spill] sm:$0xff] }
 0x1d3   : > { %2834 = vmatpush1.msra.mxu1 %v7044_v26  ;;  %2641 = vmatprep.subr.mxu0 %v7046_v5  ;;  %v7053_v3 = vand.u32 4294901760, %v7052_v51  ;;  %v7068_v26 = vld [vmem:[#allocation85_spill] sm:$0xff]  ;;  %v7070_v5 = vld [vmem:[#allocation68_spill] sm:$0xff] }
 0x1d4   : > { %2836 = vmatprep.subr.mxu1 %v6943_v57  ;;  %2645 = vmatpush1.msra.mxu0 %v7048_v10  ;;  %v7057_v57 = vld [vmem:[#allocation77_spill] sm:$0xff]  ;;  %v7069_v41 = vand.u32 4294901760, %v7068_v26  ;;  %v7071_v43 = vand.u32 4294901760, %v7070_v5  ;;  %v7072_v10 = vld [vmem:[#allocation67_spill] sm:$0xff] }
 0x1d5   : > { %2838 = vmatpush1.msra.mxu1 %v7049_v48  ;;  %2649 = vmatprep.subr.mxu0 %v7051_v9  ;;  %v7058_v59 = vand.u32 4294901760, %v7057_v57  ;;  %v7076_v9 = vld [vmem:[#allocation74_spill] sm:$0xff] }
 0x1d6   : > { %2840 = vmatprep.subr.mxu1 %v6947_v49  ;;  %2653 = vmatpush1.msra.mxu0 %v7053_v3  ;;  %v7062_v49 = vld [vmem:[#allocation81_spill] sm:$0xff]  ;;  %v7077_v51 = vand.u32 4294901760, %v7076_v9  ;;  %v7078_v3 = vld [vmem:[#allocation103_spill] sm:$0xff] }
 0x1d7   : > { %2842 = vmatpush1.msra.mxu1 %v6948_v44  ;;  %2657 = vmatprep.subr.mxu0 %v7055_v39  ;;  %v7063_v52 = vand.u32 4294901760, %v7062_v49  ;;  %v7065_v44 = vld [vmem:[#allocation66_spill] sm:$0xff]  ;;  %v7079_v16 = vand.u32 4294901760, %v7078_v3 }
 0x1d8   : > { %2844 = vmatprep.subr.mxu1 %v7056_v17  ;;  %2661 = vmatpush1.msra.mxu0 %v7058_v59  ;;  %v7066_v36 = vand.u32 4294901760, %v7065_v44  ;;  %v7082_v17 = vld [vmem:[#allocation80_spill] sm:$0xff]  ;;  %v7084_v59 = vld [vmem:[#allocation54_spill] sm:$0xff] }
 0x1d9   : > { %2846 = vmatpush1.msra.mxu1 %v7059_v42  ;;  %2665 = vmatprep.subr.mxu0 %v7061_v62  ;;  %v7083_v57 = vand.u32 4294901760, %v7082_v17  ;;  %v7085_v42 = vld [vmem:[#allocation100_spill] sm:$0xff] }
 0x1da   : > { %2848 = vmatprep.subr.mxu1 %v6952_v47  ;;  %2669 = vmatpush2.msra.mxu0 %v7063_v52  ;;  %v7073_v47 = vld [vmem:[#allocation89_spill] sm:$0xff]  ;;  %v7086_v54 = vand.u32 4294901760, %v7085_v42 }
 0x1db   : > { %2850 = vmatpush1.msra.mxu1 %v7064_v34  ;;  %2673 = vmatprep.subr.mxu0 %v7066_v36  ;;  %v7074_v48 = vand.u32 4294901760, %v7073_v47  ;;  %v7093_v34 = vld [vmem:[#allocation112_spill] sm:$0xff] }
 0x1dc   : > { %2852 = vmatprep.subr.mxu1 %v7067_v50  ;;  %2677 = vmatpush2.msra.mxu0 %v7069_v41  ;;  %v7094_v44 = vand.u32 4294901760, %v7093_v34 }
 0x1dd   : > { %2854 = vmatpush1.msra.mxu1 %v6956_v29  ;;  %2681 = vmatprep.subr.mxu0 %v7071_v43  ;;  %v7080_v29 = vld [vmem:[#allocation96_spill] sm:$0xff] }
 0x1de   : > { %2856 = vmatprep.subr.mxu1 %v7072_v10  ;;  %2685 = vmatpush2.msra.mxu0 %v7074_v48  ;;  %v7081_v39 = vand.u32 4294901760, %v7080_v29 }
 0x1df   : > { %2858 = vmatpush1.msra.mxu1 %v7075_v55  ;;  %2689 = vmatprep.subr.mxu0 %v7077_v51 }
 0x1e0   : > { %2860 = vmatprep.subr.mxu1 %v6961_v61  ;;  %2693 = vmatpush2.msra.mxu0 %v7079_v16  ;;  %v7087_v61 = vld [vmem:[#allocation94_spill] sm:$0xff] }
 0x1e1   : > { %2862 = vmatpush1.msra.mxu1 %v6963_v38  ;;  %2697 = vmatprep.subr.mxu0 %v7081_v39  ;;  %v7088_v62 = vand.u32 4294901760, %v7087_v61  ;;  %v7089_v38 = vld [vmem:[#allocation107_spill] sm:$0xff] }
 0x1e2   : > { %2864 = vmatprep.subr.mxu1 %v6965_v27  ;;  %2701 = vmatpush2.msra.mxu0 %v7083_v57  ;;  %v7090_v49 = vand.u32 4294901760, %v7089_v38  ;;  %v7091_v27 = vld [vmem:[#allocation101_spill] sm:$0xff] }
 0x1e3   : > { %2866 = vmatpush2.msra.mxu1 %v7084_v59  ;;  %2705 = vmatprep.subr.mxu0 %v7086_v54  ;;  %v7092_v52 = vand.u32 4294901760, %v7091_v27 }
 0x1e4   : > { %2868 = vmatprep.subr.mxu1 %v6968_v18  ;;  %2709 = vmatpush2.msra.mxu0 %v7088_v62  ;;  %v7095_v18 = vld [vmem:[#allocation108_spill] sm:$0xff] }
 0x1e5   : > { %2870 = vmatpush2.msra.mxu1 %v6970_v46  ;;  %2713 = vmatprep.subr.mxu0 %v7090_v49  ;;  %v7096_v36 = vand.u32 4294901760, %v7095_v18  ;;  %v7097_v46 = vld [vmem:[#allocation115_spill] sm:$0xff] }
 0x1e6   : > { %2872 = vmatprep.subr.mxu1 %v6971_v33  ;;  %2717 = vmatpush2.msra.mxu0 %v7092_v52  ;;  %v7098_v50 = vand.u32 4294901760, %v7097_v46  ;;  %v7099_v33 = vld [vmem:[#allocation113_spill] sm:$0xff] }
 0x1e7   : > { %2874 = vmatpush2.msra.mxu1 %v6972_v21  ;;  %2721 = vmatprep.subr.mxu0 %v7094_v44  ;;  %v7100_v26 = vand.u32 4294901760, %v7099_v33  ;;  %v7101_v21 = vld [vmem:[#allocation118_spill] sm:$0xff] }
 0x1e8   : > { %2876 = vmatprep.subr.mxu1 %v6973_v40  ;;  %2725 = vmatpush2.msra.mxu0 %v7096_v36  ;;  %v7102_v41 = vand.u32 4294901760, %v7101_v21  ;;  %v7103_v40 = vld [vmem:[#allocation12_spill] sm:$0xff] }
 0x1e9   : > { %2878 = vmatpush2.msra.mxu1 %v6975_v28  ;;  %2729 = vmatprep.subr.mxu0 %v7098_v50  ;;  %v7104_v5 = vand.u32 4294901760, %v7103_v40  ;;  %v7105_v28 = vld [vmem:[#allocation121_spill] sm:$0xff] }
 0x1ea   : > { %2880 = vmatprep.subr.mxu1 %v6976_v53  ;;  %2733 = vmatpush2.msra.mxu0 %v7100_v26  ;;  %v7106_v43 = vand.u32 4294901760, %v7105_v28  ;;  %v7107_v53 = vld [vmem:[#allocation119_spill] sm:$0xff] }
 0x1eb   : > { %2882 = vmatpush2.msra.mxu1 %v6977_v63  ;;  %2737 = vmatprep.subr.mxu0 %v7102_v41  ;;  %v7108_v10 = vand.u32 4294901760, %v7107_v53  ;;  %v7109_v63 = vld [vmem:[#allocation122_spill] sm:$0xff] }
 0x1ec   : > { %2884 = vmatprep.subr.mxu1 %v6978_v14  ;;  %2741 = vmatpush2.msra.mxu0 %v7104_v5  ;;  %v7110_v47 = vand.u32 4294901760, %v7109_v63  ;;  %v7111_v14 = vand.u32 4294901760, %v5386_v2  ;;  %v7117_v2 = vld [vmem:[#allocation116_spill] sm:$0xff]  ;;  %v2937_v5 = vstv %s2936_s19 }
 0x1ed   : > { %2886 = vmatpush2.msra.mxu1 %v6979_v35  ;;  %2745 = vmatprep.subr.mxu0 %v7106_v43  ;;  %v7112_v35 = vand.u32 4294901760, %v5428_v0  ;;  %v7123_v0 = vld [vmem:[#allocation120_spill] sm:$0xff] }
 0x1ee   : > { %2888 = vmatprep.subr.mxu1 %v6980_v31  ;;  %2749 = vmatpush2.msra.mxu0 %v7108_v10  ;;  %v7113_v31 = vand.u32 4294901760, %v5416_v6  ;;  %v7119_v6 = vld [vmem:[#allocation114_spill] sm:$0xff] }
 0x1ef   : > { %2890 = vmatpush2.msra.mxu1 %v6981_v22  ;;  %2753 = vmatprep.subr.mxu0 %v7110_v47  ;;  %v7114_v22 = vand.u32 4294901760, %v5456_v58  ;;  %v7125_v58 = vld [vmem:[#allocation35_spill] sm:$0xff] }
 0x1f0   : > { %2892 = vmatprep.subr.mxu1 %v6982_v11  ;;  %2757 = vmatpush2.msra.mxu0 %v7111_v14  ;;  %v7115_v11 = vand.u32 4294901760, %v5424_v60 }
 0x1f1   : > { %2894 = vmatpush2.msra.mxu1 %v6983_v12  ;;  %2761 = vmatprep.subr.mxu0 %v7112_v35  ;;  %v7116_v12 = vand.u32 4294901760, %v5471_v8  ;;  %v890_v8 = vpop.f32.mrf.mxu1 }
 0x1f2   : > { %2896 = vmatprep.subr.mxu1 %v6984_v4  ;;  %2765 = vmatpush2.msra.mxu0 %v7113_v31  ;;  %v7118_v4 = vand.u32 4294901760, %v5475_v25 }
 0x1f3   : > { %2898 = vmatpush2.msra.mxu1 %v6985_v19  ;;  %2769 = vmatprep.subr.mxu0 %v7114_v22  ;;  %v7120_v19 = vand.u32 4294901760, %v5487_v56  ;;  %v892_v56 = vpop.f32.mrf.mxu1 }
 0x1f4   : > { %2900 = vmatprep.subr.mxu1 %v6986_v45  ;;  %2773 = vmatpush2.msra.mxu0 %v7115_v11  ;;  %v7121_v45 = vld [vmem:[#allocation124_spill] sm:$0xff] }
 0x1f5   : > { %2902 = vmatpush2.msra.mxu1 %v6987_v23  ;;  %2777 = vmatprep.subr.mxu0 %v7116_v12  ;;  %v7122_v60 = vand.u32 4294901760, %v7121_v45  ;;  %v7124_v23 = vld [vmem:[#allocation117_spill] sm:$0xff]  ;;  %v1234_v48 = vpop.f32.mrf.mxu1 }
 0x1f6   : > { %2904 = vmatprep.subr.mxu1 %v7117_v2  ;;  %2781 = vmatpush2.msra.mxu0 %v7118_v4 }
 0x1f7   : > { %2906 = vmatpush2.msra.mxu1 %v7119_v6  ;;  %2785 = vmatprep.subr.mxu0 %v7120_v19  ;;  %v1236_v55 = vpop.f32.mrf.mxu1  ;;  %v7126_v6 = vld [vmem:[#allocation13_spill] sm:$0xff] }
 0x1f8   : > { %2908 = vmatprep.subr.mxu1 %v5339_v37  ;;  %2789 = vmatpush2.msra.mxu0 %v7122_v60  ;;  %v497_v37 = vpop.f32.mrf.mxu0  ;;  %v2952_v60 = vld [vmem:[%s3417_s26] sm:$0xff] }
 0x1f9   : > { %2791 = vmatprep.mubr.f32.mxu0 %v7123_v0  ;;  %2910 = vmatpush2.msra.mxu1 %v7124_v23  ;;  %v1636_v9 = vpop.f32.mrf.mxu1 }
 0x1fa   : > { %2793 = vmatmul.mubr.f32.vlgmr.msra.gmra.mxu0 %v7125_v58  ;;  %2912 = vmatprep.subr.mxu1 %v5388_v13  ;;  %v499_v13 = vpop.f32.mrf.mxu0 }
 0x1fb   : > { %2928 = vmatprep.mubr.f32.mxu1 %v7123_v0  ;;  %2914 = vmatpush2.msra.mxu1 %v5379_v1 }
 0x1fc   : > { %2916 = vmatprep.subr.mxu1 %v5406_v7  ;;  %v1093_v25 = vpop.f32.mrf.mxu0 }
 0x1fd   : > { %2918 = vmatpush2.msra.mxu1 %v5391_v24 }
 0x1fe   : > { %2920 = vmatprep.subr.mxu1 %v5434_v30  ;;  %v1095_v1 = vpop.f32.mrf.mxu0  ;;  %v891_v30 = vadd.f32 %v890_v8, %v497_v37 }
 0x1ff   : > { %2922 = vmatpush2.msra.mxu1 %v5445_v15  ;;  %v893_v15 = vadd.f32 %v892_v56, %v499_v13 }
 0x200   : > { %2924 = vmatprep.subr.mxu1 %v5452_v32  ;;  %v1499_v7 = vpop.f32.mrf.mxu0  ;;  %v1094_v3 = vadd.f32 %v1093_v25, %v891_v30  ;;  %v1638_v32 = vpop.f32.mrf.mxu1 }
 0x201   : > { %2926 = vmatpush2.msra.mxu1 %v6995_v20  ;;  %v1096_v16 = vadd.f32 %v1095_v1, %v893_v15 }
 0x202   : > { %2930 = vmatmul.mubr.f32.vlgmr.msra.gmra.mxu1 %v7125_v58  ;;  %v1501_v24 = vpop.f32.mrf.mxu0  ;;  %v1235_v20 = vadd.f32 %v1234_v48, %v1094_v3 }
 0x203   : > { %v1237_v17 = vadd.f32 %v1236_v55, %v1096_v16 }
 0x204   : > { %v1500_v57 = vadd.f32 %v1499_v7, %v1235_v20 }
 0x205   : > { %v1502_v42 = vadd.f32 %v1501_v24, %v1237_v17 }
 0x206   : > { %v1637_v54 = vadd.f32 %v1636_v9, %v1500_v57 }
 0x207   : > { %v1639_v62 = vadd.f32 %v1638_v32, %v1502_v42 }
 0x236   : > { %v1792_v51 = vpop.f32.mrf.mxu0 }
 0x237   : > { %v1793_v38 = vadd.f32 %v1792_v51, %v1637_v54 }
 0x238   : > { %v1794_v29 = vpop.f32.mrf.mxu0 }
 0x239   : > { %v1795_v52 = vadd.f32 %v1794_v29, %v1639_v62 }
 0x23f   : > { %v2185_v39 = vpop.f32.mrf.mxu1 }
 0x240   : > { %v2186_v34 = vadd.f32 %v2185_v39, %v1793_v38 }
 0x241   : > { %v2187_v61 = vpop.f32.mrf.mxu1 }
 0x242   : > { %v2188_v18 = vadd.f32 %v2187_v61, %v1795_v52 }
 0x278   : > { %v2388_v59 = vpop.f32.mrf.mxu0 }
 0x279   : > { %v2389_v36 = vadd.f32 %v2388_v59, %v2186_v34 }
 0x27a   : > { %v2390_v49 = vpop.f32.mrf.mxu0 }
 0x27b   : > { %v2391_v50 = vadd.f32 %v2390_v49, %v2188_v18 }
 0x281   : > { %v2529_v27 = vpop.f32.mrf.mxu1 }
 0x282   : > { %v2530_v33 = vadd.f32 %v2529_v27, %v2389_v36 }
 0x283   : > { %v2531_v46 = vpop.f32.mrf.mxu1 }
 0x284   : > { %v2532_v21 = vadd.f32 %v2531_v46, %v2391_v50 }
 0x2ba   : > { %v2794_v44 = vpop.f32.mrf.mxu0 }
 0x2bb   : > { %v2795_v41 = vadd.f32 %v2794_v44, %v2530_v33 }
 0x2bc   : > { %v2796_v26 = vpop.f32.mrf.mxu0 }
 0x2bd   : > { %v2797_v28 = vadd.f32 %v2796_v26, %v2532_v21 }
 0x2c2   : > { %v2931_v40 = vpop.f32.mrf.mxu1 }
 0x2c3   : > { %v2932_v43 = vadd.f32 %v2931_v40, %v2795_v41 }
 0x2c4   : > { %v2933_v53 = vpop.f32.mrf.mxu1 }
 0x2c5   : > { %v2938_v10 = vadd.f32 %v2937_v5, %v2932_v43  ;;  %v2934_v63 = vadd.f32 %v2933_v53, %v2797_v28 }
 0x2c7   : > { %v3076_v47 = vmul.f32 -1.442695, %v2938_v10  ;;  %v2939_v14 = vadd.f32 %v2937_v5, %v2934_v63 }
 0x2c9   : > { %3144 = vpow2.f32 %v3076_v47  ;;  %v3077_v35 = vmul.f32 -1.442695, %v2939_v14 }
 0x2cb   : > { %3146 = vpow2.f32 %v3077_v35 }
 0x2d6   : > { %v3145_v31 = vpop.eup %3144 }
 0x2d7   : > { %v2946_v22 = vadd.f32 1.0, %v3145_v31 }
 0x2d8   : > { %v3147_v11 = vpop.eup %3146 }
 0x2d9   : > { %3148 = vrcp.f32 %v2946_v22  ;;  %v2947_v12 = vadd.f32 1.0, %v3147_v11 }
 0x2db   : > { %3150 = vrcp.f32 %v2947_v12 }
 0x2e6   : > { %v3149_v2 = vpop.eup %3148 }
 0x2e7   : > { %v2956_v19 = vrot.slane %v3149_v2, %v7126_v6 }
 0x2e8   : > { %v3151_v4 = vpop.eup %3150 }
 0x2e9   : > { %v2960_v45 = vrot.slane %v3151_v4, %v7126_v6 }
 0x2eb   : > { %v2963_v0 = vcombine.low %v2956_v19, %v2960_v45 }
 0x2ed   : > { %v2965_v23 = vmul.f32 %v2963_v0, %v2952_v60 }
 0x2ef   : > { %2966 = vst [vmem:[%s202_s13] sm:$0xff] %v2965_v23 }
 0x2f0   : > { %3219 = shalt.err (!%p3216_p0)
}
 0x2f1   : > { %s3220_s5 = scalar_lea.hbm %s2980_s27, 128  ;;  %s3224_s10 = scalar_lea.hbm %s5908_s3, 256 }
 0x2f2   : > { %p3221_p5 = scmp.ne.s32.totalorder %s2980_s27, %s3220_s5  ;;  %p3225_p1 = scmp.lt.s32.totalorder %s2980_s27, %s5908_s3 }
 0x2f3   : > { %p3226_p4 = scmp.lt.s32.totalorder %s3224_s10, %s3220_s5 }
 0x2f4   : > { %p3222_p9 = pnand %p3221_p5, %p7127_p3 }
 0x2f5   : > { %p3227_p6 = por %p3226_p4, %p3225_p1 }
 0x2f6   : > { %p3223_p12 = pneg %p3222_p9 }
 0x2f8   : > { %p3228_p8 = pnand %p3227_p6, %p3223_p12 }
 0x2fa   : > { %3231 = shalt.err (!%p3228_p8)
}
 0x2fb   : > { %3091 = dma.vmem_to_hbm [thread:$0]  (%p7127_p3), %s2983_s22, 128, %s2980_s27, %s2968_s28  }
 0x2fc PF: > { %s2994_s18 = sand.u32 1, %s3262_s14   ;;  %p7128_p11 = scmp.ne.s32.totalorder %s6332_s20, 0 }
 0x2fd   : > { %p7129_p7 = scmp.ge.s32.totalorder %s3274_s17, 2  ;;  %s2995_s26 = scalar_lea.sflag [#allocation5], %s2994_s18 }
 0x2ff   : > { %p3102_p10 = pnand %p7129_p7, %p7128_p11 }
 0x301   : > { %p3103_p2 = pneg %p3102_p10 }
 0x303   : > { %3257 = dma.done.wait (%p3103_p2), %s2995_s26, 128  }
 0x304   : > { %3259 = vsyncadd (%p3103_p2), %s2995_s26, 4294967168  ;;  %p18_p13 = scmp.ge.s32.totalorder %s3358_s25, 4   ;;  %s7130_s14 = smov %s3266_s15 }
 0x305   : > { %s7131_s15 = smov %s3270_s16  ;;  %s7132_s16 = smov %s3375_s6 }
 0x306   : > { %s7133_s17 = smov %s3358_s25  ;;  %20 = sbr.rel (!%p18_p13) target bundleno = 8 (0x8), region = 85 }
 0x30b   :  { %3000 = vsyncpa [#allocation4], 1 }
 0x30c   :  { %3002 = vsyncpa [#allocation4 + $0x1], 1 }
 0x30d   :  { %3003 = vsyncpa [#allocation7], 1 }
 0x30e   :  { %3004 = vsyncpa [#allocation5], 1 }
 0x30f   :  { %3006 = vsyncpa [#allocation5 + $0x1], 1 }

</bundles_post_ra>
